<compile_context>
chip_gen: v6e
topology: v6e:2x2x1
jax: 0.10.0
libtpu: 0.0.40
codegen_flags: <defaults>
</compile_context>

<pallas_src>
import functools

import jax
import jax.numpy as jnp
from jax.experimental import pallas as pl
from jax.experimental.pallas import tpu as pltpu


# ----------------------------------------------------------------------------
# Pallas kernel: one time chunk of the fused fwd+bwd LSTM recurrence.
# Grid axis 0 walks time chunks (fwd forward in time, bwd backward in time);
# h/c for both directions are carried across grid steps in VMEM scratch.
# ----------------------------------------------------------------------------
def _bilstm_chunk_kernel(gxf_ref, gxb_ref, whh_ref, outf_ref, outb_ref,
                         hf_sc, cf_sc, hb_sc, cb_sc):
    """gxf_ref: (tT, B, 4H) bf16 fwd gate pre-activations for time chunk i.
    gxb_ref:   (tT, B, 4H) bf16 bwd gate pre-activations for chunk nT-1-i.
    whh_ref:   (2H, 8H) bf16 block-diagonal fused recurrent weights.
    outf_ref:  (tT, B, H) f32 forward hidden states for chunk i.
    outb_ref:  (tT, B, H) f32 backward hidden states for chunk nT-1-i.
    *_sc:      (B, H) f32 scratch carrying h/c across grid steps."""
    tT = gxf_ref.shape[0]
    H = outf_ref.shape[-1]

    @pl.when(pl.program_id(0) == 0)
    def _():
        hf_sc[...] = jnp.zeros_like(hf_sc)
        cf_sc[...] = jnp.zeros_like(cf_sc)
        hb_sc[...] = jnp.zeros_like(hb_sc)
        cb_sc[...] = jnp.zeros_like(cb_sc)

    def cell(gates, c_prev):
        # PyTorch gate order: i, f, g, o.  H is lane-aligned => free slices.
        i_g = jax.nn.sigmoid(gates[:, 0 * H:1 * H])
        f_g = jax.nn.sigmoid(gates[:, 1 * H:2 * H])
        g_g = jnp.tanh(gates[:, 2 * H:3 * H])
        o_g = jax.nn.sigmoid(gates[:, 3 * H:4 * H])
        c_new = f_g * c_prev + i_g * g_g
        h_new = o_g * jnp.tanh(c_new)
        return h_new, c_new

    def step(t, carry):
        h_f, c_f, h_b, c_b = carry
        tb = tT - 1 - t
        # One fused recurrent matmul for both directions.  The weight read
        # stays inside the step so it is streamed from VMEM (not pinned in
        # vregs); result is f32-accumulated.
        h_cat = jnp.concatenate([h_f, h_b], axis=-1).astype(jnp.bfloat16)
        d = jnp.dot(h_cat, whh_ref[...], preferred_element_type=jnp.float32)
        g_f = gxf_ref[t].astype(jnp.float32) + d[:, 0:4 * H]
        g_b = gxb_ref[tb].astype(jnp.float32) + d[:, 4 * H:8 * H]
        h_f, c_f = cell(g_f, c_f)
        h_b, c_b = cell(g_b, c_b)
        outf_ref[t] = h_f
        outb_ref[tb] = h_b
        return h_f, c_f, h_b, c_b

    init = (hf_sc[...], cf_sc[...], hb_sc[...], cb_sc[...])
    h_f, c_f, h_b, c_b = jax.lax.fori_loop(
        0, tT, step, init, unroll=min(tT, 8))

    hf_sc[...] = h_f
    cf_sc[...] = c_f
    hb_sc[...] = h_b
    cb_sc[...] = c_b


def _bilstm_recurrence(gx, whh_fused, hidden, time_chunk):
    """Run the time-chunked recurrence.  gx: (T, B, 8H) bf16 fused gate
    pre-activations ([:, :, :4H] fwd, [:, :, 4H:] bwd).  Returns
    (out_f, out_b), each (T, B, H) f32."""
    T, B, G = gx.shape
    H = hidden
    assert G == 8 * H

    tT = time_chunk
    if T % tT != 0:
        # TODO(synk): pad T to a multiple of the chunk for ragged lengths.
        tT = T
    nT = T // tT

    grid_spec = pltpu.PrefetchScalarGridSpec(
        num_scalar_prefetch=0,
        grid=(nT,),
        in_specs=[
            # fwd gate chunk i  (columns [0:4H] of gx)
            pl.BlockSpec((tT, B, 4 * H), lambda i: (i, 0, 0)),
            # bwd gate chunk nT-1-i (columns [4H:8H] of gx)
            pl.BlockSpec((tT, B, 4 * H), lambda i: (nT - 1 - i, 0, 1)),
            # fused block-diagonal recurrent weights, resident across steps
            pl.BlockSpec((2 * H, 8 * H), lambda i: (0, 0)),
        ],
        out_specs=[
            pl.BlockSpec((tT, B, H), lambda i: (i, 0, 0)),
            pl.BlockSpec((tT, B, H), lambda i: (nT - 1 - i, 0, 0)),
        ],
        scratch_shapes=[pltpu.VMEM((B, H), jnp.float32)] * 4,
    )

    out_f, out_b = pl.pallas_call(
        _bilstm_chunk_kernel,
        grid_spec=grid_spec,
        out_shape=(jax.ShapeDtypeStruct((T, B, H), jnp.float32),
                   jax.ShapeDtypeStruct((T, B, H), jnp.float32)),
        compiler_params=pltpu.CompilerParams(
            # Serial recurrence carried in scratch across the grid.
            dimension_semantics=("arbitrary",),
            # Explicit limit: above the 16/32 MiB defaults, under physical
            # VMEM on v5e/v6e (128 MiB) and v7x (64 MiB) with headroom.
            vmem_limit_bytes=40 * 1024 * 1024,
        ),
    )(gx, gx, whh_fused)
    return out_f, out_b


def bilstm_time_major(x_tbd, p, time_chunk):
    """One bidirectional LSTM layer, time-major: (T, B, Din) -> (T, B, 2H)."""
    H = p["w_hh_f"].shape[1]
    x_bf = x_tbd.astype(jnp.bfloat16)

    # Fused input projection for both directions: one big MXU matmul outside
    # the serial recurrence, bias folded in, stored bf16.
    wih_cat = jnp.concatenate(
        [jnp.transpose(p["w_ih_f"]), jnp.transpose(p["w_ih_b"])], axis=1
    ).astype(jnp.bfloat16)                                      # (Din, 8H)
    bias_cat = jnp.concatenate(
        [p["b_ih_f"] + p["b_hh_f"], p["b_ih_b"] + p["b_hh_b"]]
    ).astype(jnp.float32)                                       # (8H,)
    gx = (jnp.einsum("tbd,dg->tbg", x_bf, wih_cat,
                     preferred_element_type=jnp.float32)
          + bias_cat).astype(jnp.bfloat16)                      # (T, B, 8H)

    # Block-diagonal fused recurrent weight (2H, 8H): rows [0:H] are h_f,
    # rows [H:2H] are h_b; columns [0:4H] fwd gates, [4H:8H] bwd gates.
    whh_f_t = jnp.transpose(p["w_hh_f"])                        # (H, 4H)
    whh_b_t = jnp.transpose(p["w_hh_b"])
    whh_fused = jnp.zeros((2 * H, 8 * H), jnp.float32)
    whh_fused = whh_fused.at[:H, :4 * H].set(whh_f_t)
    whh_fused = whh_fused.at[H:, 4 * H:].set(whh_b_t)
    whh_fused = whh_fused.astype(jnp.bfloat16)

    out_f, out_b = _bilstm_recurrence(gx, whh_fused, H, time_chunk)
    return jnp.concatenate([out_f, out_b], axis=-1)             # (T, B, 2H)


# ----------------------------------------------------------------------------
# MTLSTM wrapper (mirrors the PyTorch module's forward)
# ----------------------------------------------------------------------------
def init_bilstm_params(key, input_size, hidden_size):
    """Deterministic init matching nn.LSTM's uniform(-1/sqrt(H), 1/sqrt(H))."""
    k = 1.0 / jnp.sqrt(jnp.float32(hidden_size))
    names_shapes = [
        ("w_ih_f", (4 * hidden_size, input_size)),
        ("w_hh_f", (4 * hidden_size, hidden_size)),
        ("b_ih_f", (4 * hidden_size,)),
        ("b_hh_f", (4 * hidden_size,)),
        ("w_ih_b", (4 * hidden_size, input_size)),
        ("w_hh_b", (4 * hidden_size, hidden_size)),
        ("b_ih_b", (4 * hidden_size,)),
        ("b_hh_b", (4 * hidden_size,)),
    ]
    keys = jax.random.split(key, len(names_shapes))
    return {
        name: jax.random.uniform(kk, shape, jnp.float32, minval=-k, maxval=k)
        for kk, (name, shape) in zip(keys, names_shapes)
    }


@functools.partial(jax.jit, static_argnames=("time_chunk",))
def _mtlstm_forward(rnn1, rnn2, inputs, time_chunk):
    # One transpose in, two transposes out; the whole pipeline is time-major.
    x_tbd = jnp.transpose(inputs, (1, 0, 2))            # (T, B, D)
    out1_tm = bilstm_time_major(x_tbd, rnn1, time_chunk)  # (T, B, 2H)
    out2_tm = bilstm_time_major(out1_tm, rnn2, time_chunk)
    return (jnp.transpose(out1_tm, (1, 0, 2)),
            jnp.transpose(out2_tm, (1, 0, 2)))


class MTLSTM:
    """JAX/Pallas equivalent of the PyTorch MTLSTM forward pass.

    rnn1: BiLSTM(input_size -> hidden), output 2*hidden
    rnn2: BiLSTM(2*hidden   -> hidden), output 2*hidden
    forward(inputs, x_mask, hidden=None) -> [outputs1, outputs2]
    """

    def __init__(self, key, input_size=128, hidden_size=128, time_chunk=4):
        k1, k2 = jax.random.split(key)
        self.rnn1 = init_bilstm_params(k1, input_size, hidden_size)
        self.rnn2 = init_bilstm_params(k2, 2 * hidden_size, hidden_size)
        self.time_chunk = time_chunk

    def __call__(self, inputs, x_mask, hidden=None):
        # The active PyTorch forward ignores x_mask (packing is commented out)
        # and hidden=None means zero initial state, which the kernel uses.
        # TODO(synk): honor x_mask / non-None hidden for padded batches.
        del x_mask, hidden
        out1, out2 = _mtlstm_forward(self.rnn1, self.rnn2, inputs,
                                     self.time_chunk)
        return [out1, out2]

    # TODO(synk): load_cove (checkpoint loading from a .pt file) omitted.


# ----------------------------------------------------------------------------
# Pure-JAX references (lax.scan) for correctness spot-checks.
# ----------------------------------------------------------------------------
def _ref_lstm_dir(x_tbd, w_ih, w_hh, b_ih, b_hh, matmul_dtype):
    T, B, D = x_tbd.shape
    H = w_hh.shape[1]
    wih_t = jnp.transpose(w_ih).astype(matmul_dtype)
    whh_t = jnp.transpose(w_hh).astype(matmul_dtype)
    bias = (b_ih + b_hh).astype(jnp.float32)
    gx = jnp.einsum("tbd,dg->tbg", x_tbd.astype(matmul_dtype), wih_t,
                    preferred_element_type=jnp.float32) + bias
    if matmul_dtype == jnp.bfloat16:
        # Mirror the kernel's bf16 storage of gate pre-activations.
        gx = gx.astype(jnp.bfloat16).astype(jnp.float32)

    def step(carry, gx_t):
        h, c = carry
        g = gx_t + jnp.dot(h.astype(matmul_dtype), whh_t,
                           preferred_element_type=jnp.float32)
        i = jax.nn.sigmoid(g[:, 0 * H:1 * H])
        f = jax.nn.sigmoid(g[:, 1 * H:2 * H])
        gg = jnp.tanh(g[:, 2 * H:3 * H])
        o = jax.nn.sigmoid(g[:, 3 * H:4 * H])
        c = f * c + i * gg
        h = o * jnp.tanh(c)
        return (h, c), h

    init = (jnp.zeros((B, H), jnp.float32), jnp.zeros((B, H), jnp.float32))
    _, hs = jax.lax.scan(step, init, gx)
    return hs


def _ref_bilstm(x_btd, p, matmul_dtype=jnp.float32):
    x_tbd = jnp.transpose(x_btd, (1, 0, 2))
    fwd = _ref_lstm_dir(x_tbd, p["w_ih_f"], p["w_hh_f"],
                        p["b_ih_f"], p["b_hh_f"], matmul_dtype)
    bwd = _ref_lstm_dir(jnp.flip(x_tbd, 0), p["w_ih_b"], p["w_hh_b"],
                        p["b_ih_b"], p["b_hh_b"], matmul_dtype)
    bwd = jnp.flip(bwd, 0)
    return jnp.transpose(jnp.concatenate([fwd, bwd], -1), (1, 0, 2))


if __name__ == "__main__":
    B, T, D_IN, H = 8, 8, 128, 128

    key = jax.random.PRNGKey(0)
    k_param, k_x = jax.random.split(key)

    # time_chunk=4 -> 2 grid steps, exercising the cross-chunk h/c carry and
    # the reversed backward-direction index_map.
    model = MTLSTM(k_param, input_size=D_IN, hidden_size=H, time_chunk=4)

    inputs = jax.random.normal(k_x, (B, T, D_IN), dtype=jnp.float32)
    x_mask = jnp.zeros((B, T), dtype=jnp.int32)  # unused by forward

    out1, out2 = model(inputs, x_mask, hidden=None)
    out1 = jax.block_until_ready(out1)
    out2 = jax.block_until_ready(out2)

    assert out1.shape == (B, T, 2 * H)
    assert out2.shape == (B, T, 2 * H)

    # Reference mirroring the kernel's numerics (bf16 matmuls + bf16 gx
    # storage, f32 accumulation / carries).
    ref1_bf = _ref_bilstm(inputs, model.rnn1, jnp.bfloat16)
    ref2_bf = _ref_bilstm(ref1_bf, model.rnn2, jnp.bfloat16)
    assert jnp.allclose(out1, ref1_bf, atol=5e-3, rtol=5e-3)
    assert jnp.allclose(out2, ref2_bf, atol=5e-3, rtol=5e-3)

    # Looser sanity check against a full-f32 reference (PyTorch-style math);
    # slack covers bf16 matmuls plus bf16 gate-preactivation storage.
    ref1_f32 = _ref_bilstm(inputs, model.rnn1, jnp.float32)
    ref2_f32 = _ref_bilstm(ref1_f32, model.rnn2, jnp.float32)
    assert jnp.allclose(out1, ref1_f32, atol=8e-2, rtol=8e-2)
    assert jnp.allclose(out2, ref2_f32, atol=8e-2, rtol=8e-2)

    print("KERNEL_OK")
</pallas_src>

<mosaic_0001>
module attributes {stable_mosaic.version = 11 : i64} {
  func.func @_bilstm_chunk_kernel(%arg0: i32, %arg1: memref<4x8x512xbf16, #tpu.memory_space<vmem>>, %arg2: memref<4x8x512xbf16, #tpu.memory_space<vmem>>, %arg3: memref<256x1024xbf16, #tpu.memory_space<vmem>>, %arg4: memref<4x8x128xf32, #tpu.memory_space<vmem>>, %arg5: memref<4x8x128xf32, #tpu.memory_space<vmem>>, %arg6: memref<8x128xf32, #tpu.memory_space<vmem>>, %arg7: memref<8x128xf32, #tpu.memory_space<vmem>>, %arg8: memref<8x128xf32, #tpu.memory_space<vmem>>, %arg9: memref<8x128xf32, #tpu.memory_space<vmem>>) attributes {dimension_semantics = [#tpu.dimension_semantics<arbitrary>], iteration_bounds = array<i64: 2>, scalar_prefetch = 0 : i64, scratch_operands = 4 : i64, tpu.core_type = #tpu.core_type<tc>, window_params = [{transform_indices = @transform_0, window_bounds = array<i64: 4, 8, 512>}, {transform_indices = @transform_1, window_bounds = array<i64: 4, 8, 512>}, {pipeline_mode = #tpu.pipeline_mode<synchronous>, transform_indices = @transform_2, window_bounds = array<i64: 256, 1024>}, {transform_indices = @transform_3, window_bounds = array<i64: 4, 8, 128>}, {transform_indices = @transform_4, window_bounds = array<i64: 4, 8, 128>}]} {
    %c0_i32 = arith.constant 0 : i32
    %0 = arith.cmpi eq, %arg0, %c0_i32 : i32
    %1 = arith.extui %0 : i1 to i32
    %c0_i32_0 = arith.constant 0 : i32
    %2 = arith.cmpi ne, %1, %c0_i32_0 : i32
    scf.if %2 {
      %cst_88 = arith.constant 0.000000e+00 : f32
      %311 = vector.broadcast %cst_88 : f32 to vector<8x128xf32>
      %c0_89 = arith.constant 0 : index
      %c0_90 = arith.constant 0 : index
      %312 = vector.load %arg6[%c0_89, %c0_90] : memref<8x128xf32, #tpu.memory_space<vmem>>, vector<8x128xf32>
      tpu.vector_store %arg6[%c0_89, %c0_90], %311 {strides = array<i32>} : memref<8x128xf32, #tpu.memory_space<vmem>>, vector<8x128xf32>,
      %cst_91 = arith.constant 0.000000e+00 : f32
      %313 = vector.broadcast %cst_91 : f32 to vector<8x128xf32>
      %c0_92 = arith.constant 0 : index
      %c0_93 = arith.constant 0 : index
      %314 = vector.load %arg7[%c0_92, %c0_93] : memref<8x128xf32, #tpu.memory_space<vmem>>, vector<8x128xf32>
      tpu.vector_store %arg7[%c0_92, %c0_93], %313 {strides = array<i32>} : memref<8x128xf32, #tpu.memory_space<vmem>>, vector<8x128xf32>,
      %cst_94 = arith.constant 0.000000e+00 : f32
      %315 = vector.broadcast %cst_94 : f32 to vector<8x128xf32>
      %c0_95 = arith.constant 0 : index
      %c0_96 = arith.constant 0 : index
      %316 = vector.load %arg8[%c0_95, %c0_96] : memref<8x128xf32, #tpu.memory_space<vmem>>, vector<8x128xf32>
      tpu.vector_store %arg8[%c0_95, %c0_96], %315 {strides = array<i32>} : memref<8x128xf32, #tpu.memory_space<vmem>>, vector<8x128xf32>,
      %cst_97 = arith.constant 0.000000e+00 : f32
      %317 = vector.broadcast %cst_97 : f32 to vector<8x128xf32>
      %c0_98 = arith.constant 0 : index
      %c0_99 = arith.constant 0 : index
      %318 = vector.load %arg9[%c0_98, %c0_99] : memref<8x128xf32, #tpu.memory_space<vmem>>, vector<8x128xf32>
      tpu.vector_store %arg9[%c0_98, %c0_99], %317 {strides = array<i32>} : memref<8x128xf32, #tpu.memory_space<vmem>>, vector<8x128xf32>,
    } else {
    }
    %c0 = arith.constant 0 : index
    %c0_1 = arith.constant 0 : index
    %3 = vector.load %arg6[%c0, %c0_1] : memref<8x128xf32, #tpu.memory_space<vmem>>, vector<8x128xf32>
    %c0_2 = arith.constant 0 : index
    %c0_3 = arith.constant 0 : index
    %4 = vector.load %arg7[%c0_2, %c0_3] : memref<8x128xf32, #tpu.memory_space<vmem>>, vector<8x128xf32>
    %c0_4 = arith.constant 0 : index
    %c0_5 = arith.constant 0 : index
    %5 = vector.load %arg8[%c0_4, %c0_5] : memref<8x128xf32, #tpu.memory_space<vmem>>, vector<8x128xf32>
    %c0_6 = arith.constant 0 : index
    %c0_7 = arith.constant 0 : index
    %6 = vector.load %arg9[%c0_6, %c0_7] : memref<8x128xf32, #tpu.memory_space<vmem>>, vector<8x128xf32>
    %c0_i32_8 = arith.constant 0 : i32
    %c3_i32 = arith.constant 3 : i32
    %7 = arith.subi %c3_i32, %c0_i32_8 : i32
    %8 = tpu.concatenate %3, %5 in 1 : vector<8x128xf32>, vector<8x128xf32> -> vector<8x256xf32>
    %9 = arith.truncf %8 : vector<8x256xf32> to vector<8x256xbf16>
    %c0_9 = arith.constant 0 : index
    %c0_10 = arith.constant 0 : index
    %10 = vector.load %arg3[%c0_9, %c0_10] : memref<256x1024xbf16, #tpu.memory_space<vmem>>, vector<256x1024xbf16>
    %cst = arith.constant dense<0.000000e+00> : vector<8x1024xf32>
    %11 = tpu.matmul %9, %10, %cst {dimension_numbers = #tpu.dot_dimension_numbers<[1], [0], [0], [1], [0, 0, 1, 1], [], []>} : vector<8x256xbf16>, vector<256x1024xbf16>, vector<8x1024xf32> -> vector<8x1024xf32>
    %12 = arith.index_cast %c0_i32_8 : i32 to index
    %c0_11 = arith.constant 0 : index
    %c0_12 = arith.constant 0 : index
    %13 = vector.load %arg1[%12, %c0_11, %c0_12] : memref<4x8x512xbf16, #tpu.memory_space<vmem>>, vector<1x8x512xbf16>
    %14 = vector.shape_cast %13 : vector<1x8x512xbf16> to vector<8x512xbf16>
    %15 = arith.extf %14 : vector<8x512xbf16> to vector<8x512xf32>
    %16 = vector.extract_strided_slice %11 {offsets = [0, 0], sizes = [8, 512], strides = [1, 1]} : vector<8x1024xf32> to vector<8x512xf32>
    %17 = arith.addf %15, %16 : vector<8x512xf32>
    %18 = arith.index_cast %7 : i32 to index
    %c0_13 = arith.constant 0 : index
    %c0_14 = arith.constant 0 : index
    %19 = vector.load %arg2[%18, %c0_13, %c0_14] : memref<4x8x512xbf16, #tpu.memory_space<vmem>>, vector<1x8x512xbf16>
    %20 = vector.shape_cast %19 : vector<1x8x512xbf16> to vector<8x512xbf16>
    %21 = arith.extf %20 : vector<8x512xbf16> to vector<8x512xf32>
    %22 = vector.extract_strided_slice %11 {offsets = [0, 512], sizes = [8, 512], strides = [1, 1]} : vector<8x1024xf32> to vector<8x512xf32>
    %23 = arith.addf %21, %22 : vector<8x512xf32>
    %24 = vector.extract_strided_slice %17 {offsets = [0, 0], sizes = [8, 128], strides = [1, 1]} : vector<8x512xf32> to vector<8x128xf32>
    %25 = arith.negf %24 : vector<8x128xf32>
    %26 = math.exp %25 : vector<8x128xf32>
    %cst_15 = arith.constant 1.000000e+00 : f32
    %27 = vector.broadcast %cst_15 : f32 to vector<8x128xf32>
    %28 = arith.addf %27, %26 : vector<8x128xf32>
    %29 = arith.divf %27, %28 : vector<8x128xf32>
    %30 = vector.extract_strided_slice %17 {offsets = [0, 128], sizes = [8, 128], strides = [1, 1]} : vector<8x512xf32> to vector<8x128xf32>
    %31 = arith.negf %30 : vector<8x128xf32>
    %32 = math.exp %31 : vector<8x128xf32>
    %cst_16 = arith.constant 1.000000e+00 : f32
    %33 = vector.broadcast %cst_16 : f32 to vector<8x128xf32>
    %34 = arith.addf %33, %32 : vector<8x128xf32>
    %35 = arith.divf %33, %34 : vector<8x128xf32>
    %36 = vector.extract_strided_slice %17 {offsets = [0, 256], sizes = [8, 128], strides = [1, 1]} : vector<8x512xf32> to vector<8x128xf32>
    %37 = math.tanh %36 : vector<8x128xf32>
    %38 = vector.extract_strided_slice %17 {offsets = [0, 384], sizes = [8, 128], strides = [1, 1]} : vector<8x512xf32> to vector<8x128xf32>
    %39 = arith.negf %38 : vector<8x128xf32>
    %40 = math.exp %39 : vector<8x128xf32>
    %cst_17 = arith.constant 1.000000e+00 : f32
    %41 = vector.broadcast %cst_17 : f32 to vector<8x128xf32>
    %42 = arith.addf %41, %40 : vector<8x128xf32>
    %43 = arith.divf %41, %42 : vector<8x128xf32>
    %44 = arith.mulf %35, %4 : vector<8x128xf32>
    %45 = arith.mulf %29, %37 : vector<8x128xf32>
    %46 = arith.addf %44, %45 : vector<8x128xf32>
    %47 = math.tanh %46 : vector<8x128xf32>
    %48 = arith.mulf %43, %47 : vector<8x128xf32>
    %49 = vector.extract_strided_slice %23 {offsets = [0, 0], sizes = [8, 128], strides = [1, 1]} : vector<8x512xf32> to vector<8x128xf32>
    %50 = arith.negf %49 : vector<8x128xf32>
    %51 = math.exp %50 : vector<8x128xf32>
    %cst_18 = arith.constant 1.000000e+00 : f32
    %52 = vector.broadcast %cst_18 : f32 to vector<8x128xf32>
    %53 = arith.addf %52, %51 : vector<8x128xf32>
    %54 = arith.divf %52, %53 : vector<8x128xf32>
    %55 = vector.extract_strided_slice %23 {offsets = [0, 128], sizes = [8, 128], strides = [1, 1]} : vector<8x512xf32> to vector<8x128xf32>
    %56 = arith.negf %55 : vector<8x128xf32>
    %57 = math.exp %56 : vector<8x128xf32>
    %cst_19 = arith.constant 1.000000e+00 : f32
    %58 = vector.broadcast %cst_19 : f32 to vector<8x128xf32>
    %59 = arith.addf %58, %57 : vector<8x128xf32>
    %60 = arith.divf %58, %59 : vector<8x128xf32>
    %61 = vector.extract_strided_slice %23 {offsets = [0, 256], sizes = [8, 128], strides = [1, 1]} : vector<8x512xf32> to vector<8x128xf32>
    %62 = math.tanh %61 : vector<8x128xf32>
    %63 = vector.extract_strided_slice %23 {offsets = [0, 384], sizes = [8, 128], strides = [1, 1]} : vector<8x512xf32> to vector<8x128xf32>
    %64 = arith.negf %63 : vector<8x128xf32>
    %65 = math.exp %64 : vector<8x128xf32>
    %cst_20 = arith.constant 1.000000e+00 : f32
    %66 = vector.broadcast %cst_20 : f32 to vector<8x128xf32>
    %67 = arith.addf %66, %65 : vector<8x128xf32>
    %68 = arith.divf %66, %67 : vector<8x128xf32>
    %69 = arith.mulf %60, %6 : vector<8x128xf32>
    %70 = arith.mulf %54, %62 : vector<8x128xf32>
    %71 = arith.addf %69, %70 : vector<8x128xf32>
    %72 = math.tanh %71 : vector<8x128xf32>
    %73 = arith.mulf %68, %72 : vector<8x128xf32>
    %74 = arith.index_cast %c0_i32_8 : i32 to index
    %c0_21 = arith.constant 0 : index
    %c0_22 = arith.constant 0 : index
    %75 = vector.load %arg4[%74, %c0_21, %c0_22] : memref<4x8x128xf32, #tpu.memory_space<vmem>>, vector<1x8x128xf32>
    %76 = vector.shape_cast %75 : vector<1x8x128xf32> to vector<8x128xf32>
    %77 = vector.shape_cast %48 : vector<8x128xf32> to vector<1x8x128xf32>
    tpu.vector_store %arg4[%74, %c0_21, %c0_22], %77 {strides = array<i32>} : memref<4x8x128xf32, #tpu.memory_space<vmem>>, vector<1x8x128xf32>,
    %78 = arith.index_cast %7 : i32 to index
    %c0_23 = arith.constant 0 : index
    %c0_24 = arith.constant 0 : index
    %79 = vector.load %arg5[%78, %c0_23, %c0_24] : memref<4x8x128xf32, #tpu.memory_space<vmem>>, vector<1x8x128xf32>
    %80 = vector.shape_cast %79 : vector<1x8x128xf32> to vector<8x128xf32>
    %81 = vector.shape_cast %73 : vector<8x128xf32> to vector<1x8x128xf32>
    tpu.vector_store %arg5[%78, %c0_23, %c0_24], %81 {strides = array<i32>} : memref<4x8x128xf32, #tpu.memory_space<vmem>>, vector<1x8x128xf32>,
    %c1_i32 = arith.constant 1 : i32
    %c3_i32_25 = arith.constant 3 : i32
    %82 = arith.subi %c3_i32_25, %c1_i32 : i32
    %83 = tpu.concatenate %48, %73 in 1 : vector<8x128xf32>, vector<8x128xf32> -> vector<8x256xf32>
    %84 = arith.truncf %83 : vector<8x256xf32> to vector<8x256xbf16>
    %c0_26 = arith.constant 0 : index
    %c0_27 = arith.constant 0 : index
    %85 = vector.load %arg3[%c0_26, %c0_27] : memref<256x1024xbf16, #tpu.memory_space<vmem>>, vector<256x1024xbf16>
    %cst_28 = arith.constant dense<0.000000e+00> : vector<8x1024xf32>
    %86 = tpu.matmul %84, %85, %cst_28 {dimension_numbers = #tpu.dot_dimension_numbers<[1], [0], [0], [1], [0, 0, 1, 1], [], []>} : vector<8x256xbf16>, vector<256x1024xbf16>, vector<8x1024xf32> -> vector<8x1024xf32>
    %87 = arith.index_cast %c1_i32 : i32 to index
    %c0_29 = arith.constant 0 : index
    %c0_30 = arith.constant 0 : index
    %88 = vector.load %arg1[%87, %c0_29, %c0_30] : memref<4x8x512xbf16, #tpu.memory_space<vmem>>, vector<1x8x512xbf16>
    %89 = vector.shape_cast %88 : vector<1x8x512xbf16> to vector<8x512xbf16>
    %90 = arith.extf %89 : vector<8x512xbf16> to vector<8x512xf32>
    %91 = vector.extract_strided_slice %86 {offsets = [0, 0], sizes = [8, 512], strides = [1, 1]} : vector<8x1024xf32> to vector<8x512xf32>
    %92 = arith.addf %90, %91 : vector<8x512xf32>
    %93 = arith.index_cast %82 : i32 to index
    %c0_31 = arith.constant 0 : index
    %c0_32 = arith.constant 0 : index
    %94 = vector.load %arg2[%93, %c0_31, %c0_32] : memref<4x8x512xbf16, #tpu.memory_space<vmem>>, vector<1x8x512xbf16>
    %95 = vector.shape_cast %94 : vector<1x8x512xbf16> to vector<8x512xbf16>
    %96 = arith.extf %95 : vector<8x512xbf16> to vector<8x512xf32>
    %97 = vector.extract_strided_slice %86 {offsets = [0, 512], sizes = [8, 512], strides = [1, 1]} : vector<8x1024xf32> to vector<8x512xf32>
    %98 = arith.addf %96, %97 : vector<8x512xf32>
    %99 = vector.extract_strided_slice %92 {offsets = [0, 0], sizes = [8, 128], strides = [1, 1]} : vector<8x512xf32> to vector<8x128xf32>
    %100 = arith.negf %99 : vector<8x128xf32>
    %101 = math.exp %100 : vector<8x128xf32>
    %cst_33 = arith.constant 1.000000e+00 : f32
    %102 = vector.broadcast %cst_33 : f32 to vector<8x128xf32>
    %103 = arith.addf %102, %101 : vector<8x128xf32>
    %104 = arith.divf %102, %103 : vector<8x128xf32>
    %105 = vector.extract_strided_slice %92 {offsets = [0, 128], sizes = [8, 128], strides = [1, 1]} : vector<8x512xf32> to vector<8x128xf32>
    %106 = arith.negf %105 : vector<8x128xf32>
    %107 = math.exp %106 : vector<8x128xf32>
    %cst_34 = arith.constant 1.000000e+00 : f32
    %108 = vector.broadcast %cst_34 : f32 to vector<8x128xf32>
    %109 = arith.addf %108, %107 : vector<8x128xf32>
    %110 = arith.divf %108, %109 : vector<8x128xf32>
    %111 = vector.extract_strided_slice %92 {offsets = [0, 256], sizes = [8, 128], strides = [1, 1]} : vector<8x512xf32> to vector<8x128xf32>
    %112 = math.tanh %111 : vector<8x128xf32>
    %113 = vector.extract_strided_slice %92 {offsets = [0, 384], sizes = [8, 128], strides = [1, 1]} : vector<8x512xf32> to vector<8x128xf32>
    %114 = arith.negf %113 : vector<8x128xf32>
    %115 = math.exp %114 : vector<8x128xf32>
    %cst_35 = arith.constant 1.000000e+00 : f32
    %116 = vector.broadcast %cst_35 : f32 to vector<8x128xf32>
    %117 = arith.addf %116, %115 : vector<8x128xf32>
    %118 = arith.divf %116, %117 : vector<8x128xf32>
    %119 = arith.mulf %110, %46 : vector<8x128xf32>
    %120 = arith.mulf %104, %112 : vector<8x128xf32>
    %121 = arith.addf %119, %120 : vector<8x128xf32>
    %122 = math.tanh %121 : vector<8x128xf32>
    %123 = arith.mulf %118, %122 : vector<8x128xf32>
    %124 = vector.extract_strided_slice %98 {offsets = [0, 0], sizes = [8, 128], strides = [1, 1]} : vector<8x512xf32> to vector<8x128xf32>
    %125 = arith.negf %124 : vector<8x128xf32>
    %126 = math.exp %125 : vector<8x128xf32>
    %cst_36 = arith.constant 1.000000e+00 : f32
    %127 = vector.broadcast %cst_36 : f32 to vector<8x128xf32>
    %128 = arith.addf %127, %126 : vector<8x128xf32>
    %129 = arith.divf %127, %128 : vector<8x128xf32>
    %130 = vector.extract_strided_slice %98 {offsets = [0, 128], sizes = [8, 128], strides = [1, 1]} : vector<8x512xf32> to vector<8x128xf32>
    %131 = arith.negf %130 : vector<8x128xf32>
    %132 = math.exp %131 : vector<8x128xf32>
    %cst_37 = arith.constant 1.000000e+00 : f32
    %133 = vector.broadcast %cst_37 : f32 to vector<8x128xf32>
    %134 = arith.addf %133, %132 : vector<8x128xf32>
    %135 = arith.divf %133, %134 : vector<8x128xf32>
    %136 = vector.extract_strided_slice %98 {offsets = [0, 256], sizes = [8, 128], strides = [1, 1]} : vector<8x512xf32> to vector<8x128xf32>
    %137 = math.tanh %136 : vector<8x128xf32>
    %138 = vector.extract_strided_slice %98 {offsets = [0, 384], sizes = [8, 128], strides = [1, 1]} : vector<8x512xf32> to vector<8x128xf32>
    %139 = arith.negf %138 : vector<8x128xf32>
    %140 = math.exp %139 : vector<8x128xf32>
    %cst_38 = arith.constant 1.000000e+00 : f32
    %141 = vector.broadcast %cst_38 : f32 to vector<8x128xf32>
    %142 = arith.addf %141, %140 : vector<8x128xf32>
    %143 = arith.divf %141, %142 : vector<8x128xf32>
    %144 = arith.mulf %135, %71 : vector<8x128xf32>
    %145 = arith.mulf %129, %137 : vector<8x128xf32>
    %146 = arith.addf %144, %145 : vector<8x128xf32>
    %147 = math.tanh %146 : vector<8x128xf32>
    %148 = arith.mulf %143, %147 : vector<8x128xf32>
    %149 = arith.index_cast %c1_i32 : i32 to index
    %c0_39 = arith.constant 0 : index
    %c0_40 = arith.constant 0 : index
    %150 = vector.load %arg4[%149, %c0_39, %c0_40] : memref<4x8x128xf32, #tpu.memory_space<vmem>>, vector<1x8x128xf32>
    %151 = vector.shape_cast %150 : vector<1x8x128xf32> to vector<8x128xf32>
    %152 = vector.shape_cast %123 : vector<8x128xf32> to vector<1x8x128xf32>
    tpu.vector_store %arg4[%149, %c0_39, %c0_40], %152 {strides = array<i32>} : memref<4x8x128xf32, #tpu.memory_space<vmem>>, vector<1x8x128xf32>,
    %153 = arith.index_cast %82 : i32 to index
    %c0_41 = arith.constant 0 : index
    %c0_42 = arith.constant 0 : index
    %154 = vector.load %arg5[%153, %c0_41, %c0_42] : memref<4x8x128xf32, #tpu.memory_space<vmem>>, vector<1x8x128xf32>
    %155 = vector.shape_cast %154 : vector<1x8x128xf32> to vector<8x128xf32>
    %156 = vector.shape_cast %148 : vector<8x128xf32> to vector<1x8x128xf32>
    tpu.vector_store %arg5[%153, %c0_41, %c0_42], %156 {strides = array<i32>} : memref<4x8x128xf32, #tpu.memory_space<vmem>>, vector<1x8x128xf32>,
    %c2_i32 = arith.constant 2 : i32
    %c3_i32_43 = arith.constant 3 : i32
    %157 = arith.subi %c3_i32_43, %c2_i32 : i32
    %158 = tpu.concatenate %123, %148 in 1 : vector<8x128xf32>, vector<8x128xf32> -> vector<8x256xf32>
    %159 = arith.truncf %158 : vector<8x256xf32> to vector<8x256xbf16>
    %c0_44 = arith.constant 0 : index
    %c0_45 = arith.constant 0 : index
    %160 = vector.load %arg3[%c0_44, %c0_45] : memref<256x1024xbf16, #tpu.memory_space<vmem>>, vector<256x1024xbf16>
    %cst_46 = arith.constant dense<0.000000e+00> : vector<8x1024xf32>
    %161 = tpu.matmul %159, %160, %cst_46 {dimension_numbers = #tpu.dot_dimension_numbers<[1], [0], [0], [1], [0, 0, 1, 1], [], []>} : vector<8x256xbf16>, vector<256x1024xbf16>, vector<8x1024xf32> -> vector<8x1024xf32>
    %162 = arith.index_cast %c2_i32 : i32 to index
    %c0_47 = arith.constant 0 : index
    %c0_48 = arith.constant 0 : index
    %163 = vector.load %arg1[%162, %c0_47, %c0_48] : memref<4x8x512xbf16, #tpu.memory_space<vmem>>, vector<1x8x512xbf16>
    %164 = vector.shape_cast %163 : vector<1x8x512xbf16> to vector<8x512xbf16>
    %165 = arith.extf %164 : vector<8x512xbf16> to vector<8x512xf32>
    %166 = vector.extract_strided_slice %161 {offsets = [0, 0], sizes = [8, 512], strides = [1, 1]} : vector<8x1024xf32> to vector<8x512xf32>
    %167 = arith.addf %165, %166 : vector<8x512xf32>
    %168 = arith.index_cast %157 : i32 to index
    %c0_49 = arith.constant 0 : index
    %c0_50 = arith.constant 0 : index
    %169 = vector.load %arg2[%168, %c0_49, %c0_50] : memref<4x8x512xbf16, #tpu.memory_space<vmem>>, vector<1x8x512xbf16>
    %170 = vector.shape_cast %169 : vector<1x8x512xbf16> to vector<8x512xbf16>
    %171 = arith.extf %170 : vector<8x512xbf16> to vector<8x512xf32>
    %172 = vector.extract_strided_slice %161 {offsets = [0, 512], sizes = [8, 512], strides = [1, 1]} : vector<8x1024xf32> to vector<8x512xf32>
    %173 = arith.addf %171, %172 : vector<8x512xf32>
    %174 = vector.extract_strided_slice %167 {offsets = [0, 0], sizes = [8, 128], strides = [1, 1]} : vector<8x512xf32> to vector<8x128xf32>
    %175 = arith.negf %174 : vector<8x128xf32>
    %176 = math.exp %175 : vector<8x128xf32>
    %cst_51 = arith.constant 1.000000e+00 : f32
    %177 = vector.broadcast %cst_51 : f32 to vector<8x128xf32>
    %178 = arith.addf %177, %176 : vector<8x128xf32>
    %179 = arith.divf %177, %178 : vector<8x128xf32>
    %180 = vector.extract_strided_slice %167 {offsets = [0, 128], sizes = [8, 128], strides = [1, 1]} : vector<8x512xf32> to vector<8x128xf32>
    %181 = arith.negf %180 : vector<8x128xf32>
    %182 = math.exp %181 : vector<8x128xf32>
    %cst_52 = arith.constant 1.000000e+00 : f32
    %183 = vector.broadcast %cst_52 : f32 to vector<8x128xf32>
    %184 = arith.addf %183, %182 : vector<8x128xf32>
    %185 = arith.divf %183, %184 : vector<8x128xf32>
    %186 = vector.extract_strided_slice %167 {offsets = [0, 256], sizes = [8, 128], strides = [1, 1]} : vector<8x512xf32> to vector<8x128xf32>
    %187 = math.tanh %186 : vector<8x128xf32>
    %188 = vector.extract_strided_slice %167 {offsets = [0, 384], sizes = [8, 128], strides = [1, 1]} : vector<8x512xf32> to vector<8x128xf32>
    %189 = arith.negf %188 : vector<8x128xf32>
    %190 = math.exp %189 : vector<8x128xf32>
    %cst_53 = arith.constant 1.000000e+00 : f32
    %191 = vector.broadcast %cst_53 : f32 to vector<8x128xf32>
    %192 = arith.addf %191, %190 : vector<8x128xf32>
    %193 = arith.divf %191, %192 : vector<8x128xf32>
    %194 = arith.mulf %185, %121 : vector<8x128xf32>
    %195 = arith.mulf %179, %187 : vector<8x128xf32>
    %196 = arith.addf %194, %195 : vector<8x128xf32>
    %197 = math.tanh %196 : vector<8x128xf32>
    %198 = arith.mulf %193, %197 : vector<8x128xf32>
    %199 = vector.extract_strided_slice %173 {offsets = [0, 0], sizes = [8, 128], strides = [1, 1]} : vector<8x512xf32> to vector<8x128xf32>
    %200 = arith.negf %199 : vector<8x128xf32>
    %201 = math.exp %200 : vector<8x128xf32>
    %cst_54 = arith.constant 1.000000e+00 : f32
    %202 = vector.broadcast %cst_54 : f32 to vector<8x128xf32>
    %203 = arith.addf %202, %201 : vector<8x128xf32>
    %204 = arith.divf %202, %203 : vector<8x128xf32>
    %205 = vector.extract_strided_slice %173 {offsets = [0, 128], sizes = [8, 128], strides = [1, 1]} : vector<8x512xf32> to vector<8x128xf32>
    %206 = arith.negf %205 : vector<8x128xf32>
    %207 = math.exp %206 : vector<8x128xf32>
    %cst_55 = arith.constant 1.000000e+00 : f32
    %208 = vector.broadcast %cst_55 : f32 to vector<8x128xf32>
    %209 = arith.addf %208, %207 : vector<8x128xf32>
    %210 = arith.divf %208, %209 : vector<8x128xf32>
    %211 = vector.extract_strided_slice %173 {offsets = [0, 256], sizes = [8, 128], strides = [1, 1]} : vector<8x512xf32> to vector<8x128xf32>
    %212 = math.tanh %211 : vector<8x128xf32>
    %213 = vector.extract_strided_slice %173 {offsets = [0, 384], sizes = [8, 128], strides = [1, 1]} : vector<8x512xf32> to vector<8x128xf32>
    %214 = arith.negf %213 : vector<8x128xf32>
    %215 = math.exp %214 : vector<8x128xf32>
    %cst_56 = arith.constant 1.000000e+00 : f32
    %216 = vector.broadcast %cst_56 : f32 to vector<8x128xf32>
    %217 = arith.addf %216, %215 : vector<8x128xf32>
    %218 = arith.divf %216, %217 : vector<8x128xf32>
    %219 = arith.mulf %210, %146 : vector<8x128xf32>
    %220 = arith.mulf %204, %212 : vector<8x128xf32>
    %221 = arith.addf %219, %220 : vector<8x128xf32>
    %222 = math.tanh %221 : vector<8x128xf32>
    %223 = arith.mulf %218, %222 : vector<8x128xf32>
    %224 = arith.index_cast %c2_i32 : i32 to index
    %c0_57 = arith.constant 0 : index
    %c0_58 = arith.constant 0 : index
    %225 = vector.load %arg4[%224, %c0_57, %c0_58] : memref<4x8x128xf32, #tpu.memory_space<vmem>>, vector<1x8x128xf32>
    %226 = vector.shape_cast %225 : vector<1x8x128xf32> to vector<8x128xf32>
    %227 = vector.shape_cast %198 : vector<8x128xf32> to vector<1x8x128xf32>
    tpu.vector_store %arg4[%224, %c0_57, %c0_58], %227 {strides = array<i32>} : memref<4x8x128xf32, #tpu.memory_space<vmem>>, vector<1x8x128xf32>,
    %228 = arith.index_cast %157 : i32 to index
    %c0_59 = arith.constant 0 : index
    %c0_60 = arith.constant 0 : index
    %229 = vector.load %arg5[%228, %c0_59, %c0_60] : memref<4x8x128xf32, #tpu.memory_space<vmem>>, vector<1x8x128xf32>
    %230 = vector.shape_cast %229 : vector<1x8x128xf32> to vector<8x128xf32>
    %231 = vector.shape_cast %223 : vector<8x128xf32> to vector<1x8x128xf32>
    tpu.vector_store %arg5[%228, %c0_59, %c0_60], %231 {strides = array<i32>} : memref<4x8x128xf32, #tpu.memory_space<vmem>>, vector<1x8x128xf32>,
    %c3_i32_61 = arith.constant 3 : i32
    %c3_i32_62 = arith.constant 3 : i32
    %232 = arith.subi %c3_i32_62, %c3_i32_61 : i32
    %233 = tpu.concatenate %198, %223 in 1 : vector<8x128xf32>, vector<8x128xf32> -> vector<8x256xf32>
    %234 = arith.truncf %233 : vector<8x256xf32> to vector<8x256xbf16>
    %c0_63 = arith.constant 0 : index
    %c0_64 = arith.constant 0 : index
    %235 = vector.load %arg3[%c0_63, %c0_64] : memref<256x1024xbf16, #tpu.memory_space<vmem>>, vector<256x1024xbf16>
    %cst_65 = arith.constant dense<0.000000e+00> : vector<8x1024xf32>
    %236 = tpu.matmul %234, %235, %cst_65 {dimension_numbers = #tpu.dot_dimension_numbers<[1], [0], [0], [1], [0, 0, 1, 1], [], []>} : vector<8x256xbf16>, vector<256x1024xbf16>, vector<8x1024xf32> -> vector<8x1024xf32>
    %237 = arith.index_cast %c3_i32_61 : i32 to index
    %c0_66 = arith.constant 0 : index
    %c0_67 = arith.constant 0 : index
    %238 = vector.load %arg1[%237, %c0_66, %c0_67] : memref<4x8x512xbf16, #tpu.memory_space<vmem>>, vector<1x8x512xbf16>
    %239 = vector.shape_cast %238 : vector<1x8x512xbf16> to vector<8x512xbf16>
    %240 = arith.extf %239 : vector<8x512xbf16> to vector<8x512xf32>
    %241 = vector.extract_strided_slice %236 {offsets = [0, 0], sizes = [8, 512], strides = [1, 1]} : vector<8x1024xf32> to vector<8x512xf32>
    %242 = arith.addf %240, %241 : vector<8x512xf32>
    %243 = arith.index_cast %232 : i32 to index
    %c0_68 = arith.constant 0 : index
    %c0_69 = arith.constant 0 : index
    %244 = vector.load %arg2[%243, %c0_68, %c0_69] : memref<4x8x512xbf16, #tpu.memory_space<vmem>>, vector<1x8x512xbf16>
    %245 = vector.shape_cast %244 : vector<1x8x512xbf16> to vector<8x512xbf16>
    %246 = arith.extf %245 : vector<8x512xbf16> to vector<8x512xf32>
    %247 = vector.extract_strided_slice %236 {offsets = [0, 512], sizes = [8, 512], strides = [1, 1]} : vector<8x1024xf32> to vector<8x512xf32>
    %248 = arith.addf %246, %247 : vector<8x512xf32>
    %249 = vector.extract_strided_slice %242 {offsets = [0, 0], sizes = [8, 128], strides = [1, 1]} : vector<8x512xf32> to vector<8x128xf32>
    %250 = arith.negf %249 : vector<8x128xf32>
    %251 = math.exp %250 : vector<8x128xf32>
    %cst_70 = arith.constant 1.000000e+00 : f32
    %252 = vector.broadcast %cst_70 : f32 to vector<8x128xf32>
    %253 = arith.addf %252, %251 : vector<8x128xf32>
    %254 = arith.divf %252, %253 : vector<8x128xf32>
    %255 = vector.extract_strided_slice %242 {offsets = [0, 128], sizes = [8, 128], strides = [1, 1]} : vector<8x512xf32> to vector<8x128xf32>
    %256 = arith.negf %255 : vector<8x128xf32>
    %257 = math.exp %256 : vector<8x128xf32>
    %cst_71 = arith.constant 1.000000e+00 : f32
    %258 = vector.broadcast %cst_71 : f32 to vector<8x128xf32>
    %259 = arith.addf %258, %257 : vector<8x128xf32>
    %260 = arith.divf %258, %259 : vector<8x128xf32>
    %261 = vector.extract_strided_slice %242 {offsets = [0, 256], sizes = [8, 128], strides = [1, 1]} : vector<8x512xf32> to vector<8x128xf32>
    %262 = math.tanh %261 : vector<8x128xf32>
    %263 = vector.extract_strided_slice %242 {offsets = [0, 384], sizes = [8, 128], strides = [1, 1]} : vector<8x512xf32> to vector<8x128xf32>
    %264 = arith.negf %263 : vector<8x128xf32>
    %265 = math.exp %264 : vector<8x128xf32>
    %cst_72 = arith.constant 1.000000e+00 : f32
    %266 = vector.broadcast %cst_72 : f32 to vector<8x128xf32>
    %267 = arith.addf %266, %265 : vector<8x128xf32>
    %268 = arith.divf %266, %267 : vector<8x128xf32>
    %269 = arith.mulf %260, %196 : vector<8x128xf32>
    %270 = arith.mulf %254, %262 : vector<8x128xf32>
    %271 = arith.addf %269, %270 : vector<8x128xf32>
    %272 = math.tanh %271 : vector<8x128xf32>
    %273 = arith.mulf %268, %272 : vector<8x128xf32>
    %274 = vector.extract_strided_slice %248 {offsets = [0, 0], sizes = [8, 128], strides = [1, 1]} : vector<8x512xf32> to vector<8x128xf32>
    %275 = arith.negf %274 : vector<8x128xf32>
    %276 = math.exp %275 : vector<8x128xf32>
    %cst_73 = arith.constant 1.000000e+00 : f32
    %277 = vector.broadcast %cst_73 : f32 to vector<8x128xf32>
    %278 = arith.addf %277, %276 : vector<8x128xf32>
    %279 = arith.divf %277, %278 : vector<8x128xf32>
    %280 = vector.extract_strided_slice %248 {offsets = [0, 128], sizes = [8, 128], strides = [1, 1]} : vector<8x512xf32> to vector<8x128xf32>
    %281 = arith.negf %280 : vector<8x128xf32>
    %282 = math.exp %281 : vector<8x128xf32>
    %cst_74 = arith.constant 1.000000e+00 : f32
    %283 = vector.broadcast %cst_74 : f32 to vector<8x128xf32>
    %284 = arith.addf %283, %282 : vector<8x128xf32>
    %285 = arith.divf %283, %284 : vector<8x128xf32>
    %286 = vector.extract_strided_slice %248 {offsets = [0, 256], sizes = [8, 128], strides = [1, 1]} : vector<8x512xf32> to vector<8x128xf32>
    %287 = math.tanh %286 : vector<8x128xf32>
    %288 = vector.extract_strided_slice %248 {offsets = [0, 384], sizes = [8, 128], strides = [1, 1]} : vector<8x512xf32> to vector<8x128xf32>
    %289 = arith.negf %288 : vector<8x128xf32>
    %290 = math.exp %289 : vector<8x128xf32>
    %cst_75 = arith.constant 1.000000e+00 : f32
    %291 = vector.broadcast %cst_75 : f32 to vector<8x128xf32>
    %292 = arith.addf %291, %290 : vector<8x128xf32>
    %293 = arith.divf %291, %292 : vector<8x128xf32>
    %294 = arith.mulf %285, %221 : vector<8x128xf32>
    %295 = arith.mulf %279, %287 : vector<8x128xf32>
    %296 = arith.addf %294, %295 : vector<8x128xf32>
    %297 = math.tanh %296 : vector<8x128xf32>
    %298 = arith.mulf %293, %297 : vector<8x128xf32>
    %299 = arith.index_cast %c3_i32_61 : i32 to index
    %c0_76 = arith.constant 0 : index
    %c0_77 = arith.constant 0 : index
    %300 = vector.load %arg4[%299, %c0_76, %c0_77] : memref<4x8x128xf32, #tpu.memory_space<vmem>>, vector<1x8x128xf32>
    %301 = vector.shape_cast %300 : vector<1x8x128xf32> to vector<8x128xf32>
    %302 = vector.shape_cast %273 : vector<8x128xf32> to vector<1x8x128xf32>
    tpu.vector_store %arg4[%299, %c0_76, %c0_77], %302 {strides = array<i32>} : memref<4x8x128xf32, #tpu.memory_space<vmem>>, vector<1x8x128xf32>,
    %303 = arith.index_cast %232 : i32 to index
    %c0_78 = arith.constant 0 : index
    %c0_79 = arith.constant 0 : index
    %304 = vector.load %arg5[%303, %c0_78, %c0_79] : memref<4x8x128xf32, #tpu.memory_space<vmem>>, vector<1x8x128xf32>
    %305 = vector.shape_cast %304 : vector<1x8x128xf32> to vector<8x128xf32>
    %306 = vector.shape_cast %298 : vector<8x128xf32> to vector<1x8x128xf32>
    tpu.vector_store %arg5[%303, %c0_78, %c0_79], %306 {strides = array<i32>} : memref<4x8x128xf32, #tpu.memory_space<vmem>>, vector<1x8x128xf32>,
    %c4_i32 = arith.constant 4 : i32
    %c0_80 = arith.constant 0 : index
    %c0_81 = arith.constant 0 : index
    %307 = vector.load %arg6[%c0_80, %c0_81] : memref<8x128xf32, #tpu.memory_space<vmem>>, vector<8x128xf32>
    tpu.vector_store %arg6[%c0_80, %c0_81], %273 {strides = array<i32>} : memref<8x128xf32, #tpu.memory_space<vmem>>, vector<8x128xf32>,
    %c0_82 = arith.constant 0 : index
    %c0_83 = arith.constant 0 : index
    %308 = vector.load %arg7[%c0_82, %c0_83] : memref<8x128xf32, #tpu.memory_space<vmem>>, vector<8x128xf32>
    tpu.vector_store %arg7[%c0_82, %c0_83], %271 {strides = array<i32>} : memref<8x128xf32, #tpu.memory_space<vmem>>, vector<8x128xf32>,
    %c0_84 = arith.constant 0 : index
    %c0_85 = arith.constant 0 : index
    %309 = vector.load %arg8[%c0_84, %c0_85] : memref<8x128xf32, #tpu.memory_space<vmem>>, vector<8x128xf32>
    tpu.vector_store %arg8[%c0_84, %c0_85], %298 {strides = array<i32>} : memref<8x128xf32, #tpu.memory_space<vmem>>, vector<8x128xf32>,
    %c0_86 = arith.constant 0 : index
    %c0_87 = arith.constant 0 : index
    %310 = vector.load %arg9[%c0_86, %c0_87] : memref<8x128xf32, #tpu.memory_space<vmem>>, vector<8x128xf32>
    tpu.vector_store %arg9[%c0_86, %c0_87], %296 {strides = array<i32>} : memref<8x128xf32, #tpu.memory_space<vmem>>, vector<8x128xf32>,
    return
  }
  func.func @transform_0(%arg0: i32) -> (i32, i32, i32) {
    %c0_i32 = arith.constant 0 : i32
    %c0_i32_0 = arith.constant 0 : i32
    %c0_i32_1 = arith.constant 0 : i32
    return %arg0, %c0_i32, %c0_i32_0 : i32, i32, i32
  }
  func.func @transform_1(%arg0: i32) -> (i32, i32, i32) {
    %c1_i32 = arith.constant 1 : i32
    %0 = arith.subi %c1_i32, %arg0 : i32
    %c0_i32 = arith.constant 0 : i32
    %c1_i32_0 = arith.constant 1 : i32
    %c0_i32_1 = arith.constant 0 : i32
    return %0, %c0_i32, %c1_i32_0 : i32, i32, i32
  }
  func.func @transform_2(%arg0: i32) -> (i32, i32) {
    %c0_i32 = arith.constant 0 : i32
    %c0_i32_0 = arith.constant 0 : i32
    %c0_i32_1 = arith.constant 0 : i32
    return %c0_i32, %c0_i32_0 : i32, i32
  }
  func.func @transform_3(%arg0: i32) -> (i32, i32, i32) {
    %c0_i32 = arith.constant 0 : i32
    %c0_i32_0 = arith.constant 0 : i32
    %c0_i32_1 = arith.constant 0 : i32
    return %arg0, %c0_i32, %c0_i32_0 : i32, i32, i32
  }
  func.func @transform_4(%arg0: i32) -> (i32, i32, i32) {
    %c1_i32 = arith.constant 1 : i32
    %0 = arith.subi %c1_i32, %arg0 : i32
    %c0_i32 = arith.constant 0 : i32
    %c0_i32_0 = arith.constant 0 : i32
    %c0_i32_1 = arith.constant 0 : i32
    return %0, %c0_i32, %c0_i32_0 : i32, i32, i32
  }
}

</mosaic_0001>

<bundles_post_ra>
// kernel: _mtlstm_forward.2
= control target key start
LH: loop header
LB: loop body
LE: loop exit
PB: predicated region body
PF: predicated region fallthrough
CT: control target
= control target key end

     0   :  { %s5299_s15 = smov 0   ;;  %s5301_s16 = smov 0   ;;  %s7274_s0 = inlined_call_operand.vmem [shape: bf16[8,8,1024], index: 0, kind: input, shape index: {}, may-alias: {0,1}]   ;;  %s7275_s1 = inlined_call_operand.vmem [shape: bf16[8,8,1024], index: 1, kind: input, shape index: {}, may-alias: {0,1}]   ;;  %s7276_s2 = inlined_call_operand.vmem [shape: bf16[256,1024], index: 2, kind: input, shape index: {}]   ;;  %s7277_s3 = inlined_call_operand.vmem [shape: f32[8,8,128], index: 3, kind: output, shape index: {0}]   ;;  %s7278_s4 = inlined_call_operand.vmem [shape: f32[8,8,128], index: 4, kind: output, shape index: {1}]  }
   0x1   :  { %s5303_s17 = smov 0   ;;  %s5305_s18 = smov 0  }
   0x2   :  { %s5307_s19 = smov 0  }
   0x3 LB: > { %s5325_s20 = sadd.s32 4294967295, %s5271_s19   ;;  %s5328_s21 = sadd.s32 1, %s5271_s19   ;;  %s5271_s19 = sphi %s5307_s19, %s7722_s19   ;;  %s5267_s18 = sphi %s5305_s18, %s7721_s18   ;;  %s5263_s17 = sphi %s5303_s17, %s7720_s17   ;;  %s5259_s16 = sphi %s5301_s16, %s7719_s16   ;;  %s5255_s15 = sphi %s5299_s15, %s7718_s15  }
   0x4   : > { %s19_s22 = ssub.s32 %s5271_s19, %s5328_s21  ;;  %s22_s23 = sadd.s32 1, %s5267_s18 }
   0x5   : > { %p20_p0 = scmp.eq.s32.totalorder %s19_s22, 0  ;;  %p29_p1 = scmp.ne.s32.totalorder %s5267_s18, %s5263_s17 }
   0x6   : > { %p30_p2 = scmp.eq.s32.totalorder %s5271_s19, 0  ;;  %s45_s24 = ssub.s32 1, %s5271_s19 }
   0x7   : > { %s5338_s25 = scalar_select %p20_p0, %s5267_s18, %s22_s23  }
   0x8   : > { %p31_p3 = por %p30_p2, %p29_p1  ;;  %s46_s26 = ssub.s32 1, %s5328_s21 }
   0x9   : > { %s47_s27 = ssub.s32 %s45_s24, %s46_s26  ;;  %s50_s28 = sadd.s32 1, %s5259_s16 }
   0xa   : > { %p48_p4 = scmp.eq.s32.totalorder %s47_s27, 0  ;;  %p57_p5 = scmp.ne.s32.totalorder %s5259_s16, %s5255_s15 }
   0xb   : > { %p4481_p7 = scmp.ge.s32.totalorder %s5271_s19, 2 }
   0xc   : > { %s5347_s29 = scalar_select %p48_p4, %s5259_s16, %s50_s28  }
   0xd   : > { %p5349_p6 = por %p57_p5, %p30_p2  ;;  %161 = sbr.rel (%p4481_p7) target bundleno = 34 (0x22), region = 20 }
  0x12   : > { %164 = sbr.rel (!%p31_p3) target bundleno = 26 (0x1a), region = 24  ;;  %s166_s5 = sand.u32 (%p31_p3), 1, %s5267_s18  }
  0x13   : > { %s5062_s6 = sshll.u32 (%p31_p3), %s5271_s19, 7  ;;  %s4482_s7 = sshll.u32 (%p31_p3), %s166_s5, 6 }
  0x14   : > { %s172_s10 = scalar_lea.vmem (%p31_p3), %s7274_s0, %s5062_s6  ;;  %s168_s11 = scalar_lea.vmem (%p31_p3), [#allocation6], %s4482_s7 }
  0x15   : > { %v185_v0 = vld [vmem:[%s172_s10] sm:$0xff] (%p31_p3)  ;;  %v187_v1 = vld [vmem:[%s172_s10 + $0x8] sm:$0xff] (%p31_p3) }
  0x16   : > { %v189_v2 = vld [vmem:[%s172_s10 + $0x20] sm:$0xff] (%p31_p3)  ;;  %186 = vst [vmem:[%s168_s11] sm:$0xff] (%p31_p3), %v185_v0  ;;  %188 = vst [vmem:[%s168_s11 + $0x8] sm:$0xff] (%p31_p3), %v187_v1  ;;  %v191_v3 = vld [vmem:[%s172_s10 + $0x28] sm:$0xff] (%p31_p3) }
  0x17   : > { %190 = vst [vmem:[%s168_s11 + $0x10] sm:$0xff] %v189_v2  ;;  %v193_v4 = vld [vmem:[%s172_s10 + $0x40] sm:$0xff]  ;;  %v195_v5 = vld [vmem:[%s172_s10 + $0x48] sm:$0xff]  ;;  %192 = vst [vmem:[%s168_s11 + $0x18] sm:$0xff] %v191_v3 }
  0x18   : > { %194 = vst [vmem:[%s168_s11 + $0x20] sm:$0xff] %v193_v4  ;;  %196 = vst [vmem:[%s168_s11 + $0x28] sm:$0xff] %v195_v5  ;;  %v197_v6 = vld [vmem:[%s172_s10 + $0x60] sm:$0xff]  ;;  %v199_v7 = vld [vmem:[%s172_s10 + $0x68] sm:$0xff] }
  0x19   : > { %198 = vst [vmem:[%s168_s11 + $0x30] sm:$0xff] %v197_v6  ;;  %200 = vst [vmem:[%s168_s11 + $0x38] sm:$0xff] %v199_v7 }
  0x1a PF: > { %206 = sbr.rel (!%p5349_p6) target bundleno = 34 (0x22), region = 47  ;;  %s208_s12 = sand.u32 (%p5349_p6), 1, %s5259_s16  }
  0x1b   : > { %s5063_s13 = sshll.u32 (%p5349_p6), %s45_s24, 7  ;;  %s4486_s14 = sshll.u32 (%p5349_p6), %s208_s12, 6 }
  0x1c   : > { %s4409_s26 = scalar_lea.vmem (%p5349_p6), %s7275_s1, %s5063_s13  ;;  %s210_s27 = scalar_lea.vmem (%p5349_p6), [#allocation7], %s4486_s14 }
  0x1d   : > { %v4489_v8 = vld [vmem:[%s4409_s26 + $0x10] sm:$0xff] (%p5349_p6)  ;;  %v4490_v9 = vld [vmem:[%s4409_s26 + $0x18] sm:$0xff] (%p5349_p6) }
  0x1e   : > { %v4491_v10 = vld [vmem:[%s4409_s26 + $0x30] sm:$0xff] (%p5349_p6)  ;;  %230 = vst [vmem:[%s210_s27] sm:$0xff] (%p5349_p6), %v4489_v8  ;;  %232 = vst [vmem:[%s210_s27 + $0x8] sm:$0xff] (%p5349_p6), %v4490_v9  ;;  %v4492_v11 = vld [vmem:[%s4409_s26 + $0x38] sm:$0xff] (%p5349_p6) }
  0x1f   : > { %234 = vst [vmem:[%s210_s27 + $0x10] sm:$0xff] %v4491_v10  ;;  %v4493_v12 = vld [vmem:[%s4409_s26 + $0x50] sm:$0xff]  ;;  %v4494_v13 = vld [vmem:[%s4409_s26 + $0x58] sm:$0xff]  ;;  %236 = vst [vmem:[%s210_s27 + $0x18] sm:$0xff] %v4492_v11 }
  0x20   : > { %238 = vst [vmem:[%s210_s27 + $0x20] sm:$0xff] %v4493_v12  ;;  %240 = vst [vmem:[%s210_s27 + $0x28] sm:$0xff] %v4494_v13  ;;  %v4495_v14 = vld [vmem:[%s4409_s26 + $0x70] sm:$0xff]  ;;  %v4496_v15 = vld [vmem:[%s4409_s26 + $0x78] sm:$0xff] }
  0x21   : > { %242 = vst [vmem:[%s210_s27 + $0x30] sm:$0xff] %v4495_v14  ;;  %244 = vst [vmem:[%s210_s27 + $0x38] sm:$0xff] %v4496_v15 }
  0x22 PF: > { %p4497_p8 = scmp.ge.s32.totalorder %s5271_s19, 1  ;;  %p249_p9 = scmp.lt.s32.totalorder %s5271_s19, 3 }
  0x24   : > { %p250_p10 = pnand %p4497_p8, %p249_p9 }
  0x26   : > { %253 = sbr.rel (%p250_p10) target bundleno = 1391 (0x56f), region = 70 }
  0x2b   : > { %s256_s24 = sand.u32 1, %s5263_s17   ;;  %s263_s28 = sand.u32 1, %s5255_s15  }
  0x2c   : > { %s4498_s30 = sshll.u32 %s256_s24, 6  ;;  %s4499_s5 = sshll.u32 %s263_s28, 6 }
  0x2d   : > { %s4500_s6 = sshll.u32 %s5325_s20, 2  ;;  %s307_s7 = ssub.s32 1, %s5325_s20 }
  0x2e   : > { %p302_p11 = scmp.lt.s32.totalorder %s4500_s6, 7  ;;  %s4502_s8 = sshll.u32 %s307_s7, 2 }
  0x2f   : > { %p309_p12 = scmp.lt.s32.totalorder %s4502_s8, 7  ;;  %s5383_s17 = scalar_lea.vmem [#allocation6], %s4498_s30 }
  0x30   : > { %s7724_s6 = smov (!%p302_p11, %s4500_s6), 7  ;;  %s5385_s22 = scalar_lea.vmem [#allocation7], %s4499_s5 }
  0x31   : > { %s7726_s8 = smov (!%p309_p12, %s4502_s8), 7  ;;  %s4501_s9 = sshll.u32 %s7724_s6, 3 }
  0x32   : > { %s5376_s11 = scalar_lea.vmem %s7277_s3, %s4501_s9  ;;  %s4503_s12 = sshll.u32 %s7726_s8, 3 }
  0x33   : > { %s5381_s15 = scalar_lea.vmem %s7278_s4, %s4503_s12  ;;  %p4504_p13 = scmp.ne.s32.totalorder %s5325_s20, 0 }
  0x35   : > { %318 = sbr.rel (%p4504_p13) target bundleno = 61 (0x3d), region = 82 }
  0x3a   : > { %v5273_v16 = vmov 0.0  }
  0x3b   : > { %319 = vst [vmem:[#allocation2] sm:$0xff] %v5273_v16  ;;  %320 = vst [vmem:[#allocation3] sm:$0xff] %v5273_v16 }
  0x3c   : > { %321 = vst [vmem:[#allocation4] sm:$0xff] %v5273_v16  ;;  %322 = vst [vmem:[#allocation5] sm:$0xff] %v5273_v16 }
  0x3d PF: > { %v385_v17 = vld [vmem:[%s7276_s2 + $0x1c0] sm:$0xff]  ;;  %v386_v26 = vld [vmem:[%s7276_s2 + $0x1c8] sm:$0xff] }
  0x3e   : > { %v389_v18 = vld [vmem:[%s7276_s2 + $0x1e0] sm:$0xff]  ;;  %v390_v27 = vld [vmem:[%s7276_s2 + $0x1e8] sm:$0xff] }
  0x3f   : > { %v377_v19 = vld [vmem:[%s7276_s2 + $0x180] sm:$0xff]  ;;  %v5397_v20 = vcombine.high %v385_v17, %v389_v18  ;;  %v5399_v21 = vcombine.low %v385_v17, %v389_v18  ;;  %v5422_v29 = vcombine.high %v386_v26, %v390_v27  ;;  %v5424_v30 = vcombine.low %v386_v26, %v390_v27  ;;  %v378_v31 = vld [vmem:[%s7276_s2 + $0x188] sm:$0xff] }
  0x40   : > { %v381_v22 = vld [vmem:[%s7276_s2 + $0x1a0] sm:$0xff]  ;;  %v382_v32 = vld [vmem:[%s7276_s2 + $0x1a8] sm:$0xff] }
  0x41   : > { %v5404_v23 = vcombine.high %v377_v19, %v381_v22  ;;  %v369_v24 = vld [vmem:[%s7276_s2 + $0x140] sm:$0xff]  ;;  %1097 = vmatprep.subr.bf16.mxu0 %v5397_v20  ;;  %v5420_v28 = vcombine.low %v377_v19, %v381_v22  ;;  %v5435_v34 = vcombine.high %v378_v31, %v382_v32  ;;  %v370_v35 = vld [vmem:[%s7276_s2 + $0x148] sm:$0xff]  ;;  %1138 = vmatprep.subr.bf16.mxu1 %v5422_v29 }
  0x42   : > { %v373_v25 = vld [vmem:[%s7276_s2 + $0x160] sm:$0xff]  ;;  %1098 = vmatpush1.bf16.msra.mxu0 %v5399_v21  ;;  %v374_v36 = vld [vmem:[%s7276_s2 + $0x168] sm:$0xff]  ;;  %1139 = vmatpush1.bf16.msra.mxu1 %v5424_v30  ;;  %v5451_v39 = vcombine.low %v378_v31, %v382_v32 }
  0x43   : > { %1099 = vmatprep.subr.bf16.mxu0 %v5404_v23  ;;  %v5433_v33 = vcombine.high %v369_v24, %v373_v25  ;;  %v361_v37 = vld [vmem:[%s7276_s2 + $0x100] sm:$0xff]  ;;  %v5454_v40 = vcombine.low %v369_v24, %v373_v25  ;;  %1140 = vmatprep.subr.bf16.mxu1 %v5435_v34  ;;  %v5457_v41 = vcombine.high %v370_v35, %v374_v36  ;;  %v362_v43 = vld [vmem:[%s7276_s2 + $0x108] sm:$0xff]  ;;  %v325_v0 = vld [vmem:[#allocation4] sm:$0xff] }
  0x44   : > { %v365_v38 = vld [vmem:[%s7276_s2 + $0x120] sm:$0xff]  ;;  %v366_v44 = vld [vmem:[%s7276_s2 + $0x128] sm:$0xff]  ;;  %v5475_v47 = vcombine.low %v370_v35, %v374_v36  ;;  %v5531_v3 = vpack.c.bf16 %v325_v0, %v325_v0 }
  0x45   : > { %v5460_v42 = vcombine.high %v361_v37, %v365_v38  ;;  %v353_v45 = vld [vmem:[%s7276_s2 + $0xc0] sm:$0xff]  ;;  %v5478_v48 = vcombine.low %v361_v37, %v365_v38  ;;  %v5481_v49 = vcombine.high %v362_v43, %v366_v44  ;;  %v354_v51 = vld [vmem:[%s7276_s2 + $0xc8] sm:$0xff]  ;;  %v5499_v55 = vcombine.low %v362_v43, %v366_v44 }
  0x46   : > { %1100 = vmatpush1.bf16.msra.mxu0 %v5420_v28  ;;  %v357_v46 = vld [vmem:[%s7276_s2 + $0xe0] sm:$0xff]  ;;  %1141 = vmatpush1.bf16.msra.mxu1 %v5451_v39  ;;  %v358_v52 = vld [vmem:[%s7276_s2 + $0xe8] sm:$0xff] }
  0x47   : > { %1101 = vmatprep.subr.bf16.mxu0 %v5433_v33  ;;  %1142 = vmatprep.subr.bf16.mxu1 %v5457_v41  ;;  %v5484_v50 = vcombine.high %v353_v45, %v357_v46  ;;  %v345_v53 = vld [vmem:[%s7276_s2 + $0x80] sm:$0xff]  ;;  %v5502_v56 = vcombine.low %v353_v45, %v357_v46  ;;  %v5505_v57 = vcombine.high %v354_v51, %v358_v52  ;;  %v346_v59 = vld [vmem:[%s7276_s2 + $0x88] sm:$0xff] }
  0x48   : > { %v349_v54 = vld [vmem:[%s7276_s2 + $0xa0] sm:$0xff]  ;;  %v350_v60 = vld [vmem:[%s7276_s2 + $0xa8] sm:$0xff]  ;;  %v5523_v63 = vcombine.low %v354_v51, %v358_v52  ;;  %1129 = vmatprep.mubr.bf16.mxu0 %v5531_v3  ;;  %1170 = vmatprep.mubr.bf16.mxu1 %v5531_v3 }
  0x49   : > { %v5508_v58 = vcombine.high %v345_v53, %v349_v54  ;;  %v337_v61 = vld [vmem:[%s7276_s2 + $0x40] sm:$0xff]  ;;  %v5526_v1 = vcombine.low %v345_v53, %v349_v54  ;;  %v5529_v2 = vcombine.high %v346_v59, %v350_v60  ;;  %v338_v5 = vld [vmem:[%s7276_s2 + $0x48] sm:$0xff]  ;;  %v5550_v9 = vcombine.low %v346_v59, %v350_v60 }
  0x4a   : > { %1102 = vmatpush1.bf16.msra.mxu0 %v5454_v40  ;;  %1143 = vmatpush1.bf16.msra.mxu1 %v5475_v47  ;;  %v341_v62 = vld [vmem:[%s7276_s2 + $0x60] sm:$0xff]  ;;  %v342_v6 = vld [vmem:[%s7276_s2 + $0x68] sm:$0xff] }
  0x4b   : > { %1103 = vmatprep.subr.bf16.mxu0 %v5460_v42  ;;  %1144 = vmatprep.subr.bf16.mxu1 %v5481_v49  ;;  %v5534_v4 = vcombine.high %v337_v61, %v341_v62  ;;  %v329_v7 = vld [vmem:[%s7276_s2] sm:$0xff]  ;;  %v5554_v10 = vcombine.low %v337_v61, %v341_v62  ;;  %v5557_v11 = vcombine.high %v338_v5, %v342_v6  ;;  %v330_v13 = vld [vmem:[%s7276_s2 + $0x8] sm:$0xff] }
  0x4c   : > { %v333_v8 = vld [vmem:[%s7276_s2 + $0x20] sm:$0xff]  ;;  %v334_v14 = vld [vmem:[%s7276_s2 + $0x28] sm:$0xff]  ;;  %v5575_v17 = vcombine.low %v338_v5, %v342_v6 }
  0x4d   : > { %v5560_v12 = vcombine.high %v329_v7, %v333_v8  ;;  %v449_v15 = vld [vmem:[%s7276_s2 + $0x3c0] sm:$0xff]  ;;  %v5578_v18 = vcombine.low %v329_v7, %v333_v8  ;;  %v5581_v19 = vcombine.high %v330_v13, %v334_v14  ;;  %v450_v24 = vld [vmem:[%s7276_s2 + $0x3c8] sm:$0xff]  ;;  %v5599_v31 = vcombine.low %v330_v13, %v334_v14 }
  0x4e   : > { %1104 = vmatpush1.bf16.msra.mxu0 %v5478_v48  ;;  %1145 = vmatpush1.bf16.msra.mxu1 %v5499_v55  ;;  %v453_v16 = vld [vmem:[%s7276_s2 + $0x3e0] sm:$0xff]  ;;  %v454_v25 = vld [vmem:[%s7276_s2 + $0x3e8] sm:$0xff] }
  0x4f   : > { %1105 = vmatprep.subr.bf16.mxu0 %v5484_v50  ;;  %1146 = vmatprep.subr.bf16.mxu1 %v5505_v57  ;;  %v5584_v22 = vcombine.high %v449_v15, %v453_v16  ;;  %v441_v26 = vld [vmem:[%s7276_s2 + $0x380] sm:$0xff]  ;;  %v5602_v32 = vcombine.low %v449_v15, %v453_v16  ;;  %v5605_v35 = vcombine.high %v450_v24, %v454_v25  ;;  %v442_v37 = vld [vmem:[%s7276_s2 + $0x388] sm:$0xff] }
  0x50   : > { %v445_v27 = vld [vmem:[%s7276_s2 + $0x3a0] sm:$0xff]  ;;  %v446_v38 = vld [vmem:[%s7276_s2 + $0x3a8] sm:$0xff]  ;;  %v5623_v45 = vcombine.low %v450_v24, %v454_v25 }
  0x51   : > { %v5608_v36 = vcombine.high %v441_v26, %v445_v27  ;;  %v433_v43 = vld [vmem:[%s7276_s2 + $0x340] sm:$0xff]  ;;  %v5626_v46 = vcombine.low %v441_v26, %v445_v27  ;;  %v5629_v51 = vcombine.high %v442_v37, %v446_v38  ;;  %v434_v53 = vld [vmem:[%s7276_s2 + $0x348] sm:$0xff]  ;;  %v5647_v61 = vcombine.low %v442_v37, %v446_v38 }
  0x52   : > { %1106 = vmatpush1.bf16.msra.mxu0 %v5502_v56  ;;  %1147 = vmatpush1.bf16.msra.mxu1 %v5523_v63  ;;  %v437_v44 = vld [vmem:[%s7276_s2 + $0x360] sm:$0xff]  ;;  %v438_v54 = vld [vmem:[%s7276_s2 + $0x368] sm:$0xff] }
  0x53   : > { %1107 = vmatprep.subr.bf16.mxu0 %v5508_v58  ;;  %1148 = vmatprep.subr.bf16.mxu1 %v5529_v2  ;;  %v5632_v52 = vcombine.high %v433_v43, %v437_v44  ;;  %v425_v59 = vld [vmem:[%s7276_s2 + $0x300] sm:$0xff]  ;;  %v5650_v62 = vcombine.low %v433_v43, %v437_v44  ;;  %v5653_v0 = vcombine.high %v434_v53, %v438_v54  ;;  %v426_v6 = vld [vmem:[%s7276_s2 + $0x308] sm:$0xff] }
  0x54   : > { %v429_v60 = vld [vmem:[%s7276_s2 + $0x320] sm:$0xff]  ;;  %v430_v7 = vld [vmem:[%s7276_s2 + $0x328] sm:$0xff]  ;;  %v5671_v14 = vcombine.low %v434_v53, %v438_v54 }
  0x55   : > { %v5656_v5 = vcombine.high %v425_v59, %v429_v60  ;;  %v417_v8 = vld [vmem:[%s7276_s2 + $0x2c0] sm:$0xff]  ;;  %v5674_v15 = vcombine.low %v425_v59, %v429_v60  ;;  %v5677_v16 = vcombine.high %v426_v6, %v430_v7  ;;  %v418_v25 = vld [vmem:[%s7276_s2 + $0x2c8] sm:$0xff]  ;;  %v5695_v38 = vcombine.low %v426_v6, %v430_v7 }
  0x56   : > { %1108 = vmatpush1.bf16.msra.mxu0 %v5526_v1  ;;  %1149 = vmatpush1.bf16.msra.mxu1 %v5550_v9  ;;  %v421_v13 = vld [vmem:[%s7276_s2 + $0x2e0] sm:$0xff]  ;;  %v422_v26 = vld [vmem:[%s7276_s2 + $0x2e8] sm:$0xff] }
  0x57   : > { %1109 = vmatprep.subr.bf16.mxu0 %v5534_v4  ;;  %1150 = vmatprep.subr.bf16.mxu1 %v5557_v11  ;;  %7426 = vst [vmem:[#allocation8_spill] sm:$0xff] %v5674_v15  ;;  %7427 = vst [vmem:[#allocation9_spill] sm:$0xff] %v5677_v16  ;;  %v5680_v24 = vcombine.high %v417_v8, %v421_v13  ;;  %v409_v27 = vld [vmem:[%s7276_s2 + $0x280] sm:$0xff]  ;;  %v5698_v43 = vcombine.low %v417_v8, %v421_v13  ;;  %v410_v54 = vld [vmem:[%s7276_s2 + $0x288] sm:$0xff] }
  0x58   : > { %v413_v37 = vld [vmem:[%s7276_s2 + $0x2a0] sm:$0xff]  ;;  %7429 = vst [vmem:[#allocation11_spill] sm:$0xff] %v5695_v38  ;;  %v5701_v44 = vcombine.high %v418_v25, %v422_v26  ;;  %v414_v59 = vld [vmem:[%s7276_s2 + $0x2a8] sm:$0xff]  ;;  %v5719_v7 = vcombine.low %v418_v25, %v422_v26 }
  0x59   : > { %7428 = vst [vmem:[#allocation10_spill] sm:$0xff] %v5680_v24  ;;  %7430 = vst [vmem:[#allocation12_spill] sm:$0xff] %v5698_v43  ;;  %v5704_v53 = vcombine.high %v409_v27, %v413_v37  ;;  %v401_v60 = vld [vmem:[%s7276_s2 + $0x240] sm:$0xff]  ;;  %v5722_v8 = vcombine.low %v409_v27, %v413_v37  ;;  %v5725_v13 = vcombine.high %v410_v54, %v414_v59  ;;  %v406_v25 = vld [vmem:[%s7276_s2 + $0x268] sm:$0xff] }
  0x5a   : > { %1110 = vmatpush1.bf16.msra.mxu0 %v5554_v10  ;;  %1151 = vmatpush1.bf16.msra.mxu1 %v5575_v17  ;;  %7431 = vst [vmem:[#allocation13_spill] sm:$0xff] %v5701_v44  ;;  %v405_v6 = vld [vmem:[%s7276_s2 + $0x260] sm:$0xff]  ;;  %7433 = vst [vmem:[#allocation15_spill] sm:$0xff] %v5719_v7  ;;  %v5743_v37 = vcombine.low %v410_v54, %v414_v59  ;;  %v398_v54 = vld [vmem:[%s7276_s2 + $0x228] sm:$0xff] }
  0x5b   : > { %1111 = vmatprep.subr.bf16.mxu0 %v5560_v12  ;;  %1152 = vmatprep.subr.bf16.mxu1 %v5581_v19  ;;  %7432 = vst [vmem:[#allocation14_spill] sm:$0xff] %v5704_v53  ;;  %7434 = vst [vmem:[#allocation16_spill] sm:$0xff] %v5722_v8  ;;  %v393_v26 = vld [vmem:[%s7276_s2 + $0x200] sm:$0xff]  ;;  %v387_v59 = vld [vmem:[%s7276_s2 + $0x1d0] sm:$0xff] }
  0x5c   : > { %7435 = vst [vmem:[#allocation17_spill] sm:$0xff] %v5725_v13  ;;  %v397_v27 = vld [vmem:[%s7276_s2 + $0x220] sm:$0xff]  ;;  %7437 = vst [vmem:[#allocation19_spill] sm:$0xff] %v5743_v37 }
  0x5e   : > { %1112 = vmatpush1.bf16.msra.mxu0 %v5578_v18  ;;  %1153 = vmatpush1.bf16.msra.mxu1 %v5599_v31 }
  0x5f   : > { %1113 = vmatprep.subr.bf16.mxu0 %v5584_v22  ;;  %1154 = vmatprep.subr.bf16.mxu1 %v5605_v35 }
  0x62   : > { %1114 = vmatpush2.bf16.msra.mxu0 %v5602_v32  ;;  %1155 = vmatpush2.bf16.msra.mxu1 %v5623_v45 }
  0x63   : > { %1115 = vmatprep.subr.bf16.mxu0 %v5608_v36  ;;  %1156 = vmatprep.subr.bf16.mxu1 %v5629_v51 }
  0x66   : > { %1116 = vmatpush2.bf16.msra.mxu0 %v5626_v46  ;;  %1157 = vmatpush2.bf16.msra.mxu1 %v5647_v61 }
  0x67   : > { %1117 = vmatprep.subr.bf16.mxu0 %v5632_v52  ;;  %1158 = vmatprep.subr.bf16.mxu1 %v5653_v0 }
  0x6a   : > { %1118 = vmatpush2.bf16.msra.mxu0 %v5650_v62  ;;  %1159 = vmatpush2.bf16.msra.mxu1 %v5671_v14 }
  0x6b   : > { %1119 = vmatprep.subr.bf16.mxu0 %v5656_v5  ;;  %1160 = vmatprep.subr.bf16.mxu1 %v5677_v16  ;;  %v388_v16 = vld [vmem:[%s7276_s2 + $0x1d8] sm:$0xff] }
  0x6e   : > { %1120 = vmatpush2.bf16.msra.mxu0 %v5674_v15  ;;  %1161 = vmatpush2.bf16.msra.mxu1 %v5695_v38  ;;  %v402_v15 = vld [vmem:[%s7276_s2 + $0x248] sm:$0xff] }
  0x6f   : > { %1121 = vmatprep.subr.bf16.mxu0 %v5680_v24  ;;  %1162 = vmatprep.subr.bf16.mxu1 %v5701_v44  ;;  %v5728_v24 = vcombine.high %v401_v60, %v405_v6  ;;  %v5752_v44 = vcombine.high %v393_v26, %v397_v27  ;;  %v394_v38 = vld [vmem:[%s7276_s2 + $0x208] sm:$0xff] }
  0x71   : > { %7436 = vst [vmem:[#allocation18_spill] sm:$0xff] %v5728_v24  ;;  %7440 = vst [vmem:[#allocation22_spill] sm:$0xff] %v5752_v44 }
  0x72   : > { %1122 = vmatpush2.bf16.msra.mxu0 %v5698_v43  ;;  %1163 = vmatpush2.bf16.msra.mxu1 %v5719_v7  ;;  %v5749_v43 = vcombine.high %v402_v15, %v406_v25 }
  0x73   : > { %1123 = vmatprep.subr.bf16.mxu0 %v5704_v53  ;;  %v5746_v53 = vcombine.low %v401_v60, %v405_v6  ;;  %1164 = vmatprep.subr.bf16.mxu1 %v5725_v13  ;;  %v391_v60 = vld [vmem:[%s7276_s2 + $0x1f0] sm:$0xff]  ;;  %v5767_v6 = vcombine.low %v402_v15, %v406_v25  ;;  %v5773_v13 = vcombine.high %v394_v38, %v398_v54  ;;  %v392_v15 = vld [vmem:[%s7276_s2 + $0x1f8] sm:$0xff] }
  0x74   : > { %7439 = vst [vmem:[#allocation21_spill] sm:$0xff] %v5749_v43  ;;  %v5776_v7 = vcombine.high %v387_v59, %v391_v60  ;;  %v379_v25 = vld [vmem:[%s7276_s2 + $0x190] sm:$0xff] }
  0x75   : > { %7438 = vst [vmem:[#allocation20_spill] sm:$0xff] %v5746_v53  ;;  %7441 = vst [vmem:[#allocation23_spill] sm:$0xff] %v5767_v6 }
  0x76   : > { %1124 = vmatpush2.bf16.msra.mxu0 %v5722_v8  ;;  %1165 = vmatpush2.bf16.msra.mxu1 %v5743_v37  ;;  %v323_v8 = vld [vmem:[#allocation2] sm:$0xff]  ;;  %7443 = vst [vmem:[#allocation25_spill] sm:$0xff] %v5773_v13  ;;  %7444 = vst [vmem:[#allocation26_spill] sm:$0xff] %v5776_v7 }
  0x77   : > { %1125 = vmatprep.subr.bf16.mxu0 %v5728_v24  ;;  %v5770_v24 = vcombine.low %v393_v26, %v397_v27  ;;  %1166 = vmatprep.subr.bf16.mxu1 %v5749_v43  ;;  %v383_v26 = vld [vmem:[%s7276_s2 + $0x1b0] sm:$0xff]  ;;  %v5790_v27 = vpack.c.bf16 %v323_v8, %v323_v8  ;;  %v5799_v43 = vcombine.high %v388_v16, %v392_v15  ;;  %v380_v8 = vld [vmem:[%s7276_s2 + $0x198] sm:$0xff] }
  0x78   : > { %v5802_v37 = vcombine.high %v379_v25, %v383_v26 }
  0x79   : > { %7442 = vst [vmem:[#allocation24_spill] sm:$0xff] %v5770_v24  ;;  %7446 = vst [vmem:[#allocation28_spill] sm:$0xff] %v5799_v43 }
  0x7a   : > { %1126 = vmatpush2.bf16.msra.mxu0 %v5746_v53  ;;  %1167 = vmatpush2.bf16.msra.mxu1 %v5767_v6  ;;  %v5796_v53 = vcombine.low %v387_v59, %v391_v60  ;;  %7447 = vst [vmem:[#allocation29_spill] sm:$0xff] %v5802_v37  ;;  %v375_v59 = vld [vmem:[%s7276_s2 + $0x170] sm:$0xff]  ;;  %v5818_v60 = vcombine.low %v388_v16, %v392_v15  ;;  %v372_v6 = vld [vmem:[%s7276_s2 + $0x158] sm:$0xff] }
  0x7b   : > { %1127 = vmatprep.subr.bf16.mxu0 %v5752_v44  ;;  %v5793_v44 = vcombine.low %v394_v38, %v398_v54  ;;  %1168 = vmatprep.subr.bf16.mxu1 %v5773_v13  ;;  %v384_v38 = vld [vmem:[%s7276_s2 + $0x1b8] sm:$0xff]  ;;  %v371_v54 = vld [vmem:[%s7276_s2 + $0x150] sm:$0xff] }
  0x7c   : > { %7445 = vst [vmem:[#allocation27_spill] sm:$0xff] %v5796_v53  ;;  %7448 = vst [vmem:[#allocation30_spill] sm:$0xff] %v5818_v60  ;;  %v5827_v13 = vcombine.high %v371_v54, %v375_v59  ;;  %v376_v16 = vld [vmem:[%s7276_s2 + $0x178] sm:$0xff]  ;;  %v363_v15 = vld [vmem:[%s7276_s2 + $0x110] sm:$0xff] }
  0x7e   : > { %1128 = vmatpush2.bf16.msra.mxu0 %v5770_v24  ;;  %1169 = vmatpush2.bf16.msra.mxu1 %v5793_v44  ;;  %v5824_v24 = vcombine.high %v380_v8, %v384_v38  ;;  %7451 = vst [vmem:[#allocation33_spill] sm:$0xff] %v5827_v13 }
  0x7f   : > { %1179 = vmatprep.subr.bf16.mxu0 %v5776_v7  ;;  %v5821_v7 = vcombine.low %v379_v25, %v383_v26  ;;  %1220 = vmatprep.subr.bf16.mxu1 %v5799_v43  ;;  %v367_v25 = vld [vmem:[%s7276_s2 + $0x130] sm:$0xff]  ;;  %v5844_v26 = vcombine.low %v380_v8, %v384_v38 }
  0x80   : > { %7450 = vst [vmem:[#allocation32_spill] sm:$0xff] %v5824_v24  ;;  %v5854_v43 = vcombine.high %v363_v15, %v367_v25  ;;  %v355_v8 = vld [vmem:[%s7276_s2 + $0xd0] sm:$0xff] }
  0x81   : > { %1130 = vmatmul.mubr.bf16.vlgmr.msra.gmra.mxu0 %v5790_v27  ;;  %7449 = vst [vmem:[#allocation31_spill] sm:$0xff] %v5821_v7  ;;  %1171 = vmatmul.mubr.bf16.vlgmr.msra.gmra.mxu1 %v5790_v27  ;;  %7452 = vst [vmem:[#allocation34_spill] sm:$0xff] %v5844_v26  ;;  %v359_v38 = vld [vmem:[%s7276_s2 + $0xf0] sm:$0xff] }
  0x82   : > { %1180 = vmatpush1.bf16.msra.mxu0 %v5796_v53  ;;  %1211 = vmatprep.mubr.bf16.mxu0 %v5531_v3  ;;  %v5851_v53 = vcombine.high %v372_v6, %v376_v16  ;;  %7455 = vst [vmem:[#allocation37_spill] sm:$0xff] %v5854_v43 }
  0x83   : > { %1181 = vmatprep.subr.bf16.mxu0 %v5802_v37  ;;  %1221 = vmatpush1.bf16.msra.mxu1 %v5818_v60  ;;  %v5848_v37 = vcombine.low %v371_v54, %v375_v59  ;;  %v364_v60 = vld [vmem:[%s7276_s2 + $0x118] sm:$0xff]  ;;  %v5869_v54 = vcombine.low %v372_v6, %v376_v16  ;;  %v5872_v59 = vcombine.low %v363_v15, %v367_v25  ;;  %v347_v16 = vld [vmem:[%s7276_s2 + $0x90] sm:$0xff] }
  0x84   : > { %1252 = vmatprep.mubr.bf16.mxu1 %v5531_v3  ;;  %1222 = vmatprep.subr.bf16.mxu1 %v5824_v24  ;;  %7454 = vst [vmem:[#allocation36_spill] sm:$0xff] %v5851_v53  ;;  %v368_v3 = vld [vmem:[%s7276_s2 + $0x138] sm:$0xff]  ;;  %v351_v15 = vld [vmem:[%s7276_s2 + $0xb0] sm:$0xff] }
  0x85   : > { %7453 = vst [vmem:[#allocation35_spill] sm:$0xff] %v5848_v37  ;;  %7456 = vst [vmem:[#allocation38_spill] sm:$0xff] %v5869_v54  ;;  %v356_v24 = vld [vmem:[%s7276_s2 + $0xd8] sm:$0xff]  ;;  %v5893_v25 = vcombine.low %v364_v60, %v368_v3 }
  0x86   : > { %1182 = vmatpush1.bf16.msra.mxu0 %v5821_v7  ;;  %7457 = vst [vmem:[#allocation39_spill] sm:$0xff] %v5872_v59  ;;  %v5878_v7 = vcombine.high %v355_v8, %v359_v38  ;;  %v360_v6 = vld [vmem:[%s7276_s2 + $0xf8] sm:$0xff] }
  0x87   : > { %1183 = vmatprep.subr.bf16.mxu0 %v5827_v13  ;;  %1223 = vmatpush1.bf16.msra.mxu1 %v5844_v26  ;;  %v5875_v13 = vcombine.high %v364_v60, %v368_v3  ;;  %7460 = vst [vmem:[#allocation42_spill] sm:$0xff] %v5893_v25  ;;  %v348_v26 = vld [vmem:[%s7276_s2 + $0x98] sm:$0xff]  ;;  %v339_v3 = vld [vmem:[%s7276_s2 + $0x50] sm:$0xff] }
  0x88   : > { %1224 = vmatprep.subr.bf16.mxu1 %v5851_v53  ;;  %7459 = vst [vmem:[#allocation41_spill] sm:$0xff] %v5878_v7  ;;  %v5902_v53 = vcombine.high %v347_v16, %v351_v15  ;;  %v352_v60 = vld [vmem:[%s7276_s2 + $0xb8] sm:$0xff] }
  0x89   : > { %7458 = vst [vmem:[#allocation40_spill] sm:$0xff] %v5875_v13 }
  0x8a   : > { %1184 = vmatpush1.bf16.msra.mxu0 %v5848_v37  ;;  %v5899_v37 = vcombine.high %v356_v24, %v360_v6  ;;  %7463 = vst [vmem:[#allocation45_spill] sm:$0xff] %v5902_v53 }
  0x8b   : > { %1185 = vmatprep.subr.bf16.mxu0 %v5854_v43  ;;  %1225 = vmatpush1.bf16.msra.mxu1 %v5869_v54  ;;  %v5896_v43 = vcombine.low %v355_v8, %v359_v38  ;;  %v343_v8 = vld [vmem:[%s7276_s2 + $0x70] sm:$0xff]  ;;  %v5917_v38 = vcombine.low %v356_v24, %v360_v6  ;;  %v340_v54 = vld [vmem:[%s7276_s2 + $0x58] sm:$0xff] }
  0x8c   : > { %1226 = vmatprep.subr.bf16.mxu1 %v5875_v13  ;;  %7462 = vst [vmem:[#allocation44_spill] sm:$0xff] %v5899_v37  ;;  %v5926_v13 = vcombine.high %v339_v3, %v343_v8  ;;  %v344_v24 = vld [vmem:[%s7276_s2 + $0x78] sm:$0xff]  ;;  %v331_v6 = vld [vmem:[%s7276_s2 + $0x10] sm:$0xff] }
  0x8d   : > { %7461 = vst [vmem:[#allocation43_spill] sm:$0xff] %v5896_v43  ;;  %7464 = vst [vmem:[#allocation46_spill] sm:$0xff] %v5917_v38 }
  0x8e   : > { %1186 = vmatpush1.bf16.msra.mxu0 %v5872_v59  ;;  %v5923_v59 = vcombine.high %v348_v26, %v352_v60  ;;  %7467 = vst [vmem:[#allocation49_spill] sm:$0xff] %v5926_v13 }
  0x8f   : > { %1187 = vmatprep.subr.bf16.mxu0 %v5878_v7  ;;  %1227 = vmatpush1.bf16.msra.mxu1 %v5893_v25  ;;  %v5920_v7 = vcombine.low %v347_v16, %v351_v15  ;;  %v335_v16 = vld [vmem:[%s7276_s2 + $0x30] sm:$0xff]  ;;  %v5941_v15 = vcombine.low %v348_v26, %v352_v60  ;;  %v332_v25 = vld [vmem:[%s7276_s2 + $0x18] sm:$0xff] }
  0x90   : > { %1228 = vmatprep.subr.bf16.mxu1 %v5899_v37  ;;  %7466 = vst [vmem:[#allocation48_spill] sm:$0xff] %v5923_v59  ;;  %v5950_v37 = vcombine.high %v331_v6, %v335_v16  ;;  %v336_v26 = vld [vmem:[%s7276_s2 + $0x38] sm:$0xff]  ;;  %v451_v60 = vld [vmem:[%s7276_s2 + $0x3d0] sm:$0xff] }
  0x91   : > { %7465 = vst [vmem:[#allocation47_spill] sm:$0xff] %v5920_v7  ;;  %7468 = vst [vmem:[#allocation50_spill] sm:$0xff] %v5941_v15 }
  0x92   : > { %1188 = vmatpush1.bf16.msra.mxu0 %v5896_v43  ;;  %v5947_v43 = vcombine.high %v340_v54, %v344_v24  ;;  %7471 = vst [vmem:[#allocation53_spill] sm:$0xff] %v5950_v37 }
  0x93   : > { %1189 = vmatprep.subr.bf16.mxu0 %v5902_v53  ;;  %1229 = vmatpush1.bf16.msra.mxu1 %v5917_v38  ;;  %v5944_v53 = vcombine.low %v339_v3, %v343_v8  ;;  %v455_v3 = vld [vmem:[%s7276_s2 + $0x3f0] sm:$0xff]  ;;  %v5965_v8 = vcombine.low %v340_v54, %v344_v24  ;;  %v452_v38 = vld [vmem:[%s7276_s2 + $0x3d8] sm:$0xff] }
  0x94   : > { %1230 = vmatprep.subr.bf16.mxu1 %v5923_v59  ;;  %7470 = vst [vmem:[#allocation52_spill] sm:$0xff] %v5947_v43  ;;  %v5974_v59 = vcombine.high %v451_v60, %v455_v3  ;;  %v456_v54 = vld [vmem:[%s7276_s2 + $0x3f8] sm:$0xff]  ;;  %v443_v24 = vld [vmem:[%s7276_s2 + $0x390] sm:$0xff] }
  0x95   : > { %7469 = vst [vmem:[#allocation51_spill] sm:$0xff] %v5944_v53  ;;  %7472 = vst [vmem:[#allocation54_spill] sm:$0xff] %v5965_v8 }
  0x96   : > { %1190 = vmatpush1.bf16.msra.mxu0 %v5920_v7  ;;  %v5971_v7 = vcombine.high %v332_v25, %v336_v26  ;;  %7475 = vst [vmem:[#allocation57_spill] sm:$0xff] %v5974_v59 }
  0x97   : > { %1191 = vmatprep.subr.bf16.mxu0 %v5926_v13  ;;  %1231 = vmatpush1.bf16.msra.mxu1 %v5941_v15  ;;  %v5968_v13 = vcombine.low %v331_v6, %v335_v16  ;;  %v447_v6 = vld [vmem:[%s7276_s2 + $0x3b0] sm:$0xff]  ;;  %v5989_v16 = vcombine.low %v332_v25, %v336_v26  ;;  %v444_v15 = vld [vmem:[%s7276_s2 + $0x398] sm:$0xff] }
  0x98   : > { %1232 = vmatprep.subr.bf16.mxu1 %v5947_v43  ;;  %7474 = vst [vmem:[#allocation56_spill] sm:$0xff] %v5971_v7  ;;  %v5998_v43 = vcombine.high %v443_v24, %v447_v6  ;;  %v448_v25 = vld [vmem:[%s7276_s2 + $0x3b8] sm:$0xff]  ;;  %v435_v26 = vld [vmem:[%s7276_s2 + $0x350] sm:$0xff] }
  0x99   : > { %7473 = vst [vmem:[#allocation55_spill] sm:$0xff] %v5968_v13  ;;  %7476 = vst [vmem:[#allocation58_spill] sm:$0xff] %v5989_v16 }
  0x9a   : > { %1192 = vmatpush1.bf16.msra.mxu0 %v5944_v53  ;;  %v5995_v53 = vcombine.high %v452_v38, %v456_v54  ;;  %7479 = vst [vmem:[#allocation61_spill] sm:$0xff] %v5998_v43 }
  0x9b   : > { %1193 = vmatprep.subr.bf16.mxu0 %v5950_v37  ;;  %1233 = vmatpush1.bf16.msra.mxu1 %v5965_v8  ;;  %v5992_v37 = vcombine.low %v451_v60, %v455_v3  ;;  %v439_v60 = vld [vmem:[%s7276_s2 + $0x370] sm:$0xff]  ;;  %v6013_v3 = vcombine.low %v452_v38, %v456_v54  ;;  %v436_v8 = vld [vmem:[%s7276_s2 + $0x358] sm:$0xff] }
  0x9c   : > { %1234 = vmatprep.subr.bf16.mxu1 %v5971_v7  ;;  %7478 = vst [vmem:[#allocation60_spill] sm:$0xff] %v5995_v53  ;;  %v6022_v7 = vcombine.high %v435_v26, %v439_v60  ;;  %v440_v38 = vld [vmem:[%s7276_s2 + $0x378] sm:$0xff]  ;;  %v427_v54 = vld [vmem:[%s7276_s2 + $0x310] sm:$0xff] }
  0x9d   : > { %7477 = vst [vmem:[#allocation59_spill] sm:$0xff] %v5992_v37  ;;  %7480 = vst [vmem:[#allocation62_spill] sm:$0xff] %v6013_v3 }
  0x9e   : > { %1194 = vmatpush1.bf16.msra.mxu0 %v5968_v13  ;;  %v6019_v13 = vcombine.high %v444_v15, %v448_v25  ;;  %7483 = vst [vmem:[#allocation65_spill] sm:$0xff] %v6022_v7 }
  0x9f   : > { %1195 = vmatprep.subr.bf16.mxu0 %v5974_v59  ;;  %1235 = vmatpush1.bf16.msra.mxu1 %v5989_v16  ;;  %v6016_v59 = vcombine.low %v443_v24, %v447_v6  ;;  %v431_v24 = vld [vmem:[%s7276_s2 + $0x330] sm:$0xff]  ;;  %v6037_v6 = vcombine.low %v444_v15, %v448_v25  ;;  %v428_v16 = vld [vmem:[%s7276_s2 + $0x318] sm:$0xff] }
  0xa0   : > { %1236 = vmatprep.subr.bf16.mxu1 %v5995_v53  ;;  %7482 = vst [vmem:[#allocation64_spill] sm:$0xff] %v6019_v13  ;;  %v6046_v53 = vcombine.high %v427_v54, %v431_v24  ;;  %v432_v15 = vld [vmem:[%s7276_s2 + $0x338] sm:$0xff]  ;;  %v419_v25 = vld [vmem:[%s7276_s2 + $0x2d0] sm:$0xff] }
  0xa1   : > { %7481 = vst [vmem:[#allocation63_spill] sm:$0xff] %v6016_v59  ;;  %7484 = vst [vmem:[#allocation66_spill] sm:$0xff] %v6037_v6 }
  0xa2   : > { %1196 = vmatpush2.bf16.msra.mxu0 %v5992_v37  ;;  %v6043_v37 = vcombine.high %v436_v8, %v440_v38  ;;  %7487 = vst [vmem:[#allocation69_spill] sm:$0xff] %v6046_v53 }
  0xa3   : > { %1197 = vmatprep.subr.bf16.mxu0 %v5998_v43  ;;  %1237 = vmatpush2.bf16.msra.mxu1 %v6013_v3  ;;  %v6040_v43 = vcombine.low %v435_v26, %v439_v60  ;;  %v423_v26 = vld [vmem:[%s7276_s2 + $0x2f0] sm:$0xff]  ;;  %v6061_v60 = vcombine.low %v436_v8, %v440_v38  ;;  %v420_v3 = vld [vmem:[%s7276_s2 + $0x2d8] sm:$0xff] }
  0xa4   : > { %1238 = vmatprep.subr.bf16.mxu1 %v6019_v13  ;;  %7486 = vst [vmem:[#allocation68_spill] sm:$0xff] %v6043_v37  ;;  %v6070_v13 = vcombine.high %v419_v25, %v423_v26  ;;  %v424_v8 = vld [vmem:[%s7276_s2 + $0x2f8] sm:$0xff]  ;;  %v411_v38 = vld [vmem:[%s7276_s2 + $0x290] sm:$0xff] }
  0xa5   : > { %7485 = vst [vmem:[#allocation67_spill] sm:$0xff] %v6040_v43  ;;  %7488 = vst [vmem:[#allocation70_spill] sm:$0xff] %v6061_v60 }
  0xa6   : > { %1198 = vmatpush2.bf16.msra.mxu0 %v6016_v59  ;;  %v6067_v59 = vcombine.high %v428_v16, %v432_v15  ;;  %7491 = vst [vmem:[#allocation73_spill] sm:$0xff] %v6070_v13 }
  0xa7   : > { %1199 = vmatprep.subr.bf16.mxu0 %v6022_v7  ;;  %1239 = vmatpush2.bf16.msra.mxu1 %v6037_v6  ;;  %v6064_v7 = vcombine.low %v427_v54, %v431_v24  ;;  %v415_v54 = vld [vmem:[%s7276_s2 + $0x2b0] sm:$0xff]  ;;  %v6085_v24 = vcombine.low %v428_v16, %v432_v15  ;;  %v412_v6 = vld [vmem:[%s7276_s2 + $0x298] sm:$0xff] }
  0xa8   : > { %1240 = vmatprep.subr.bf16.mxu1 %v6043_v37  ;;  %7490 = vst [vmem:[#allocation72_spill] sm:$0xff] %v6067_v59  ;;  %v6094_v37 = vcombine.high %v411_v38, %v415_v54  ;;  %v416_v16 = vld [vmem:[%s7276_s2 + $0x2b8] sm:$0xff]  ;;  %v403_v15 = vld [vmem:[%s7276_s2 + $0x250] sm:$0xff] }
  0xa9   : > { %7489 = vst [vmem:[#allocation71_spill] sm:$0xff] %v6064_v7  ;;  %7492 = vst [vmem:[#allocation74_spill] sm:$0xff] %v6085_v24 }
  0xaa   : > { %1200 = vmatpush2.bf16.msra.mxu0 %v6040_v43  ;;  %v6091_v43 = vcombine.high %v420_v3, %v424_v8  ;;  %7495 = vst [vmem:[#allocation77_spill] sm:$0xff] %v6094_v37 }
  0xab   : > { %1201 = vmatprep.subr.bf16.mxu0 %v6046_v53  ;;  %1241 = vmatpush2.bf16.msra.mxu1 %v6061_v60  ;;  %v6088_v53 = vcombine.low %v419_v25, %v423_v26  ;;  %v407_v25 = vld [vmem:[%s7276_s2 + $0x270] sm:$0xff]  ;;  %v6109_v26 = vcombine.low %v420_v3, %v424_v8  ;;  %v404_v60 = vld [vmem:[%s7276_s2 + $0x258] sm:$0xff] }
  0xac   : > { %1242 = vmatprep.subr.bf16.mxu1 %v6067_v59  ;;  %7494 = vst [vmem:[#allocation76_spill] sm:$0xff] %v6091_v43  ;;  %v6118_v59 = vcombine.high %v403_v15, %v407_v25  ;;  %v408_v3 = vld [vmem:[%s7276_s2 + $0x278] sm:$0xff]  ;;  %v395_v8 = vld [vmem:[%s7276_s2 + $0x210] sm:$0xff] }
  0xad   : > { %7493 = vst [vmem:[#allocation75_spill] sm:$0xff] %v6088_v53 }
  0xae   : > { %1202 = vmatpush2.bf16.msra.mxu0 %v6064_v7  ;;  %v6115_v7 = vcombine.high %v412_v6, %v416_v16  ;;  %7496 = vst [vmem:[#allocation78_spill] sm:$0xff] %v6118_v59 }
  0xaf   : > { %1203 = vmatprep.subr.bf16.mxu0 %v6070_v13  ;;  %1243 = vmatpush2.bf16.msra.mxu1 %v6085_v24  ;;  %v6112_v13 = vcombine.low %v411_v38, %v415_v54  ;;  %v399_v38 = vld [vmem:[%s7276_s2 + $0x230] sm:$0xff]  ;;  %v6133_v54 = vcombine.low %v412_v6, %v416_v16  ;;  %v396_v24 = vld [vmem:[%s7276_s2 + $0x218] sm:$0xff]  ;;  %v6151_v16 = vcombine.low %v404_v60, %v408_v3 }
  0xb0   : > { %1244 = vmatprep.subr.bf16.mxu1 %v6091_v43  ;;  %v6142_v43 = vcombine.high %v395_v8, %v399_v38  ;;  %v400_v6 = vld [vmem:[%s7276_s2 + $0x238] sm:$0xff] }
  0xb2   : > { %1204 = vmatpush2.bf16.msra.mxu0 %v6088_v53  ;;  %v6139_v53 = vcombine.high %v404_v60, %v408_v3 }
  0xb3   : > { %1205 = vmatprep.subr.bf16.mxu0 %v6094_v37  ;;  %1245 = vmatpush2.bf16.msra.mxu1 %v6109_v26  ;;  %v6136_v37 = vcombine.low %v403_v15, %v407_v25  ;;  %v6154_v15 = vcombine.low %v395_v8, %v399_v38  ;;  %v6157_v25 = vcombine.high %v396_v24, %v400_v6 }
  0xb4   : > { %1246 = vmatprep.subr.bf16.mxu1 %v6115_v7 }
  0xb6   : > { %1206 = vmatpush2.bf16.msra.mxu0 %v6112_v13 }
  0xb7   : > { %1207 = vmatprep.subr.bf16.mxu0 %v6118_v59  ;;  %1247 = vmatpush2.bf16.msra.mxu1 %v6133_v54  ;;  %v6161_v59 = vcombine.low %v396_v24, %v400_v6  ;;  %v324_v24 = vld [vmem:[#allocation3] sm:$0xff] }
  0xb8   : > { %1248 = vmatprep.subr.bf16.mxu1 %v6139_v53 }
  0xba   : > { %1208 = vmatpush2.bf16.msra.mxu0 %v6136_v37 }
  0xbb   : > { %1209 = vmatprep.subr.bf16.mxu0 %v6142_v43  ;;  %1249 = vmatpush2.bf16.msra.mxu1 %v6151_v16 }
  0xbc   : > { %1250 = vmatprep.subr.bf16.mxu1 %v6157_v25 }
  0xbe   : > { %1210 = vmatpush2.bf16.msra.mxu0 %v6154_v15 }
  0xbf   : > { %2103 = vmatprep.subr.bf16.mxu0 %v5397_v20  ;;  %1251 = vmatpush2.bf16.msra.mxu1 %v6161_v59  ;;  %v7497_v20 = vld [vmem:[#allocation9_spill] sm:$0xff] }
  0xc0   : > { %2144 = vmatprep.subr.bf16.mxu1 %v5422_v29  ;;  %v7501_v29 = vld [vmem:[#allocation13_spill] sm:$0xff] }
  0xc1   : > { %1212 = vmatmul.mubr.bf16.vlgmr.msra.gmra.mxu0 %v5790_v27 }
  0xc2   : > { %2104 = vmatpush1.bf16.msra.mxu0 %v5399_v21  ;;  %1253 = vmatmul.mubr.bf16.vlgmr.msra.gmra.mxu1 %v5790_v27  ;;  %v7498_v21 = vld [vmem:[#allocation8_spill] sm:$0xff] }
  0xc3   : > { %2105 = vmatprep.subr.bf16.mxu0 %v5404_v23  ;;  %2145 = vmatpush1.bf16.msra.mxu1 %v5424_v30  ;;  %v7499_v23 = vld [vmem:[#allocation10_spill] sm:$0xff]  ;;  %v7502_v30 = vld [vmem:[#allocation12_spill] sm:$0xff] }
  0xc4   : > { %2146 = vmatprep.subr.bf16.mxu1 %v5435_v34  ;;  %v7504_v34 = vld [vmem:[#allocation15_spill] sm:$0xff] }
  0xc6   : > { %2106 = vmatpush1.bf16.msra.mxu0 %v5420_v28  ;;  %v7500_v28 = vld [vmem:[#allocation11_spill] sm:$0xff] }
  0xc7   : > { %2107 = vmatprep.subr.bf16.mxu0 %v5433_v33  ;;  %2147 = vmatpush1.bf16.msra.mxu1 %v5451_v39  ;;  %v7503_v33 = vld [vmem:[#allocation14_spill] sm:$0xff]  ;;  %v7505_v39 = vld [vmem:[#allocation17_spill] sm:$0xff] }
  0xc8   : > { %2148 = vmatprep.subr.bf16.mxu1 %v5457_v41  ;;  %v7507_v41 = vld [vmem:[#allocation18_spill] sm:$0xff] }
  0xca   : > { %2108 = vmatpush1.bf16.msra.mxu0 %v5454_v40  ;;  %v7506_v40 = vld [vmem:[#allocation16_spill] sm:$0xff] }
  0xcb   : > { %2109 = vmatprep.subr.bf16.mxu0 %v5460_v42  ;;  %2149 = vmatpush1.bf16.msra.mxu1 %v5475_v47  ;;  %v7508_v42 = vld [vmem:[#allocation19_spill] sm:$0xff]  ;;  %v7509_v47 = vld [vmem:[#allocation21_spill] sm:$0xff] }
  0xcc   : > { %2150 = vmatprep.subr.bf16.mxu1 %v5481_v49  ;;  %v7511_v49 = vld [vmem:[#allocation22_spill] sm:$0xff] }
  0xce   : > { %2110 = vmatpush1.bf16.msra.mxu0 %v5478_v48  ;;  %v7510_v48 = vld [vmem:[#allocation20_spill] sm:$0xff] }
  0xcf   : > { %2111 = vmatprep.subr.bf16.mxu0 %v5484_v50  ;;  %2151 = vmatpush1.bf16.msra.mxu1 %v5499_v55  ;;  %v7512_v50 = vld [vmem:[#allocation23_spill] sm:$0xff]  ;;  %v7513_v55 = vld [vmem:[#allocation25_spill] sm:$0xff] }
  0xd0   : > { %2152 = vmatprep.subr.bf16.mxu1 %v5505_v57  ;;  %v7515_v57 = vld [vmem:[#allocation26_spill] sm:$0xff] }
  0xd2   : > { %2112 = vmatpush1.bf16.msra.mxu0 %v5502_v56  ;;  %v7514_v56 = vld [vmem:[#allocation24_spill] sm:$0xff] }
  0xd3   : > { %2113 = vmatprep.subr.bf16.mxu0 %v5508_v58  ;;  %2153 = vmatpush1.bf16.msra.mxu1 %v5523_v63  ;;  %v7516_v58 = vld [vmem:[#allocation28_spill] sm:$0xff] }
  0xd4   : > { %2154 = vmatprep.subr.bf16.mxu1 %v5529_v2  ;;  %v1261_v63 = vld [vmem:[%s5383_s17] sm:$0xff] }
  0xd5   : > { %v1264_v2 = vunpack.c.h.bf16 %v1261_v63 }
  0xd6   : > { %2114 = vmatpush1.bf16.msra.mxu0 %v5526_v1  ;;  %v1263_v1 = vunpack.c.l.bf16 %v1261_v63 }
  0xd7   : > { %2115 = vmatprep.subr.bf16.mxu0 %v5534_v4  ;;  %2155 = vmatpush1.bf16.msra.mxu1 %v5550_v9 }
  0xd8   : > { %2156 = vmatprep.subr.bf16.mxu1 %v5557_v11 }
  0xda   : > { %2116 = vmatpush1.bf16.msra.mxu0 %v5554_v10 }
  0xdb   : > { %2117 = vmatprep.subr.bf16.mxu0 %v5560_v12  ;;  %2157 = vmatpush1.bf16.msra.mxu1 %v5575_v17 }
  0xdc   : > { %2158 = vmatprep.subr.bf16.mxu1 %v5581_v19  ;;  %v1262_v19 = vld [vmem:[%s5383_s17 + $0x8] sm:$0xff] }
  0xde   : > { %2118 = vmatpush1.bf16.msra.mxu0 %v5578_v18 }
  0xdf   : > { %2119 = vmatprep.subr.bf16.mxu0 %v5584_v22  ;;  %2159 = vmatpush1.bf16.msra.mxu1 %v5599_v31 }
  0xe0   : > { %2160 = vmatprep.subr.bf16.mxu1 %v5605_v35  ;;  %v1266_v35 = vunpack.c.h.bf16 %v1262_v19 }
  0xe2   : > { %2120 = vmatpush2.bf16.msra.mxu0 %v5602_v32 }
  0xe3   : > { %2121 = vmatprep.subr.bf16.mxu0 %v5608_v36  ;;  %2161 = vmatpush2.bf16.msra.mxu1 %v5623_v45 }
  0xe4   : > { %2162 = vmatprep.subr.bf16.mxu1 %v5629_v51 }
  0xe6   : > { %2122 = vmatpush2.bf16.msra.mxu0 %v5626_v46  ;;  %v1265_v46 = vunpack.c.l.bf16 %v1262_v19 }
  0xe7   : > { %2123 = vmatprep.subr.bf16.mxu0 %v5632_v52  ;;  %2163 = vmatpush2.bf16.msra.mxu1 %v5647_v61 }
  0xe8   : > { %2164 = vmatprep.subr.bf16.mxu1 %v5653_v0 }
  0xea   : > { %2124 = vmatpush2.bf16.msra.mxu0 %v5650_v62 }
  0xeb   : > { %2125 = vmatprep.subr.bf16.mxu0 %v5656_v5  ;;  %2165 = vmatpush2.bf16.msra.mxu1 %v5671_v14 }
  0xec   : > { %2166 = vmatprep.subr.bf16.mxu1 %v7497_v20 }
  0xee   : > { %2126 = vmatpush2.bf16.msra.mxu0 %v7498_v21 }
  0xef   : > { %2127 = vmatprep.subr.bf16.mxu0 %v7499_v23  ;;  %2167 = vmatpush2.bf16.msra.mxu1 %v7500_v28 }
  0xf0   : > { %2168 = vmatprep.subr.bf16.mxu1 %v7501_v29  ;;  %v4633_v29 = vld [vmem:[%s5385_s22 + $0x30] sm:$0xff] }
  0xf2   : > { %2128 = vmatpush2.bf16.msra.mxu0 %v7502_v30  ;;  %v1274_v30 = vunpack.c.l.bf16 %v4633_v29 }
  0xf3   : > { %2129 = vmatprep.subr.bf16.mxu0 %v7503_v33  ;;  %2169 = vmatpush2.bf16.msra.mxu1 %v7504_v34  ;;  %v1275_v33 = vunpack.c.h.bf16 %v4633_v29  ;;  %v7530_v29 = vld [vmem:[#allocation42_spill] sm:$0xff] }
  0xf4   : > { %2170 = vmatprep.subr.bf16.mxu1 %v7505_v39 }
  0xf6   : > { %2130 = vmatpush2.bf16.msra.mxu0 %v7506_v40 }
  0xf7   : > { %2131 = vmatprep.subr.bf16.mxu0 %v7507_v41  ;;  %2171 = vmatpush2.bf16.msra.mxu1 %v7508_v42 }
  0xf8   : > { %2172 = vmatprep.subr.bf16.mxu1 %v7509_v47 }
  0xfa   : > { %2132 = vmatpush2.bf16.msra.mxu0 %v7510_v48 }
  0xfb   : > { %2133 = vmatprep.subr.bf16.mxu0 %v7511_v49  ;;  %2173 = vmatpush2.bf16.msra.mxu1 %v7512_v50  ;;  %v4634_v50 = vld [vmem:[%s5385_s22 + $0x38] sm:$0xff] }
  0xfc   : > { %2174 = vmatprep.subr.bf16.mxu1 %v7513_v55 }
  0xfe   : > { %2134 = vmatpush2.bf16.msra.mxu0 %v7514_v56 }
  0xff   : > { %2185 = vmatprep.subr.bf16.mxu0 %v7515_v57  ;;  %2175 = vmatpush2.bf16.msra.mxu1 %v5793_v44 }
 0x100   : > { %2226 = vmatprep.subr.bf16.mxu1 %v7516_v58  ;;  %v1277_v58 = vunpack.c.h.bf16 %v4634_v50 }
 0x141   : > { %v1131_v4 = vpop.f32.mrf.mxu0  ;;  %v1172_v17 = vpop.f32.mrf.mxu1 }
 0x142   : > { %v1267_v9 = vadd.f32 %v1263_v1, %v1131_v4  ;;  %v1269_v52 = vadd.f32 %v1265_v46, %v1172_v17  ;;  %v1276_v1 = vunpack.c.l.bf16 %v4634_v50  ;;  %v7541_v50 = vld [vmem:[#allocation51_spill] sm:$0xff] }
 0x143   : > { %v1133_v10 = vpop.f32.mrf.mxu0  ;;  %v1174_v31 = vpop.f32.mrf.mxu1 }
 0x144   : > { %v4635_v11 = vmul.f32 -1.442695, %v1267_v9  ;;  %v1268_v12 = vadd.f32 %v1264_v2, %v1133_v10  ;;  %v1270_v51 = vadd.f32 %v1266_v35, %v1174_v31  ;;  %v326_v31 = vld [vmem:[#allocation5] sm:$0xff] }
 0x145   : > { %v1135_v18 = vpop.f32.mrf.mxu0  ;;  %v1176_v36 = vpop.f32.mrf.mxu1 }
 0x146   : > { %5105 = vpow2.f32 %v4635_v11  ;;  %v4636_v22 = vmul.f32 -1.442695, %v1268_v12  ;;  %v4637_v61 = vmul.f32 -1.442695, %v1270_v51 }
 0x147   : > { %v1136_v32 = vpop.f32.mrf.mxu0  ;;  %v1177_v45 = vpop.f32.mrf.mxu1 }
 0x148   : > { %5107 = vpow2.f32 %v4636_v22 }
 0x149   : > { %5109 = vtanh.f32 %v1269_v52 }
 0x14a   : > { %5111 = vpow2.f32 %v4637_v61 }
 0x153   : > { %v5106_v62 = vpop.eup %5105 }
 0x154   : > { %v1285_v0 = vadd.f32 1.0, %v5106_v62 }
 0x155   : > { %v5108_v5 = vpop.eup %5107 }
 0x156   : > { %5113 = vrcp.f32 %v1285_v0  ;;  %v1291_v14 = vadd.f32 1.0, %v5108_v5  ;;  %v5110_v44 = vpop.eup %5109  ;;  %v7517_v5 = vld [vmem:[#allocation27_spill] sm:$0xff] }
 0x157   : > { %v5112_v27 = vpop.eup %5111 }
 0x158   : > { %5115 = vrcp.f32 %v1291_v14  ;;  %v1298_v8 = vadd.f32 1.0, %v5112_v27  ;;  %v7518_v14 = vld [vmem:[#allocation30_spill] sm:$0xff]  ;;  %v7520_v27 = vld [vmem:[#allocation32_spill] sm:$0xff] }
 0x15a   : > { %5117 = vrcp.f32 %v1298_v8  ;;  %v7524_v8 = vld [vmem:[#allocation36_spill] sm:$0xff] }
 0x163   : > { %v5114_v60 = vpop.eup %5113 }
 0x164   : > { %v1302_v3 = vmul.f32 %v5114_v60, %v5110_v44  ;;  %v7519_v44 = vld [vmem:[#allocation29_spill] sm:$0xff]  ;;  %v7521_v60 = vld [vmem:[#allocation31_spill] sm:$0xff] }
 0x165   : > { %v5116_v38 = vpop.eup %5115 }
 0x166   : > { %v1301_v6 = vmul.f32 %v5116_v38, %v324_v24  ;;  %v7522_v24 = vld [vmem:[#allocation34_spill] sm:$0xff]  ;;  %v7525_v38 = vld [vmem:[#allocation35_spill] sm:$0xff] }
 0x167   : > { %v5118_v21 = vpop.eup %5117 }
 0x168   : > { %v6236_v20 = vadd.f32 %v1302_v3, %v1301_v6  ;;  %v7523_v3 = vld [vmem:[#allocation33_spill] sm:$0xff]  ;;  %v7526_v6 = vld [vmem:[#allocation38_spill] sm:$0xff] }
 0x16a   : > { %5119 = vtanh.f32 %v6236_v20 }
 0x177   : > { %v5120_v23 = vpop.eup %5119 }
 0x178   : > { %v1305_v28 = vmul.f32 %v5120_v23, %v5118_v21  ;;  %v7527_v21 = vld [vmem:[#allocation37_spill] sm:$0xff]  ;;  %v7528_v23 = vld [vmem:[#allocation40_spill] sm:$0xff] }
 0x17a   : > { %1330 = vst [vmem:[%s5376_s11] sm:$0xff] %v1305_v28  ;;  %v6246_v0 = vpack.c.bf16 %v1305_v28, %v1305_v28  ;;  %v7529_v28 = vld [vmem:[#allocation39_spill] sm:$0xff] }
 0x181   : > { %v1213_v34 = vpop.f32.mrf.mxu0 }
 0x182   : > { %v1278_v39 = vadd.f32 %v1274_v30, %v1213_v34  ;;  %v1254_v47 = vpop.f32.mrf.mxu1  ;;  %v7531_v30 = vld [vmem:[#allocation41_spill] sm:$0xff]  ;;  %v7533_v34 = vld [vmem:[#allocation43_spill] sm:$0xff] }
 0x183   : > { %v1215_v40 = vpop.f32.mrf.mxu0  ;;  %v1280_v4 = vadd.f32 %v1276_v1, %v1254_v47  ;;  %v7538_v47 = vld [vmem:[#allocation50_spill] sm:$0xff]  ;;  %v7547_v1 = vld [vmem:[#allocation57_spill] sm:$0xff] }
 0x184   : > { %v4638_v41 = vmul.f32 -1.442695, %v1278_v39  ;;  %v1279_v42 = vadd.f32 %v1275_v33, %v1215_v40  ;;  %v1256_v55 = vpop.f32.mrf.mxu1  ;;  %v7532_v33 = vld [vmem:[#allocation44_spill] sm:$0xff]  ;;  %v7534_v39 = vld [vmem:[#allocation46_spill] sm:$0xff]  ;;  %v7535_v40 = vld [vmem:[#allocation45_spill] sm:$0xff] }
 0x185   : > { %v1217_v48 = vpop.f32.mrf.mxu0  ;;  %v1281_v2 = vadd.f32 %v1277_v58, %v1256_v55  ;;  %v7542_v55 = vld [vmem:[#allocation54_spill] sm:$0xff]  ;;  %v7545_v58 = vld [vmem:[#allocation55_spill] sm:$0xff] }
 0x186   : > { %5121 = vpow2.f32 %v4638_v41  ;;  %v4639_v49 = vmul.f32 -1.442695, %v1279_v42  ;;  %v1258_v57 = vpop.f32.mrf.mxu1  ;;  %v7536_v41 = vld [vmem:[#allocation48_spill] sm:$0xff]  ;;  %v7537_v42 = vld [vmem:[#allocation47_spill] sm:$0xff]  ;;  %v7539_v48 = vld [vmem:[#allocation49_spill] sm:$0xff] }
 0x187   : > { %v1218_v56 = vpop.f32.mrf.mxu0  ;;  %v4640_v9 = vmul.f32 -1.442695, %v1281_v2  ;;  %v7544_v57 = vld [vmem:[#allocation56_spill] sm:$0xff] }
 0x188   : > { %5123 = vpow2.f32 %v4639_v49  ;;  %v1259_v63 = vpop.f32.mrf.mxu1  ;;  %v7540_v49 = vld [vmem:[#allocation52_spill] sm:$0xff]  ;;  %v7543_v56 = vld [vmem:[#allocation53_spill] sm:$0xff] }
 0x189   : > { %5125 = vtanh.f32 %v1280_v4  ;;  %v7546_v63 = vld [vmem:[#allocation58_spill] sm:$0xff]  ;;  %v7548_v2 = vld [vmem:[#allocation60_spill] sm:$0xff]  ;;  %v7549_v4 = vld [vmem:[#allocation59_spill] sm:$0xff] }
 0x18a   : > { %5127 = vpow2.f32 %v4640_v9  ;;  %v7550_v9 = vld [vmem:[#allocation62_spill] sm:$0xff] }
 0x193   : > { %v5122_v10 = vpop.eup %5121 }
 0x194   : > { %v1309_v11 = vadd.f32 1.0, %v5122_v10  ;;  %v7551_v10 = vld [vmem:[#allocation61_spill] sm:$0xff] }
 0x195   : > { %v5124_v12 = vpop.eup %5123 }
 0x196   : > { %5129 = vrcp.f32 %v1309_v11  ;;  %v1315_v17 = vadd.f32 1.0, %v5124_v12  ;;  %v5126_v18 = vpop.eup %5125  ;;  %v7552_v11 = vld [vmem:[#allocation64_spill] sm:$0xff]  ;;  %v7553_v12 = vld [vmem:[#allocation63_spill] sm:$0xff] }
 0x197   : > { %v5128_v19 = vpop.eup %5127 }
 0x198   : > { %5131 = vrcp.f32 %v1315_v17  ;;  %v1322_v35 = vadd.f32 1.0, %v5128_v19  ;;  %v7554_v17 = vld [vmem:[#allocation66_spill] sm:$0xff]  ;;  %v7556_v19 = vld [vmem:[#allocation68_spill] sm:$0xff] }
 0x19a   : > { %5133 = vrcp.f32 %v1322_v35  ;;  %v7560_v35 = vld [vmem:[#allocation72_spill] sm:$0xff] }
 0x1a3   : > { %v5130_v22 = vpop.eup %5129 }
 0x1a4   : > { %v1326_v45 = vmul.f32 %v5130_v22, %v5126_v18  ;;  %v7555_v18 = vld [vmem:[#allocation65_spill] sm:$0xff]  ;;  %v7557_v22 = vld [vmem:[#allocation67_spill] sm:$0xff] }
 0x1a5   : > { %v5132_v32 = vpop.eup %5131 }
 0x1a6   : > { %v1325_v36 = vmul.f32 %v5132_v32, %v326_v31  ;;  %v7558_v31 = vld [vmem:[#allocation70_spill] sm:$0xff]  ;;  %v7559_v32 = vld [vmem:[#allocation69_spill] sm:$0xff] }
 0x1a7   : > { %v5134_v51 = vpop.eup %5133 }
 0x1a8   : > { %v6242_v46 = vadd.f32 %v1326_v45, %v1325_v36  ;;  %v7561_v36 = vld [vmem:[#allocation71_spill] sm:$0xff]  ;;  %v7562_v45 = vld [vmem:[#allocation74_spill] sm:$0xff] }
 0x1aa   : > { %5135 = vtanh.f32 %v6242_v46 }
 0x1b7   : > { %v5136_v52 = vpop.eup %5135 }
 0x1b8   : > { %v1329_v61 = vmul.f32 %v5136_v52, %v5134_v51  ;;  %v7563_v51 = vld [vmem:[#allocation73_spill] sm:$0xff]  ;;  %v7564_v52 = vld [vmem:[#allocation76_spill] sm:$0xff] }
 0x1ba   : > { %4641 = vst [vmem:[%s5381_s15 + $0x18] sm:$0xff] %v1329_v61  ;;  %v1334_v62 = vpack.c.bf16 %v1329_v61, %v1329_v61  ;;  %v7565_v61 = vld [vmem:[#allocation75_spill] sm:$0xff] }
 0x1bc   : > { %2135 = vmatprep.mubr.bf16.mxu0 %v1334_v62  ;;  %2176 = vmatprep.mubr.bf16.mxu1 %v1334_v62 }
 0x1bd   : > { %2136 = vmatmul.mubr.bf16.vlgmr.msra.gmra.mxu0 %v6246_v0  ;;  %2177 = vmatmul.mubr.bf16.vlgmr.msra.gmra.mxu1 %v6246_v0 }
 0x1be   : > { %2186 = vmatpush1.bf16.msra.mxu0 %v7517_v5  ;;  %2227 = vmatpush1.bf16.msra.mxu1 %v7518_v14  ;;  %v7567_v5 = vld [vmem:[#allocation78_spill] sm:$0xff]  ;;  %v2396_v14 = vld [vmem:[%s7276_s2 + $0x1a8] sm:$0xff] }
 0x1bf   : > { %2217 = vmatprep.mubr.bf16.mxu0 %v1334_v62  ;;  %2258 = vmatprep.mubr.bf16.mxu1 %v1334_v62  ;;  %v7566_v62 = vld [vmem:[#allocation77_spill] sm:$0xff] }
 0x1c0   : > { %2187 = vmatprep.subr.bf16.mxu0 %v7519_v44  ;;  %2228 = vmatprep.subr.bf16.mxu1 %v7520_v27 }
 0x1c2   : > { %2188 = vmatpush1.bf16.msra.mxu0 %v7521_v60  ;;  %2229 = vmatpush1.bf16.msra.mxu1 %v7522_v24  ;;  %v2383_v24 = vld [vmem:[%s7276_s2 + $0x140] sm:$0xff] }
 0x1c3   : > { %2189 = vmatprep.subr.bf16.mxu0 %v7523_v3  ;;  %2230 = vmatprep.subr.bf16.mxu1 %v7524_v8  ;;  %v2387_v3 = vld [vmem:[%s7276_s2 + $0x160] sm:$0xff]  ;;  %v2384_v8 = vld [vmem:[%s7276_s2 + $0x148] sm:$0xff] }
 0x1c6   : > { %2190 = vmatpush1.bf16.msra.mxu0 %v7525_v38  ;;  %2231 = vmatpush1.bf16.msra.mxu1 %v7526_v6  ;;  %v6371_v38 = vcombine.high %v2383_v24, %v2387_v3  ;;  %v2388_v6 = vld [vmem:[%s7276_s2 + $0x168] sm:$0xff] }
 0x1c7   : > { %2191 = vmatprep.subr.bf16.mxu0 %v7527_v21  ;;  %2232 = vmatprep.subr.bf16.mxu1 %v7528_v23  ;;  %v6376_v21 = vcombine.low %v2383_v24, %v2387_v3  ;;  %v6378_v23 = vcombine.low %v2384_v8, %v2388_v6 }
 0x1ca   : > { %2192 = vmatpush1.bf16.msra.mxu0 %v7529_v28  ;;  %2233 = vmatpush1.bf16.msra.mxu1 %v7530_v29  ;;  %v6380_v28 = vcombine.high %v2384_v8, %v2388_v6  ;;  %v2375_v29 = vld [vmem:[%s7276_s2 + $0x100] sm:$0xff] }
 0x1cb   : > { %2193 = vmatprep.subr.bf16.mxu0 %v7531_v30  ;;  %2234 = vmatprep.subr.bf16.mxu1 %v7532_v33  ;;  %v2379_v30 = vld [vmem:[%s7276_s2 + $0x120] sm:$0xff]  ;;  %v2376_v33 = vld [vmem:[%s7276_s2 + $0x108] sm:$0xff] }
 0x1cc   : > { %v2455_v8 = vld [vmem:[%s7276_s2 + $0x380] sm:$0xff] }
 0x1cd   : > { %v2459_v6 = vld [vmem:[%s7276_s2 + $0x3a0] sm:$0xff] }
 0x1ce   : > { %2194 = vmatpush1.bf16.msra.mxu0 %v7533_v34  ;;  %2235 = vmatpush1.bf16.msra.mxu1 %v7534_v39  ;;  %v6395_v34 = vcombine.high %v2375_v29, %v2379_v30  ;;  %v2380_v39 = vld [vmem:[%s7276_s2 + $0x128] sm:$0xff] }
 0x1cf   : > { %2195 = vmatprep.subr.bf16.mxu0 %v7535_v40  ;;  %2236 = vmatprep.subr.bf16.mxu1 %v7536_v41  ;;  %v6400_v40 = vcombine.low %v2375_v29, %v2379_v30  ;;  %v6402_v41 = vcombine.low %v2376_v33, %v2380_v39  ;;  %v2456_v29 = vld [vmem:[%s7276_s2 + $0x388] sm:$0xff]  ;;  %v6539_v30 = vcombine.high %v2455_v8, %v2459_v6 }
 0x1d2   : > { %2196 = vmatpush1.bf16.msra.mxu0 %v7537_v42  ;;  %2237 = vmatpush1.bf16.msra.mxu1 %v7538_v47  ;;  %v6404_v42 = vcombine.high %v2376_v33, %v2380_v39  ;;  %v2367_v47 = vld [vmem:[%s7276_s2 + $0xc0] sm:$0xff]  ;;  %v2460_v33 = vld [vmem:[%s7276_s2 + $0x3a8] sm:$0xff]  ;;  %v6544_v39 = vcombine.low %v2455_v8, %v2459_v6 }
 0x1d3   : > { %2197 = vmatprep.subr.bf16.mxu0 %v7539_v48  ;;  %2238 = vmatprep.subr.bf16.mxu1 %v7540_v49  ;;  %v2371_v48 = vld [vmem:[%s7276_s2 + $0xe0] sm:$0xff]  ;;  %v2368_v49 = vld [vmem:[%s7276_s2 + $0xc8] sm:$0xff] }
 0x1d4   : > { %7568 = vst [vmem:[#allocation9_spill] sm:$0xff] %v6544_v39  ;;  %v2432_v8 = vld [vmem:[%s7276_s2 + $0x2c8] sm:$0xff] }
 0x1d6   : > { %2198 = vmatpush1.bf16.msra.mxu0 %v7541_v50  ;;  %2239 = vmatpush1.bf16.msra.mxu1 %v7542_v55  ;;  %v6419_v50 = vcombine.high %v2367_v47, %v2371_v48  ;;  %v2372_v55 = vld [vmem:[%s7276_s2 + $0xe8] sm:$0xff] }
 0x1d7   : > { %2199 = vmatprep.subr.bf16.mxu0 %v7543_v56  ;;  %2240 = vmatprep.subr.bf16.mxu1 %v7544_v57  ;;  %v6424_v56 = vcombine.low %v2367_v47, %v2371_v48  ;;  %v6426_v57 = vcombine.low %v2368_v49, %v2372_v55  ;;  %v6546_v47 = vcombine.low %v2456_v29, %v2460_v33 }
 0x1d8   : > { %v6548_v48 = vcombine.high %v2456_v29, %v2460_v33  ;;  %v2436_v29 = vld [vmem:[%s7276_s2 + $0x2e8] sm:$0xff]  ;;  %v2423_v33 = vld [vmem:[%s7276_s2 + $0x280] sm:$0xff] }
 0x1d9   : > { %7569 = vst [vmem:[#allocation8_spill] sm:$0xff] %v6546_v47 }
 0x1da   : > { %2200 = vmatpush1.bf16.msra.mxu0 %v7545_v58  ;;  %2241 = vmatpush1.bf16.msra.mxu1 %v7546_v63  ;;  %v6428_v58 = vcombine.high %v2368_v49, %v2372_v55  ;;  %v2359_v63 = vld [vmem:[%s7276_s2 + $0x80] sm:$0xff] }
 0x1db   : > { %2201 = vmatprep.subr.bf16.mxu0 %v7547_v1  ;;  %2242 = vmatprep.subr.bf16.mxu1 %v7548_v2  ;;  %v2363_v1 = vld [vmem:[%s7276_s2 + $0xa0] sm:$0xff]  ;;  %v2360_v2 = vld [vmem:[%s7276_s2 + $0x88] sm:$0xff] }
 0x1dc   : > { %v2447_v49 = vld [vmem:[%s7276_s2 + $0x340] sm:$0xff] }
 0x1dd   : > { %v2451_v55 = vld [vmem:[%s7276_s2 + $0x360] sm:$0xff] }
 0x1de   : > { %2202 = vmatpush2.bf16.msra.mxu0 %v7549_v4  ;;  %2243 = vmatpush2.bf16.msra.mxu1 %v7550_v9  ;;  %v6443_v4 = vcombine.high %v2359_v63, %v2363_v1  ;;  %v2364_v9 = vld [vmem:[%s7276_s2 + $0xa8] sm:$0xff] }
 0x1df   : > { %2203 = vmatprep.subr.bf16.mxu0 %v7551_v10  ;;  %2244 = vmatprep.subr.bf16.mxu1 %v7552_v11  ;;  %v6448_v10 = vcombine.low %v2359_v63, %v2363_v1  ;;  %v6450_v11 = vcombine.low %v2360_v2, %v2364_v9  ;;  %v2448_v63 = vld [vmem:[%s7276_s2 + $0x348] sm:$0xff]  ;;  %v6563_v1 = vcombine.high %v2447_v49, %v2451_v55 }
 0x1e1   : > { %7570 = vst [vmem:[#allocation10_spill] sm:$0xff] %v6563_v1 }
 0x1e2   : > { %2204 = vmatpush2.bf16.msra.mxu0 %v7553_v12  ;;  %2245 = vmatpush2.bf16.msra.mxu1 %v7554_v17  ;;  %v6452_v12 = vcombine.high %v2360_v2, %v2364_v9  ;;  %v2351_v17 = vld [vmem:[%s7276_s2 + $0x40] sm:$0xff]  ;;  %v2452_v2 = vld [vmem:[%s7276_s2 + $0x368] sm:$0xff]  ;;  %v6568_v9 = vcombine.low %v2447_v49, %v2451_v55 }
 0x1e3   : > { %2205 = vmatprep.subr.bf16.mxu0 %v7555_v18  ;;  %2246 = vmatprep.subr.bf16.mxu1 %v7556_v19  ;;  %v2355_v18 = vld [vmem:[%s7276_s2 + $0x60] sm:$0xff]  ;;  %v2352_v19 = vld [vmem:[%s7276_s2 + $0x48] sm:$0xff] }
 0x1e4   : > { %7571 = vst [vmem:[#allocation11_spill] sm:$0xff] %v6568_v9  ;;  %v2427_v49 = vld [vmem:[%s7276_s2 + $0x2a0] sm:$0xff] }
 0x1e6   : > { %2206 = vmatpush2.bf16.msra.mxu0 %v7557_v22  ;;  %2247 = vmatpush2.bf16.msra.mxu1 %v7558_v31  ;;  %v6467_v22 = vcombine.high %v2351_v17, %v2355_v18  ;;  %v2356_v31 = vld [vmem:[%s7276_s2 + $0x68] sm:$0xff] }
 0x1e7   : > { %2207 = vmatprep.subr.bf16.mxu0 %v7559_v32  ;;  %2248 = vmatprep.subr.bf16.mxu1 %v7560_v35  ;;  %v6472_v32 = vcombine.low %v2351_v17, %v2355_v18  ;;  %v6474_v35 = vcombine.low %v2352_v19, %v2356_v31  ;;  %v6570_v17 = vcombine.low %v2448_v63, %v2452_v2 }
 0x1e8   : > { %v6572_v18 = vcombine.high %v2448_v63, %v2452_v2  ;;  %v6623_v63 = vcombine.high %v2432_v8, %v2436_v29  ;;  %v2424_v2 = vld [vmem:[%s7276_s2 + $0x288] sm:$0xff] }
 0x1e9   : > { %7572 = vst [vmem:[#allocation13_spill] sm:$0xff] %v6570_v17 }
 0x1ea   : > { %2208 = vmatpush2.bf16.msra.mxu0 %v7561_v36  ;;  %2249 = vmatpush2.bf16.msra.mxu1 %v7562_v45  ;;  %v6476_v36 = vcombine.high %v2352_v19, %v2356_v31  ;;  %v2343_v45 = vld [vmem:[%s7276_s2] sm:$0xff]  ;;  %7573 = vst [vmem:[#allocation12_spill] sm:$0xff] %v6572_v18  ;;  %7580 = vst [vmem:[#allocation21_spill] sm:$0xff] %v6623_v63 }
 0x1eb   : > { %2209 = vmatprep.subr.bf16.mxu0 %v7563_v51  ;;  %2250 = vmatprep.subr.bf16.mxu1 %v7564_v52  ;;  %v2347_v51 = vld [vmem:[%s7276_s2 + $0x20] sm:$0xff]  ;;  %v2344_v52 = vld [vmem:[%s7276_s2 + $0x8] sm:$0xff] }
 0x1ec   : > { %v2439_v19 = vld [vmem:[%s7276_s2 + $0x300] sm:$0xff] }
 0x1ed   : > { %v2443_v31 = vld [vmem:[%s7276_s2 + $0x320] sm:$0xff] }
 0x1ee   : > { %2210 = vmatpush2.bf16.msra.mxu0 %v7565_v61  ;;  %2251 = vmatpush2.bf16.msra.mxu1 %v6109_v26  ;;  %v2391_v26 = vld [vmem:[%s7276_s2 + $0x180] sm:$0xff]  ;;  %v6491_v61 = vcombine.high %v2343_v45, %v2347_v51 }
 0x1ef   : > { %2211 = vmatprep.subr.bf16.mxu0 %v7566_v62  ;;  %2252 = vmatprep.subr.bf16.mxu1 %v6115_v7  ;;  %v2403_v7 = vld [vmem:[%s7276_s2 + $0x1e0] sm:$0xff]  ;;  %v2348_v62 = vld [vmem:[%s7276_s2 + $0x28] sm:$0xff] }
 0x1f2   : > { %2212 = vmatpush2.bf16.msra.mxu0 %v6112_v13  ;;  %2253 = vmatpush2.bf16.msra.mxu1 %v6133_v54  ;;  %v2395_v54 = vld [vmem:[%s7276_s2 + $0x1a0] sm:$0xff] }
 0x1f3   : > { %2213 = vmatprep.subr.bf16.mxu0 %v7567_v5  ;;  %2254 = vmatprep.subr.bf16.mxu1 %v6139_v53  ;;  %v2399_v53 = vld [vmem:[%s7276_s2 + $0x1c0] sm:$0xff]  ;;  %v6353_v27 = vcombine.low %v2391_v26, %v2395_v54  ;;  %v6496_v5 = vcombine.low %v2343_v45, %v2347_v51  ;;  %v2440_v45 = vld [vmem:[%s7276_s2 + $0x308] sm:$0xff]  ;;  %v6587_v51 = vcombine.high %v2439_v19, %v2443_v31 }
 0x1f4   : > { %v6323_v13 = vcombine.low %v2399_v53, %v2403_v7 }
 0x1f5   : > { %7574 = vst [vmem:[#allocation14_spill] sm:$0xff] %v6587_v51 }
 0x1f6   : > { %2214 = vmatpush2.bf16.msra.mxu0 %v6136_v37  ;;  %2255 = vmatpush2.bf16.msra.mxu1 %v6151_v16  ;;  %v6325_v37 = vcombine.high %v2399_v53, %v2403_v7  ;;  %v6498_v53 = vcombine.low %v2344_v52, %v2348_v62  ;;  %v6500_v7 = vcombine.high %v2344_v52, %v2348_v62  ;;  %v2444_v52 = vld [vmem:[%s7276_s2 + $0x328] sm:$0xff] }
 0x1f7   : > { %2215 = vmatprep.subr.bf16.mxu0 %v6142_v43  ;;  %2256 = vmatprep.subr.bf16.mxu1 %v6157_v25  ;;  %v2400_v43 = vld [vmem:[%s7276_s2 + $0x1c8] sm:$0xff]  ;;  %v6340_v25 = vcombine.high %v2391_v26, %v2395_v54  ;;  %v6592_v62 = vcombine.low %v2439_v19, %v2443_v31  ;;  %v6633_v31 = vcombine.low %v2432_v8, %v2436_v29 }
 0x1f8   : > { %v2464_v26 = vld [vmem:[%s7276_s2 + $0x3c8] sm:$0xff]  ;;  %v6653_v29 = vcombine.low %v2423_v33, %v2427_v49 }
 0x1f9   : > { %7575 = vst [vmem:[#allocation15_spill] sm:$0xff] %v6592_v62  ;;  %v2428_v19 = vld [vmem:[%s7276_s2 + $0x2a8] sm:$0xff]  ;;  %7581 = vst [vmem:[#allocation20_spill] sm:$0xff] %v6633_v31 }
 0x1fa   : > { %2216 = vmatpush2.bf16.msra.mxu0 %v6154_v15  ;;  %2257 = vmatpush2.bf16.msra.mxu1 %v6161_v59  ;;  %v2404_v59 = vld [vmem:[%s7276_s2 + $0x1e8] sm:$0xff]  ;;  %7584 = vst [vmem:[#allocation25_spill] sm:$0xff] %v6653_v29 }
 0x1fb   : > { %v6336_v16 = vcombine.low %v2400_v43, %v2404_v59  ;;  %v6338_v15 = vcombine.high %v2400_v43, %v2404_v59  ;;  %3111 = vmatprep.subr.bf16.mxu0 %v6325_v37  ;;  %v2463_v43 = vld [vmem:[%s7276_s2 + $0x3c0] sm:$0xff]  ;;  %v2420_v8 = vld [vmem:[%s7276_s2 + $0x268] sm:$0xff] }
 0x1fc   : > { %v2467_v59 = vld [vmem:[%s7276_s2 + $0x3e0] sm:$0xff] }
 0x1fd   : > { %2218 = vmatmul.mubr.bf16.vlgmr.msra.gmra.mxu0 %v6246_v0  ;;  %2259 = vmatmul.mubr.bf16.vlgmr.msra.gmra.mxu1 %v6246_v0  ;;  %v2392_v0 = vld [vmem:[%s7276_s2 + $0x188] sm:$0xff]  ;;  %v6515_v54 = vcombine.high %v2463_v43, %v2467_v59 }
 0x1fe   : > { %v6349_v44 = vcombine.high %v2392_v0, %v2396_v14  ;;  %3152 = vmatprep.subr.bf16.mxu1 %v6338_v15  ;;  %3112 = vmatpush1.bf16.msra.mxu0 %v6323_v13  ;;  %v6357_v60 = vcombine.low %v2392_v0, %v2396_v14  ;;  %v2468_v0 = vld [vmem:[%s7276_s2 + $0x3e8] sm:$0xff]  ;;  %v6520_v14 = vcombine.low %v2463_v43, %v2467_v59 }
 0x1ff   : > { %3153 = vmatpush1.bf16.msra.mxu1 %v6336_v16  ;;  %3113 = vmatprep.subr.bf16.mxu0 %v6340_v25  ;;  %v6522_v24 = vcombine.low %v2464_v26, %v2468_v0  ;;  %v6524_v3 = vcombine.high %v2464_v26, %v2468_v0  ;;  %v6594_v43 = vcombine.low %v2440_v45, %v2444_v52  ;;  %v2431_v26 = vld [vmem:[%s7276_s2 + $0x2c0] sm:$0xff] }
 0x200   : > { %3154 = vmatprep.subr.bf16.mxu1 %v6349_v44  ;;  %v6596_v59 = vcombine.high %v2440_v45, %v2444_v52  ;;  %v2435_v0 = vld [vmem:[%s7276_s2 + $0x2e0] sm:$0xff]  ;;  %v6635_v45 = vcombine.high %v2423_v33, %v2427_v49  ;;  %v6638_v52 = vcombine.high %v2424_v2, %v2428_v19  ;;  %v2408_v49 = vld [vmem:[%s7276_s2 + $0x208] sm:$0xff] }
 0x201   : > { %7576 = vst [vmem:[#allocation17_spill] sm:$0xff] %v6594_v43  ;;  %v6608_v6 = vcombine.high %v2431_v26, %v2435_v0  ;;  %v6621_v55 = vcombine.low %v2431_v26, %v2435_v0  ;;  %v2415_v26 = vld [vmem:[%s7276_s2 + $0x240] sm:$0xff] }
 0x202   : > { %3114 = vmatpush1.bf16.msra.mxu0 %v6353_v27  ;;  %7577 = vst [vmem:[#allocation16_spill] sm:$0xff] %v6596_v59  ;;  %7582 = vst [vmem:[#allocation22_spill] sm:$0xff] %v6635_v45  ;;  %v2419_v0 = vld [vmem:[%s7276_s2 + $0x260] sm:$0xff] }
 0x203   : > { %3155 = vmatpush1.bf16.msra.mxu1 %v6357_v60  ;;  %3115 = vmatprep.subr.bf16.mxu0 %v6371_v38  ;;  %7578 = vst [vmem:[#allocation18_spill] sm:$0xff] %v6608_v6  ;;  %7579 = vst [vmem:[#allocation19_spill] sm:$0xff] %v6621_v55  ;;  %v2411_v33 = vld [vmem:[%s7276_s2 + $0x220] sm:$0xff] }
 0x204   : > { %3156 = vmatprep.subr.bf16.mxu1 %v6380_v28  ;;  %7583 = vst [vmem:[#allocation23_spill] sm:$0xff] %v6638_v52 }
 0x206   : > { %3116 = vmatpush1.bf16.msra.mxu0 %v6376_v21 }
 0x207   : > { %3157 = vmatpush1.bf16.msra.mxu1 %v6378_v23  ;;  %3117 = vmatprep.subr.bf16.mxu0 %v6395_v34 }
 0x208   : > { %3158 = vmatprep.subr.bf16.mxu1 %v6404_v42 }
 0x20a   : > { %3118 = vmatpush1.bf16.msra.mxu0 %v6400_v40 }
 0x20b   : > { %3159 = vmatpush1.bf16.msra.mxu1 %v6402_v41  ;;  %3119 = vmatprep.subr.bf16.mxu0 %v6419_v50 }
 0x20c   : > { %3160 = vmatprep.subr.bf16.mxu1 %v6428_v58 }
 0x20e   : > { %3120 = vmatpush1.bf16.msra.mxu0 %v6424_v56 }
 0x20f   : > { %3161 = vmatpush1.bf16.msra.mxu1 %v6426_v57  ;;  %3121 = vmatprep.subr.bf16.mxu0 %v6443_v4 }
 0x210   : > { %3162 = vmatprep.subr.bf16.mxu1 %v6452_v12 }
 0x212   : > { %3122 = vmatpush1.bf16.msra.mxu0 %v6448_v10 }
 0x213   : > { %3163 = vmatpush1.bf16.msra.mxu1 %v6450_v11  ;;  %3123 = vmatprep.subr.bf16.mxu0 %v6467_v22 }
 0x214   : > { %3164 = vmatprep.subr.bf16.mxu1 %v6476_v36 }
 0x216   : > { %3124 = vmatpush1.bf16.msra.mxu0 %v6472_v32 }
 0x217   : > { %3165 = vmatpush1.bf16.msra.mxu1 %v6474_v35  ;;  %3125 = vmatprep.subr.bf16.mxu0 %v6491_v61 }
 0x218   : > { %3166 = vmatprep.subr.bf16.mxu1 %v6500_v7 }
 0x21a   : > { %3126 = vmatpush1.bf16.msra.mxu0 %v6496_v5 }
 0x21b   : > { %3167 = vmatpush1.bf16.msra.mxu1 %v6498_v53  ;;  %3127 = vmatprep.subr.bf16.mxu0 %v6515_v54 }
 0x21c   : > { %3168 = vmatprep.subr.bf16.mxu1 %v6524_v3 }
 0x21e   : > { %3128 = vmatpush2.bf16.msra.mxu0 %v6520_v14 }
 0x21f   : > { %3169 = vmatpush2.bf16.msra.mxu1 %v6522_v24  ;;  %3129 = vmatprep.subr.bf16.mxu0 %v6539_v30 }
 0x220   : > { %3170 = vmatprep.subr.bf16.mxu1 %v6548_v48 }
 0x222   : > { %3130 = vmatpush2.bf16.msra.mxu0 %v6544_v39 }
 0x223   : > { %3171 = vmatpush2.bf16.msra.mxu1 %v6546_v47  ;;  %3131 = vmatprep.subr.bf16.mxu0 %v6563_v1 }
 0x224   : > { %3172 = vmatprep.subr.bf16.mxu1 %v6572_v18 }
 0x226   : > { %3132 = vmatpush2.bf16.msra.mxu0 %v6568_v9  ;;  %v4771_v9 = vld [vmem:[%s5383_s17 + $0x18] sm:$0xff] }
 0x227   : > { %3173 = vmatpush2.bf16.msra.mxu1 %v6570_v17  ;;  %3133 = vmatprep.subr.bf16.mxu0 %v6587_v51  ;;  %v2272_v1 = vunpack.c.l.bf16 %v4771_v9 }
 0x228   : > { %3174 = vmatprep.subr.bf16.mxu1 %v6596_v59  ;;  %v2407_v59 = vld [vmem:[%s7276_s2 + $0x200] sm:$0xff] }
 0x22a   : > { %3134 = vmatpush2.bf16.msra.mxu0 %v6592_v62 }
 0x22b   : > { %3175 = vmatpush2.bf16.msra.mxu1 %v6594_v43  ;;  %3135 = vmatprep.subr.bf16.mxu0 %v6608_v6  ;;  %v2416_v6 = vld [vmem:[%s7276_s2 + $0x248] sm:$0xff]  ;;  %v6659_v43 = vcombine.high %v2415_v26, %v2419_v0 }
 0x22c   : > { %3176 = vmatprep.subr.bf16.mxu1 %v6623_v63  ;;  %v6657_v63 = vcombine.low %v2424_v2, %v2428_v19  ;;  %v6662_v62 = vcombine.high %v2416_v6, %v2420_v8  ;;  %v2412_v2 = vld [vmem:[%s7276_s2 + $0x228] sm:$0xff]  ;;  %v6677_v19 = vcombine.low %v2415_v26, %v2419_v0  ;;  %v2405_v0 = vld [vmem:[%s7276_s2 + $0x1f0] sm:$0xff] }
 0x22d   : > { %7586 = vst [vmem:[#allocation26_spill] sm:$0xff] %v6659_v43  ;;  %v6693_v26 = vcombine.low %v2408_v49, %v2412_v2 }
 0x22e   : > { %3136 = vmatpush2.bf16.msra.mxu0 %v6621_v55  ;;  %7585 = vst [vmem:[#allocation24_spill] sm:$0xff] %v6657_v63  ;;  %7587 = vst [vmem:[#allocation28_spill] sm:$0xff] %v6662_v62  ;;  %v6689_v55 = vcombine.low %v2407_v59, %v2411_v33 }
 0x22f   : > { %3177 = vmatpush2.bf16.msra.mxu1 %v6633_v31  ;;  %3137 = vmatprep.subr.bf16.mxu0 %v6635_v45  ;;  %7588 = vst [vmem:[#allocation27_spill] sm:$0xff] %v6677_v19  ;;  %v6683_v45 = vcombine.high %v2407_v59, %v2411_v33  ;;  %v6686_v31 = vcombine.high %v2408_v49, %v2412_v2  ;;  %7593 = vst [vmem:[#allocation34_spill] sm:$0xff] %v6693_v26  ;;  %v2402_v59 = vld [vmem:[%s7276_s2 + $0x1d8] sm:$0xff] }
 0x230   : > { %3178 = vmatprep.subr.bf16.mxu1 %v6638_v52  ;;  %v6681_v52 = vcombine.low %v2416_v6, %v2420_v8  ;;  %7592 = vst [vmem:[#allocation31_spill] sm:$0xff] %v6689_v55  ;;  %v2401_v6 = vld [vmem:[%s7276_s2 + $0x1d0] sm:$0xff]  ;;  %v2406_v49 = vld [vmem:[%s7276_s2 + $0x1f8] sm:$0xff] }
 0x231   : > { %7590 = vst [vmem:[#allocation29_spill] sm:$0xff] %v6683_v45  ;;  %7591 = vst [vmem:[#allocation32_spill] sm:$0xff] %v6686_v31  ;;  %v4770_v8 = vld [vmem:[%s5383_s17 + $0x10] sm:$0xff]  ;;  %v6708_v33 = vcombine.high %v2401_v6, %v2405_v0  ;;  %v6713_v2 = vcombine.low %v2401_v6, %v2405_v0 }
 0x232   : > { %3138 = vmatpush2.bf16.msra.mxu0 %v6653_v29  ;;  %7589 = vst [vmem:[#allocation30_spill] sm:$0xff] %v6681_v52 }
 0x233   : > { %3179 = vmatpush2.bf16.msra.mxu1 %v6657_v63  ;;  %3139 = vmatprep.subr.bf16.mxu0 %v6659_v43  ;;  %7594 = vst [vmem:[#allocation33_spill] sm:$0xff] %v6708_v33 }
 0x234   : > { %3180 = vmatprep.subr.bf16.mxu1 %v6662_v62 }
 0x236   : > { %3140 = vmatpush2.bf16.msra.mxu0 %v6677_v19 }
 0x237   : > { %3181 = vmatpush2.bf16.msra.mxu1 %v6681_v52  ;;  %3141 = vmatprep.subr.bf16.mxu0 %v6683_v45  ;;  %v2270_v45 = vunpack.c.l.bf16 %v4770_v8  ;;  %v2271_v52 = vunpack.c.h.bf16 %v4770_v8 }
 0x238   : > { %3182 = vmatprep.subr.bf16.mxu1 %v6686_v31  ;;  %v6717_v31 = vcombine.high %v2402_v59, %v2406_v49 }
 0x23a   : > { %3142 = vmatpush2.bf16.msra.mxu0 %v6689_v55  ;;  %v6715_v55 = vcombine.low %v2402_v59, %v2406_v49  ;;  %7595 = vst [vmem:[#allocation36_spill] sm:$0xff] %v6717_v31 }
 0x23b   : > { %3183 = vmatpush2.bf16.msra.mxu1 %v6693_v26  ;;  %3193 = vmatprep.subr.bf16.mxu0 %v6708_v33  ;;  %v2273_v33 = vunpack.c.h.bf16 %v4771_v9 }
 0x23c   : > { %3234 = vmatprep.subr.bf16.mxu1 %v6717_v31 }
 0x27d   : > { %v2137_v26 = vpop.f32.mrf.mxu0  ;;  %v2178_v19 = vpop.f32.mrf.mxu1 }
 0x27e   : > { %v2274_v62 = vadd.f32 %v2270_v45, %v2137_v26  ;;  %v2276_v47 = vadd.f32 %v2272_v1, %v2178_v19 }
 0x27f   : > { %v2139_v43 = vpop.f32.mrf.mxu0  ;;  %v2180_v63 = vpop.f32.mrf.mxu1 }
 0x280   : > { %v4774_v29 = vmul.f32 -1.442695, %v2274_v62  ;;  %v2275_v51 = vadd.f32 %v2271_v52, %v2139_v43  ;;  %v2277_v18 = vadd.f32 %v2273_v33, %v2180_v63 }
 0x281   : > { %v2141_v6 = vpop.f32.mrf.mxu0  ;;  %v2182_v0 = vpop.f32.mrf.mxu1 }
 0x282   : > { %5137 = vpow2.f32 %v4774_v29  ;;  %v4775_v17 = vmul.f32 -1.442695, %v2275_v51  ;;  %v4776_v31 = vmul.f32 -1.442695, %v2277_v18 }
 0x283   : > { %v2142_v59 = vpop.f32.mrf.mxu0  ;;  %v2183_v49 = vpop.f32.mrf.mxu1 }
 0x284   : > { %5139 = vpow2.f32 %v4775_v17 }
 0x285   : > { %5141 = vpow2.f32 %v4776_v31 }
 0x28f   : > { %v5138_v8 = vpop.eup %5137 }
 0x290   : > { %v2292_v39 = vadd.f32 1.0, %v5138_v8 }
 0x291   : > { %v5140_v45 = vpop.eup %5139 }
 0x292   : > { %5143 = vrcp.f32 %v2292_v39  ;;  %v2298_v62 = vadd.f32 1.0, %v5140_v45  ;;  %v5142_v51 = vpop.eup %5141 }
 0x293   : > { %5145 = vtanh.f32 %v2276_v47  ;;  %v2305_v17 = vadd.f32 1.0, %v5142_v51  ;;  %v4772_v47 = vld [vmem:[%s5385_s22 + $0x20] sm:$0xff] }
 0x294   : > { %5147 = vrcp.f32 %v2298_v62  ;;  %v2281_v31 = vunpack.c.l.bf16 %v4772_v47  ;;  %v2282_v19 = vunpack.c.h.bf16 %v4772_v47 }
 0x295   : > { %5149 = vrcp.f32 %v2305_v17 }
 0x29f   : > { %v5144_v43 = vpop.eup %5143 }
 0x2a0   : > { %v5146_v52 = vpop.eup %5145 }
 0x2a1   : > { %v5148_v29 = vpop.eup %5147  ;;  %v2309_v26 = vmul.f32 %v5146_v52, %v5144_v43 }
 0x2a2   : > { %v2308_v9 = vmul.f32 %v5148_v29, %v6236_v20  ;;  %v5150_v1 = vpop.eup %5149  ;;  %v4773_v29 = vld [vmem:[%s5385_s22 + $0x28] sm:$0xff] }
 0x2a3   : > { %v2284_v17 = vunpack.c.h.bf16 %v4773_v29 }
 0x2a4   : > { %v6723_v18 = vadd.f32 %v2309_v26, %v2308_v9  ;;  %v2283_v9 = vunpack.c.l.bf16 %v4773_v29  ;;  %v2398_v29 = vld [vmem:[%s7276_s2 + $0x1b8] sm:$0xff] }
 0x2a6   : > { %7596 = vst [vmem:[#allocation35_spill] sm:$0xff] %v6723_v18  ;;  %5151 = vtanh.f32 %v6723_v18 }
 0x2b3   : > { %v5152_v39 = vpop.eup %5151 }
 0x2b4   : > { %v2312_v63 = vmul.f32 %v5152_v39, %v5150_v1 }
 0x2b6   : > { %4780 = vst [vmem:[%s5376_s11 + $0x8] sm:$0xff] %v2312_v63 }
 0x2bd   : > { %v2219_v33 = vpop.f32.mrf.mxu0  ;;  %v2260_v6 = vpop.f32.mrf.mxu1 }
 0x2be   : > { %v2285_v0 = vadd.f32 %v2281_v31, %v2219_v33  ;;  %v2287_v47 = vadd.f32 %v2283_v9, %v2260_v6  ;;  %v2385_v9 = vld [vmem:[%s7276_s2 + $0x150] sm:$0xff] }
 0x2bf   : > { %v2221_v59 = vpop.f32.mrf.mxu0  ;;  %v2262_v49 = vpop.f32.mrf.mxu1 }
 0x2c0   : > { %v4777_v8 = vmul.f32 -1.442695, %v2285_v0  ;;  %v2286_v20 = vadd.f32 %v2282_v19, %v2221_v59  ;;  %v2288_v26 = vadd.f32 %v2284_v17, %v2262_v49 }
 0x2c1   : > { %v2223_v45 = vpop.f32.mrf.mxu0  ;;  %v2264_v62 = vpop.f32.mrf.mxu1 }
 0x2c2   : > { %5153 = vpow2.f32 %v4777_v8  ;;  %v4778_v51 = vmul.f32 -1.442695, %v2286_v20  ;;  %v4779_v1 = vmul.f32 -1.442695, %v2288_v26  ;;  %v6746_v26 = vpack.c.bf16 %v2312_v63, %v2312_v63  ;;  %v2390_v63 = vld [vmem:[%s7276_s2 + $0x178] sm:$0xff] }
 0x2c3   : > { %v2224_v43 = vpop.f32.mrf.mxu0  ;;  %v2265_v52 = vpop.f32.mrf.mxu1 }
 0x2c4   : > { %5155 = vpow2.f32 %v4778_v51  ;;  %v2393_v43 = vld [vmem:[%s7276_s2 + $0x190] sm:$0xff] }
 0x2c5   : > { %5157 = vpow2.f32 %v4779_v1  ;;  %v2397_v52 = vld [vmem:[%s7276_s2 + $0x1b0] sm:$0xff] }
 0x2c6   : > { %v6751_v1 = vcombine.high %v2393_v43, %v2397_v52 }
 0x2cf   : > { %v5154_v39 = vpop.eup %5153 }
 0x2d0   : > { %v2316_v18 = vadd.f32 1.0, %v5154_v39 }
 0x2d1   : > { %v5156_v31 = vpop.eup %5155 }
 0x2d2   : > { %5159 = vrcp.f32 %v2316_v18  ;;  %v2322_v33 = vadd.f32 1.0, %v5156_v31  ;;  %v5158_v19 = vpop.eup %5157  ;;  %v2386_v31 = vld [vmem:[%s7276_s2 + $0x158] sm:$0xff] }
 0x2d3   : > { %5161 = vtanh.f32 %v2287_v47  ;;  %v2329_v20 = vadd.f32 1.0, %v5158_v19  ;;  %v2389_v47 = vld [vmem:[%s7276_s2 + $0x170] sm:$0xff] }
 0x2d4   : > { %5163 = vrcp.f32 %v2322_v33  ;;  %v6768_v33 = vcombine.low %v2393_v43, %v2397_v52  ;;  %v2369_v52 = vld [vmem:[%s7276_s2 + $0xd0] sm:$0xff] }
 0x2d5   : > { %5165 = vrcp.f32 %v2329_v20  ;;  %v2381_v20 = vld [vmem:[%s7276_s2 + $0x130] sm:$0xff] }
 0x2df   : > { %v5160_v0 = vpop.eup %5159 }
 0x2e0   : > { %v5162_v59 = vpop.eup %5161 }
 0x2e1   : > { %v5164_v8 = vpop.eup %5163  ;;  %v2333_v45 = vmul.f32 %v5162_v59, %v5160_v0  ;;  %v6772_v0 = vcombine.high %v2385_v9, %v2389_v47  ;;  %v6774_v59 = vcombine.high %v2386_v31, %v2390_v63 }
 0x2e2   : > { %v2332_v49 = vmul.f32 %v5164_v8, %v6242_v46  ;;  %v5166_v6 = vpop.eup %5165  ;;  %v2394_v46 = vld [vmem:[%s7276_s2 + $0x198] sm:$0xff]  ;;  %v2377_v8 = vld [vmem:[%s7276_s2 + $0x110] sm:$0xff] }
 0x2e3   : > { %v6753_v39 = vcombine.high %v2394_v46, %v2398_v29  ;;  %v6770_v19 = vcombine.low %v2394_v46, %v2398_v29  ;;  %7597 = vst [vmem:[#allocation38_spill] sm:$0xff] %v6774_v59  ;;  %v2373_v46 = vld [vmem:[%s7276_s2 + $0xf0] sm:$0xff]  ;;  %v2370_v29 = vld [vmem:[%s7276_s2 + $0xd8] sm:$0xff] }
 0x2e4   : > { %v6730_v62 = vadd.f32 %v2333_v45, %v2332_v49  ;;  %v2378_v45 = vld [vmem:[%s7276_s2 + $0x118] sm:$0xff] }
 0x2e5   : > { %v2382_v49 = vld [vmem:[%s7276_s2 + $0x138] sm:$0xff] }
 0x2e6   : > { %5167 = vtanh.f32 %v6730_v62  ;;  %v6800_v43 = vcombine.high %v2378_v45, %v2382_v49 }
 0x2e8   : > { %7601 = vst [vmem:[#allocation42_spill] sm:$0xff] %v6800_v43 }
 0x2f3   : > { %v5168_v51 = vpop.eup %5167 }
 0x2f4   : > { %v2336_v18 = vmul.f32 %v5168_v51, %v5166_v6  ;;  %v6792_v6 = vcombine.low %v2385_v9, %v2389_v47  ;;  %v6794_v51 = vcombine.low %v2386_v31, %v2390_v63  ;;  %v6816_v9 = vcombine.low %v2377_v8, %v2381_v20 }
 0x2f5   : > { %v6818_v47 = vcombine.low %v2378_v45, %v2382_v49  ;;  %v6822_v31 = vcombine.high %v2369_v52, %v2373_v46  ;;  %v6840_v45 = vcombine.low %v2369_v52, %v2373_v46  ;;  %v2354_v52 = vld [vmem:[%s7276_s2 + $0x58] sm:$0xff] }
 0x2f6   : > { %4781 = vst [vmem:[%s5381_s15 + $0x10] sm:$0xff] %v2336_v18  ;;  %v2342_v17 = vpack.c.bf16 %v2336_v18, %v2336_v18  ;;  %7598 = vst [vmem:[#allocation37_spill] sm:$0xff] %v6792_v6  ;;  %v6798_v18 = vcombine.high %v2377_v8, %v2381_v20  ;;  %v2362_v8 = vld [vmem:[%s7276_s2 + $0x98] sm:$0xff] }
 0x2f7   : > { %7599 = vst [vmem:[#allocation40_spill] sm:$0xff] %v6794_v51  ;;  %7602 = vst [vmem:[#allocation41_spill] sm:$0xff] %v6816_v9  ;;  %v2366_v20 = vld [vmem:[%s7276_s2 + $0xb8] sm:$0xff] }
 0x2f8   : > { %3143 = vmatprep.mubr.bf16.mxu0 %v2342_v17  ;;  %3184 = vmatprep.mubr.bf16.mxu1 %v2342_v17  ;;  %7600 = vst [vmem:[#allocation39_spill] sm:$0xff] %v6798_v18  ;;  %7603 = vst [vmem:[#allocation44_spill] sm:$0xff] %v6818_v47  ;;  %v2358_v46 = vld [vmem:[%s7276_s2 + $0x78] sm:$0xff] }
 0x2f9   : > { %3144 = vmatmul.mubr.bf16.vlgmr.msra.gmra.mxu0 %v6746_v26  ;;  %3185 = vmatmul.mubr.bf16.vlgmr.msra.gmra.mxu1 %v6746_v26  ;;  %7604 = vst [vmem:[#allocation43_spill] sm:$0xff] %v6822_v31  ;;  %7606 = vst [vmem:[#allocation45_spill] sm:$0xff] %v6840_v45 }
 0x2fa   : > { %3194 = vmatpush1.bf16.msra.mxu0 %v6713_v2  ;;  %3235 = vmatpush1.bf16.msra.mxu1 %v6715_v55 }
 0x2fb   : > { %3225 = vmatprep.mubr.bf16.mxu0 %v2342_v17  ;;  %3266 = vmatprep.mubr.bf16.mxu1 %v2342_v17  ;;  %v2374_v17 = vld [vmem:[%s7276_s2 + $0xf8] sm:$0xff] }
 0x2fc   : > { %3195 = vmatprep.subr.bf16.mxu0 %v6751_v1  ;;  %3236 = vmatprep.subr.bf16.mxu1 %v6753_v39  ;;  %v6824_v63 = vcombine.high %v2370_v29, %v2374_v17  ;;  %v6842_v49 = vcombine.low %v2370_v29, %v2374_v17  ;;  %v6866_v17 = vcombine.low %v2362_v8, %v2366_v20 }
 0x2fe   : > { %3196 = vmatpush1.bf16.msra.mxu0 %v6768_v33  ;;  %3237 = vmatpush1.bf16.msra.mxu1 %v6770_v19  ;;  %7605 = vst [vmem:[#allocation46_spill] sm:$0xff] %v6824_v63  ;;  %7607 = vst [vmem:[#allocation48_spill] sm:$0xff] %v6842_v49 }
 0x2ff   : > { %3197 = vmatprep.subr.bf16.mxu0 %v6772_v0  ;;  %3238 = vmatprep.subr.bf16.mxu1 %v6774_v59  ;;  %v2361_v59 = vld [vmem:[%s7276_s2 + $0x90] sm:$0xff]  ;;  %7611 = vst [vmem:[#allocation52_spill] sm:$0xff] %v6866_v17 }
 0x302   : > { %3198 = vmatpush1.bf16.msra.mxu0 %v6792_v6  ;;  %3239 = vmatpush1.bf16.msra.mxu1 %v6794_v51  ;;  %v2365_v51 = vld [vmem:[%s7276_s2 + $0xb0] sm:$0xff] }
 0x303   : > { %3199 = vmatprep.subr.bf16.mxu0 %v6798_v18  ;;  %3240 = vmatprep.subr.bf16.mxu1 %v6800_v43  ;;  %v6846_v43 = vcombine.high %v2361_v59, %v2365_v51  ;;  %v6848_v18 = vcombine.high %v2362_v8, %v2366_v20  ;;  %v2353_v6 = vld [vmem:[%s7276_s2 + $0x50] sm:$0xff]  ;;  %v6864_v29 = vcombine.low %v2361_v59, %v2365_v51  ;;  %v2346_v59 = vld [vmem:[%s7276_s2 + $0x18] sm:$0xff] }
 0x304   : > { %v2350_v51 = vld [vmem:[%s7276_s2 + $0x38] sm:$0xff]  ;;  %v6890_v20 = vcombine.low %v2354_v52, %v2358_v46 }
 0x305   : > { %7608 = vst [vmem:[#allocation47_spill] sm:$0xff] %v6846_v43  ;;  %7609 = vst [vmem:[#allocation50_spill] sm:$0xff] %v6848_v18 }
 0x306   : > { %3200 = vmatpush1.bf16.msra.mxu0 %v6816_v9  ;;  %3241 = vmatpush1.bf16.msra.mxu1 %v6818_v47  ;;  %v2357_v47 = vld [vmem:[%s7276_s2 + $0x70] sm:$0xff]  ;;  %7610 = vst [vmem:[#allocation49_spill] sm:$0xff] %v6864_v29  ;;  %7615 = vst [vmem:[#allocation56_spill] sm:$0xff] %v6890_v20 }
 0x307   : > { %3201 = vmatprep.subr.bf16.mxu0 %v6822_v31  ;;  %3242 = vmatprep.subr.bf16.mxu1 %v6824_v63  ;;  %v6870_v63 = vcombine.high %v2353_v6, %v2357_v47  ;;  %v6872_v31 = vcombine.high %v2354_v52, %v2358_v46  ;;  %v2345_v9 = vld [vmem:[%s7276_s2 + $0x10] sm:$0xff]  ;;  %v6888_v8 = vcombine.low %v2353_v6, %v2357_v47  ;;  %v2466_v6 = vld [vmem:[%s7276_s2 + $0x3d8] sm:$0xff] }
 0x308   : > { %v2470_v47 = vld [vmem:[%s7276_s2 + $0x3f8] sm:$0xff]  ;;  %v6914_v46 = vcombine.low %v2346_v59, %v2350_v51 }
 0x309   : > { %7612 = vst [vmem:[#allocation51_spill] sm:$0xff] %v6870_v63  ;;  %7613 = vst [vmem:[#allocation54_spill] sm:$0xff] %v6872_v31 }
 0x30a   : > { %3202 = vmatpush1.bf16.msra.mxu0 %v6840_v45  ;;  %3243 = vmatpush1.bf16.msra.mxu1 %v6842_v49  ;;  %v2349_v49 = vld [vmem:[%s7276_s2 + $0x30] sm:$0xff]  ;;  %7614 = vst [vmem:[#allocation53_spill] sm:$0xff] %v6888_v8  ;;  %7619 = vst [vmem:[#allocation60_spill] sm:$0xff] %v6914_v46 }
 0x30b   : > { %3203 = vmatprep.subr.bf16.mxu0 %v6846_v43  ;;  %3244 = vmatprep.subr.bf16.mxu1 %v6848_v18  ;;  %v6894_v18 = vcombine.high %v2345_v9, %v2349_v49  ;;  %v6896_v43 = vcombine.high %v2346_v59, %v2350_v51  ;;  %v2465_v45 = vld [vmem:[%s7276_s2 + $0x3d0] sm:$0xff]  ;;  %v6912_v52 = vcombine.low %v2345_v9, %v2349_v49  ;;  %v2458_v9 = vld [vmem:[%s7276_s2 + $0x398] sm:$0xff] }
 0x30c   : > { %v2462_v49 = vld [vmem:[%s7276_s2 + $0x3b8] sm:$0xff]  ;;  %v6938_v51 = vcombine.low %v2466_v6, %v2470_v47 }
 0x30d   : > { %7616 = vst [vmem:[#allocation55_spill] sm:$0xff] %v6894_v18  ;;  %7617 = vst [vmem:[#allocation58_spill] sm:$0xff] %v6896_v43 }
 0x30e   : > { %3204 = vmatpush1.bf16.msra.mxu0 %v6864_v29  ;;  %3245 = vmatpush1.bf16.msra.mxu1 %v6866_v17  ;;  %v2469_v17 = vld [vmem:[%s7276_s2 + $0x3f0] sm:$0xff]  ;;  %7618 = vst [vmem:[#allocation57_spill] sm:$0xff] %v6912_v52  ;;  %7623 = vst [vmem:[#allocation64_spill] sm:$0xff] %v6938_v51 }
 0x30f   : > { %3205 = vmatprep.subr.bf16.mxu0 %v6870_v63  ;;  %3246 = vmatprep.subr.bf16.mxu1 %v6872_v31  ;;  %v6918_v31 = vcombine.high %v2465_v45, %v2469_v17  ;;  %v6920_v63 = vcombine.high %v2466_v6, %v2470_v47  ;;  %v2457_v29 = vld [vmem:[%s7276_s2 + $0x390] sm:$0xff]  ;;  %v6936_v59 = vcombine.low %v2465_v45, %v2469_v17  ;;  %v2450_v45 = vld [vmem:[%s7276_s2 + $0x358] sm:$0xff] }
 0x310   : > { %v2454_v17 = vld [vmem:[%s7276_s2 + $0x378] sm:$0xff]  ;;  %v6962_v47 = vcombine.low %v2458_v9, %v2462_v49 }
 0x311   : > { %7620 = vst [vmem:[#allocation59_spill] sm:$0xff] %v6918_v31  ;;  %7621 = vst [vmem:[#allocation62_spill] sm:$0xff] %v6920_v63 }
 0x312   : > { %3206 = vmatpush1.bf16.msra.mxu0 %v6888_v8  ;;  %3247 = vmatpush1.bf16.msra.mxu1 %v6890_v20  ;;  %v2461_v20 = vld [vmem:[%s7276_s2 + $0x3b0] sm:$0xff]  ;;  %7622 = vst [vmem:[#allocation61_spill] sm:$0xff] %v6936_v59  ;;  %7627 = vst [vmem:[#allocation68_spill] sm:$0xff] %v6962_v47 }
 0x313   : > { %3207 = vmatprep.subr.bf16.mxu0 %v6894_v18  ;;  %3248 = vmatprep.subr.bf16.mxu1 %v6896_v43  ;;  %v6942_v43 = vcombine.high %v2457_v29, %v2461_v20  ;;  %v6944_v18 = vcombine.high %v2458_v9, %v2462_v49  ;;  %v2449_v8 = vld [vmem:[%s7276_s2 + $0x350] sm:$0xff]  ;;  %v6960_v6 = vcombine.low %v2457_v29, %v2461_v20  ;;  %v2442_v29 = vld [vmem:[%s7276_s2 + $0x318] sm:$0xff] }
 0x314   : > { %v2446_v20 = vld [vmem:[%s7276_s2 + $0x338] sm:$0xff]  ;;  %v6986_v49 = vcombine.low %v2450_v45, %v2454_v17 }
 0x315   : > { %7624 = vst [vmem:[#allocation63_spill] sm:$0xff] %v6942_v43  ;;  %7625 = vst [vmem:[#allocation66_spill] sm:$0xff] %v6944_v18 }
 0x316   : > { %3208 = vmatpush1.bf16.msra.mxu0 %v6912_v52  ;;  %3249 = vmatpush1.bf16.msra.mxu1 %v6914_v46  ;;  %v2453_v46 = vld [vmem:[%s7276_s2 + $0x370] sm:$0xff]  ;;  %7626 = vst [vmem:[#allocation65_spill] sm:$0xff] %v6960_v6  ;;  %7631 = vst [vmem:[#allocation72_spill] sm:$0xff] %v6986_v49 }
 0x317   : > { %3209 = vmatprep.subr.bf16.mxu0 %v6918_v31  ;;  %3250 = vmatprep.subr.bf16.mxu1 %v6920_v63  ;;  %v6966_v63 = vcombine.high %v2449_v8, %v2453_v46  ;;  %v6968_v31 = vcombine.high %v2450_v45, %v2454_v17  ;;  %v2441_v52 = vld [vmem:[%s7276_s2 + $0x310] sm:$0xff]  ;;  %v6984_v9 = vcombine.low %v2449_v8, %v2453_v46  ;;  %v2434_v8 = vld [vmem:[%s7276_s2 + $0x2d8] sm:$0xff] }
 0x318   : > { %v2438_v46 = vld [vmem:[%s7276_s2 + $0x2f8] sm:$0xff]  ;;  %v7010_v17 = vcombine.low %v2442_v29, %v2446_v20 }
 0x319   : > { %7628 = vst [vmem:[#allocation67_spill] sm:$0xff] %v6966_v63  ;;  %7629 = vst [vmem:[#allocation70_spill] sm:$0xff] %v6968_v31 }
 0x31a   : > { %3210 = vmatpush2.bf16.msra.mxu0 %v6936_v59  ;;  %3251 = vmatpush2.bf16.msra.mxu1 %v6938_v51  ;;  %v2445_v51 = vld [vmem:[%s7276_s2 + $0x330] sm:$0xff]  ;;  %7630 = vst [vmem:[#allocation69_spill] sm:$0xff] %v6984_v9  ;;  %7635 = vst [vmem:[#allocation76_spill] sm:$0xff] %v7010_v17 }
 0x31b   : > { %3211 = vmatprep.subr.bf16.mxu0 %v6942_v43  ;;  %3252 = vmatprep.subr.bf16.mxu1 %v6944_v18  ;;  %v6990_v18 = vcombine.high %v2441_v52, %v2445_v51  ;;  %v6992_v43 = vcombine.high %v2442_v29, %v2446_v20  ;;  %v2433_v59 = vld [vmem:[%s7276_s2 + $0x2d0] sm:$0xff]  ;;  %v7008_v45 = vcombine.low %v2441_v52, %v2445_v51  ;;  %v2426_v52 = vld [vmem:[%s7276_s2 + $0x298] sm:$0xff] }
 0x31c   : > { %v2430_v51 = vld [vmem:[%s7276_s2 + $0x2b8] sm:$0xff]  ;;  %v7034_v20 = vcombine.low %v2434_v8, %v2438_v46 }
 0x31d   : > { %7632 = vst [vmem:[#allocation71_spill] sm:$0xff] %v6990_v18  ;;  %7633 = vst [vmem:[#allocation74_spill] sm:$0xff] %v6992_v43 }
 0x31e   : > { %3212 = vmatpush2.bf16.msra.mxu0 %v6960_v6  ;;  %3253 = vmatpush2.bf16.msra.mxu1 %v6962_v47  ;;  %v2437_v47 = vld [vmem:[%s7276_s2 + $0x2f0] sm:$0xff]  ;;  %7634 = vst [vmem:[#allocation73_spill] sm:$0xff] %v7008_v45  ;;  %7639 = vst [vmem:[#allocation79_spill] sm:$0xff] %v7034_v20 }
 0x31f   : > { %3213 = vmatprep.subr.bf16.mxu0 %v6966_v63  ;;  %3254 = vmatprep.subr.bf16.mxu1 %v6968_v31  ;;  %v7014_v31 = vcombine.high %v2433_v59, %v2437_v47  ;;  %v7016_v63 = vcombine.high %v2434_v8, %v2438_v46  ;;  %v2425_v6 = vld [vmem:[%s7276_s2 + $0x290] sm:$0xff]  ;;  %v7032_v29 = vcombine.low %v2433_v59, %v2437_v47  ;;  %v2418_v59 = vld [vmem:[%s7276_s2 + $0x258] sm:$0xff] }
 0x320   : > { %v2422_v47 = vld [vmem:[%s7276_s2 + $0x278] sm:$0xff]  ;;  %v7058_v46 = vcombine.low %v2426_v52, %v2430_v51 }
 0x321   : > { %7636 = vst [vmem:[#allocation75_spill] sm:$0xff] %v7014_v31  ;;  %7637 = vst [vmem:[#allocation77_spill] sm:$0xff] %v7016_v63 }
 0x322   : > { %3214 = vmatpush2.bf16.msra.mxu0 %v6984_v9  ;;  %3255 = vmatpush2.bf16.msra.mxu1 %v6986_v49  ;;  %v2429_v49 = vld [vmem:[%s7276_s2 + $0x2b0] sm:$0xff]  ;;  %7638 = vst [vmem:[#allocation78_spill] sm:$0xff] %v7032_v29 }
 0x323   : > { %3215 = vmatprep.subr.bf16.mxu0 %v6990_v18  ;;  %3256 = vmatprep.subr.bf16.mxu1 %v6992_v43  ;;  %v7038_v43 = vcombine.high %v2425_v6, %v2429_v49  ;;  %v7040_v18 = vcombine.high %v2426_v52, %v2430_v51  ;;  %v2417_v9 = vld [vmem:[%s7276_s2 + $0x250] sm:$0xff]  ;;  %v7056_v8 = vcombine.low %v2425_v6, %v2429_v49  ;;  %v2410_v6 = vld [vmem:[%s7276_s2 + $0x218] sm:$0xff] }
 0x324   : > { %v2414_v49 = vld [vmem:[%s7276_s2 + $0x238] sm:$0xff]  ;;  %v7082_v51 = vcombine.low %v2418_v59, %v2422_v47 }
 0x325   : > { %7640 = vst [vmem:[#allocation80_spill] sm:$0xff] %v7038_v43  ;;  %7641 = vst [vmem:[#allocation81_spill] sm:$0xff] %v7040_v18 }
 0x326   : > { %3216 = vmatpush2.bf16.msra.mxu0 %v7008_v45  ;;  %3257 = vmatpush2.bf16.msra.mxu1 %v7010_v17  ;;  %v2421_v17 = vld [vmem:[%s7276_s2 + $0x270] sm:$0xff]  ;;  %7642 = vst [vmem:[#allocation82_spill] sm:$0xff] %v7056_v8 }
 0x327   : > { %3217 = vmatprep.subr.bf16.mxu0 %v7014_v31  ;;  %3258 = vmatprep.subr.bf16.mxu1 %v7016_v63  ;;  %v7062_v63 = vcombine.high %v2417_v9, %v2421_v17  ;;  %v7064_v31 = vcombine.high %v2418_v59, %v2422_v47  ;;  %v2409_v45 = vld [vmem:[%s7276_s2 + $0x210] sm:$0xff]  ;;  %v7080_v52 = vcombine.low %v2417_v9, %v2421_v17  ;;  %v4911_v59 = vld [vmem:[%s5383_s17 + $0x28] sm:$0xff] }
 0x328   : > { %v3281_v47 = vunpack.c.h.bf16 %v4911_v59 }
 0x32a   : > { %3218 = vmatpush2.bf16.msra.mxu0 %v7032_v29  ;;  %3259 = vmatpush2.bf16.msra.mxu1 %v7034_v20  ;;  %v2413_v20 = vld [vmem:[%s7276_s2 + $0x230] sm:$0xff] }
 0x32b   : > { %3219 = vmatprep.subr.bf16.mxu0 %v7038_v43  ;;  %3260 = vmatprep.subr.bf16.mxu1 %v7040_v18  ;;  %v7086_v18 = vcombine.high %v2409_v45, %v2413_v20  ;;  %v7088_v43 = vcombine.high %v2410_v6, %v2414_v49  ;;  %v7092_v29 = vcombine.low %v2409_v45, %v2413_v20 }
 0x32e   : > { %3220 = vmatpush2.bf16.msra.mxu0 %v7056_v8  ;;  %3261 = vmatpush2.bf16.msra.mxu1 %v7058_v46  ;;  %v7094_v8 = vcombine.low %v2410_v6, %v2414_v49  ;;  %v3280_v49 = vunpack.c.l.bf16 %v4911_v59 }
 0x32f   : > { %3221 = vmatprep.subr.bf16.mxu0 %v7062_v63  ;;  %3262 = vmatprep.subr.bf16.mxu1 %v7064_v31 }
 0x332   : > { %3222 = vmatpush2.bf16.msra.mxu0 %v7080_v52  ;;  %3263 = vmatpush2.bf16.msra.mxu1 %v7082_v51 }
 0x333   : > { %3223 = vmatprep.subr.bf16.mxu0 %v7086_v18  ;;  %3264 = vmatprep.subr.bf16.mxu1 %v7088_v43 }
 0x336   : > { %3224 = vmatpush2.bf16.msra.mxu0 %v7092_v29  ;;  %3265 = vmatpush2.bf16.msra.mxu1 %v7094_v8 }
 0x337   : > { %4119 = vmatprep.subr.bf16.mxu0 %v6325_v37  ;;  %4160 = vmatprep.subr.bf16.mxu1 %v6338_v15  ;;  %v7644_v37 = vld [vmem:[#allocation8_spill] sm:$0xff] }
 0x338   : > { %v7646_v15 = vld [vmem:[#allocation12_spill] sm:$0xff] }
 0x339   : > { %3226 = vmatmul.mubr.bf16.vlgmr.msra.gmra.mxu0 %v6746_v26  ;;  %3267 = vmatmul.mubr.bf16.vlgmr.msra.gmra.mxu1 %v6746_v26 }
 0x33a   : > { %4120 = vmatpush1.bf16.msra.mxu0 %v6323_v13  ;;  %4161 = vmatpush1.bf16.msra.mxu1 %v6336_v16  ;;  %v7643_v13 = vld [vmem:[#allocation9_spill] sm:$0xff]  ;;  %v7645_v16 = vld [vmem:[#allocation10_spill] sm:$0xff] }
 0x33b   : > { %4121 = vmatprep.subr.bf16.mxu0 %v6340_v25  ;;  %4162 = vmatprep.subr.bf16.mxu1 %v6349_v44  ;;  %v7647_v25 = vld [vmem:[#allocation11_spill] sm:$0xff]  ;;  %v7648_v44 = vld [vmem:[#allocation13_spill] sm:$0xff] }
 0x33e   : > { %4122 = vmatpush1.bf16.msra.mxu0 %v6353_v27  ;;  %4163 = vmatpush1.bf16.msra.mxu1 %v6357_v60  ;;  %v7649_v27 = vld [vmem:[#allocation14_spill] sm:$0xff]  ;;  %v7650_v60 = vld [vmem:[#allocation16_spill] sm:$0xff] }
 0x33f   : > { %4123 = vmatprep.subr.bf16.mxu0 %v6371_v38  ;;  %4164 = vmatprep.subr.bf16.mxu1 %v6380_v28  ;;  %v7651_v38 = vld [vmem:[#allocation15_spill] sm:$0xff]  ;;  %v7654_v28 = vld [vmem:[#allocation21_spill] sm:$0xff] }
 0x342   : > { %4124 = vmatpush1.bf16.msra.mxu0 %v6376_v21  ;;  %4165 = vmatpush1.bf16.msra.mxu1 %v6378_v23  ;;  %v7652_v21 = vld [vmem:[#allocation17_spill] sm:$0xff]  ;;  %v7653_v23 = vld [vmem:[#allocation18_spill] sm:$0xff] }
 0x343   : > { %4125 = vmatprep.subr.bf16.mxu0 %v6395_v34  ;;  %4166 = vmatprep.subr.bf16.mxu1 %v6404_v42  ;;  %v7655_v34 = vld [vmem:[#allocation19_spill] sm:$0xff] }
 0x344   : > { %v7658_v42 = vld [vmem:[#allocation23_spill] sm:$0xff] }
 0x346   : > { %4126 = vmatpush1.bf16.msra.mxu0 %v6400_v40  ;;  %4167 = vmatpush1.bf16.msra.mxu1 %v6402_v41  ;;  %v7656_v40 = vld [vmem:[#allocation20_spill] sm:$0xff]  ;;  %v7657_v41 = vld [vmem:[#allocation22_spill] sm:$0xff] }
 0x347   : > { %4127 = vmatprep.subr.bf16.mxu0 %v6419_v50  ;;  %4168 = vmatprep.subr.bf16.mxu1 %v6428_v58  ;;  %v7659_v50 = vld [vmem:[#allocation25_spill] sm:$0xff]  ;;  %v7662_v58 = vld [vmem:[#allocation28_spill] sm:$0xff] }
 0x34a   : > { %4128 = vmatpush1.bf16.msra.mxu0 %v6424_v56  ;;  %4169 = vmatpush1.bf16.msra.mxu1 %v6426_v57  ;;  %v7660_v56 = vld [vmem:[#allocation24_spill] sm:$0xff]  ;;  %v7661_v57 = vld [vmem:[#allocation26_spill] sm:$0xff] }
 0x34b   : > { %4129 = vmatprep.subr.bf16.mxu0 %v6443_v4  ;;  %4170 = vmatprep.subr.bf16.mxu1 %v6452_v12  ;;  %v7663_v4 = vld [vmem:[#allocation27_spill] sm:$0xff]  ;;  %v7666_v12 = vld [vmem:[#allocation32_spill] sm:$0xff] }
 0x34e   : > { %4130 = vmatpush1.bf16.msra.mxu0 %v6448_v10  ;;  %4171 = vmatpush1.bf16.msra.mxu1 %v6450_v11  ;;  %v7664_v10 = vld [vmem:[#allocation30_spill] sm:$0xff]  ;;  %v7665_v11 = vld [vmem:[#allocation29_spill] sm:$0xff] }
 0x34f   : > { %4131 = vmatprep.subr.bf16.mxu0 %v6467_v22  ;;  %4172 = vmatprep.subr.bf16.mxu1 %v6476_v36  ;;  %v7667_v22 = vld [vmem:[#allocation31_spill] sm:$0xff]  ;;  %v7670_v36 = vld [vmem:[#allocation36_spill] sm:$0xff] }
 0x352   : > { %4132 = vmatpush1.bf16.msra.mxu0 %v6472_v32  ;;  %4173 = vmatpush1.bf16.msra.mxu1 %v6474_v35  ;;  %v7668_v32 = vld [vmem:[#allocation34_spill] sm:$0xff]  ;;  %v7669_v35 = vld [vmem:[#allocation33_spill] sm:$0xff] }
 0x353   : > { %4133 = vmatprep.subr.bf16.mxu0 %v6491_v61  ;;  %4174 = vmatprep.subr.bf16.mxu1 %v6500_v7  ;;  %v4910_v61 = vld [vmem:[%s5383_s17 + $0x20] sm:$0xff] }
 0x356   : > { %4134 = vmatpush1.bf16.msra.mxu0 %v6496_v5  ;;  %4175 = vmatpush1.bf16.msra.mxu1 %v6498_v53  ;;  %v3278_v5 = vunpack.c.l.bf16 %v4910_v61  ;;  %v3279_v53 = vunpack.c.h.bf16 %v4910_v61 }
 0x357   : > { %4135 = vmatprep.subr.bf16.mxu0 %v6515_v54  ;;  %4176 = vmatprep.subr.bf16.mxu1 %v6524_v3 }
 0x35a   : > { %4136 = vmatpush2.bf16.msra.mxu0 %v6520_v14  ;;  %4177 = vmatpush2.bf16.msra.mxu1 %v6522_v24 }
 0x35b   : > { %4137 = vmatprep.subr.bf16.mxu0 %v6539_v30  ;;  %4178 = vmatprep.subr.bf16.mxu1 %v6548_v48 }
 0x35e   : > { %4138 = vmatpush2.bf16.msra.mxu0 %v7643_v13  ;;  %4179 = vmatpush2.bf16.msra.mxu1 %v7644_v37 }
 0x35f   : > { %4139 = vmatprep.subr.bf16.mxu0 %v7645_v16  ;;  %4180 = vmatprep.subr.bf16.mxu1 %v7646_v15 }
 0x362   : > { %4140 = vmatpush2.bf16.msra.mxu0 %v7647_v25  ;;  %4181 = vmatpush2.bf16.msra.mxu1 %v7648_v44 }
 0x363   : > { %4141 = vmatprep.subr.bf16.mxu0 %v7649_v27  ;;  %4182 = vmatprep.subr.bf16.mxu1 %v7650_v60 }
 0x366   : > { %4142 = vmatpush2.bf16.msra.mxu0 %v7651_v38  ;;  %4183 = vmatpush2.bf16.msra.mxu1 %v7652_v21 }
 0x367   : > { %4143 = vmatprep.subr.bf16.mxu0 %v7653_v23  ;;  %4184 = vmatprep.subr.bf16.mxu1 %v7654_v28 }
 0x36a   : > { %4144 = vmatpush2.bf16.msra.mxu0 %v7655_v34  ;;  %4185 = vmatpush2.bf16.msra.mxu1 %v7656_v40  ;;  %v7671_v34 = vld [vmem:[#allocation35_spill] sm:$0xff] }
 0x36b   : > { %4145 = vmatprep.subr.bf16.mxu0 %v7657_v41  ;;  %4186 = vmatprep.subr.bf16.mxu1 %v7658_v42 }
 0x36e   : > { %4146 = vmatpush2.bf16.msra.mxu0 %v7659_v50  ;;  %4187 = vmatpush2.bf16.msra.mxu1 %v7660_v56 }
 0x36f   : > { %4147 = vmatprep.subr.bf16.mxu0 %v7661_v57  ;;  %4188 = vmatprep.subr.bf16.mxu1 %v7662_v58  ;;  %v4912_v57 = vld [vmem:[%s5385_s22 + $0x10] sm:$0xff] }
 0x370   : > { %v3289_v58 = vunpack.c.l.bf16 %v4912_v57 }
 0x372   : > { %4148 = vmatpush2.bf16.msra.mxu0 %v7663_v4  ;;  %4189 = vmatpush2.bf16.msra.mxu1 %v7664_v10  ;;  %v3290_v4 = vunpack.c.h.bf16 %v4912_v57  ;;  %v7688_v57 = vld [vmem:[#allocation54_spill] sm:$0xff] }
 0x373   : > { %4149 = vmatprep.subr.bf16.mxu0 %v7665_v11  ;;  %4190 = vmatprep.subr.bf16.mxu1 %v7666_v12 }
 0x376   : > { %4150 = vmatpush2.bf16.msra.mxu0 %v7667_v22  ;;  %4191 = vmatpush2.bf16.msra.mxu1 %v7668_v32 }
 0x377   : > { %4201 = vmatprep.subr.bf16.mxu0 %v7669_v35  ;;  %4242 = vmatprep.subr.bf16.mxu1 %v7670_v36 }
 0x3b9   : > { %v3145_v7 = vpop.f32.mrf.mxu0  ;;  %v3186_v54 = vpop.f32.mrf.mxu1 }
 0x3ba   : > { %v3282_v14 = vadd.f32 %v3278_v5, %v3145_v7  ;;  %v3284_v16 = vadd.f32 %v3280_v49, %v3186_v54 }
 0x3bb   : > { %v3147_v24 = vpop.f32.mrf.mxu0  ;;  %v3188_v3 = vpop.f32.mrf.mxu1 }
 0x3bc   : > { %v4914_v30 = vmul.f32 -1.442695, %v3282_v14  ;;  %v3283_v48 = vadd.f32 %v3279_v53, %v3147_v24  ;;  %v3285_v6 = vadd.f32 %v3281_v47, %v3188_v3  ;;  %v4913_v14 = vld [vmem:[%s5385_s22 + $0x18] sm:$0xff] }
 0x3bd   : > { %v3149_v26 = vpop.f32.mrf.mxu0  ;;  %v3190_v9 = vpop.f32.mrf.mxu1  ;;  %v3292_v24 = vunpack.c.h.bf16 %v4913_v14 }
 0x3be   : > { %5169 = vpow2.f32 %v4914_v30  ;;  %v4915_v45 = vmul.f32 -1.442695, %v3283_v48  ;;  %v4916_v13 = vmul.f32 -1.442695, %v3285_v6  ;;  %v3291_v30 = vunpack.c.l.bf16 %v4913_v14  ;;  %v7703_v14 = vld [vmem:[#allocation67_spill] sm:$0xff] }
 0x3bf   : > { %v3150_v17 = vpop.f32.mrf.mxu0  ;;  %v3191_v20 = vpop.f32.mrf.mxu1 }
 0x3c0   : > { %5171 = vpow2.f32 %v4915_v45 }
 0x3c1   : > { %5173 = vpow2.f32 %v4916_v13 }
 0x3cb   : > { %v5170_v37 = vpop.eup %5169 }
 0x3cc   : > { %v3300_v15 = vadd.f32 1.0, %v5170_v37 }
 0x3cd   : > { %v5172_v25 = vpop.eup %5171 }
 0x3ce   : > { %5175 = vrcp.f32 %v3300_v15  ;;  %v3306_v44 = vadd.f32 1.0, %v5172_v25  ;;  %v5174_v27 = vpop.eup %5173 }
 0x3cf   : > { %5177 = vtanh.f32 %v3284_v16  ;;  %v3313_v23 = vadd.f32 1.0, %v5174_v27 }
 0x3d0   : > { %5179 = vrcp.f32 %v3306_v44 }
 0x3d1   : > { %5181 = vrcp.f32 %v3313_v23  ;;  %v7674_v23 = vld [vmem:[#allocation40_spill] sm:$0xff] }
 0x3db   : > { %v5176_v60 = vpop.eup %5175 }
 0x3dc   : > { %v5178_v38 = vpop.eup %5177 }
 0x3dd   : > { %v5180_v21 = vpop.eup %5179  ;;  %v3317_v28 = vmul.f32 %v5178_v38, %v5176_v60 }
 0x3de   : > { %v3316_v40 = vmul.f32 %v5180_v21, %v7671_v34  ;;  %v5182_v42 = vpop.eup %5181  ;;  %v7673_v21 = vld [vmem:[#allocation37_spill] sm:$0xff]  ;;  %v7683_v34 = vld [vmem:[#allocation47_spill] sm:$0xff] }
 0x3e0   : > { %v7171_v41 = vadd.f32 %v3317_v28, %v3316_v40  ;;  %v7677_v28 = vld [vmem:[#allocation41_spill] sm:$0xff]  ;;  %v7684_v40 = vld [vmem:[#allocation50_spill] sm:$0xff] }
 0x3e2   : > { %5183 = vtanh.f32 %v7171_v41 }
 0x3ef   : > { %v5184_v50 = vpop.eup %5183 }
 0x3f0   : > { %v3320_v56 = vmul.f32 %v5184_v50, %v5182_v42  ;;  %v7685_v42 = vld [vmem:[#allocation49_spill] sm:$0xff]  ;;  %v7686_v50 = vld [vmem:[#allocation52_spill] sm:$0xff] }
 0x3f2   : > { %4920 = vst [vmem:[%s5376_s11 + $0x10] sm:$0xff] %v3320_v56  ;;  %v7182_v38 = vpack.c.bf16 %v3320_v56, %v3320_v56  ;;  %v7687_v56 = vld [vmem:[#allocation51_spill] sm:$0xff] }
 0x3f9   : > { %v3227_v10 = vpop.f32.mrf.mxu0  ;;  %v3268_v11 = vpop.f32.mrf.mxu1 }
 0x3fa   : > { %v3293_v12 = vadd.f32 %v3289_v58, %v3227_v10  ;;  %v3295_v9 = vadd.f32 %v3291_v30, %v3268_v11  ;;  %v7689_v58 = vld [vmem:[#allocation53_spill] sm:$0xff]  ;;  %v7691_v10 = vld [vmem:[#allocation55_spill] sm:$0xff]  ;;  %v7692_v11 = vld [vmem:[#allocation58_spill] sm:$0xff] }
 0x3fb   : > { %v3229_v22 = vpop.f32.mrf.mxu0  ;;  %v3270_v32 = vpop.f32.mrf.mxu1  ;;  %v7706_v30 = vld [vmem:[#allocation72_spill] sm:$0xff] }
 0x3fc   : > { %v4917_v35 = vmul.f32 -1.442695, %v3293_v12  ;;  %v3294_v36 = vadd.f32 %v3290_v4, %v3229_v22  ;;  %v3296_v3 = vadd.f32 %v3292_v24, %v3270_v32  ;;  %v7690_v4 = vld [vmem:[#allocation56_spill] sm:$0xff]  ;;  %v7693_v12 = vld [vmem:[#allocation57_spill] sm:$0xff]  ;;  %v7695_v32 = vld [vmem:[#allocation59_spill] sm:$0xff] }
 0x3fd   : > { %v3231_v61 = vpop.f32.mrf.mxu0  ;;  %v3272_v5 = vpop.f32.mrf.mxu1  ;;  %v7694_v22 = vld [vmem:[#allocation60_spill] sm:$0xff]  ;;  %v7704_v24 = vld [vmem:[#allocation70_spill] sm:$0xff] }
 0x3fe   : > { %5185 = vpow2.f32 %v4917_v35  ;;  %v4918_v53 = vmul.f32 -1.442695, %v3294_v36  ;;  %v4919_v48 = vmul.f32 -1.442695, %v3296_v3  ;;  %v7696_v35 = vld [vmem:[#allocation62_spill] sm:$0xff]  ;;  %v7697_v36 = vld [vmem:[#allocation61_spill] sm:$0xff] }
 0x3ff   : > { %v3232_v7 = vpop.f32.mrf.mxu0  ;;  %v3273_v54 = vpop.f32.mrf.mxu1  ;;  %v7698_v61 = vld [vmem:[#allocation64_spill] sm:$0xff]  ;;  %v7699_v5 = vld [vmem:[#allocation63_spill] sm:$0xff]  ;;  %v7705_v3 = vld [vmem:[#allocation69_spill] sm:$0xff] }
 0x400   : > { %5187 = vpow2.f32 %v4918_v53  ;;  %v7700_v53 = vld [vmem:[#allocation66_spill] sm:$0xff]  ;;  %v7701_v7 = vld [vmem:[#allocation65_spill] sm:$0xff]  ;;  %v7702_v54 = vld [vmem:[#allocation68_spill] sm:$0xff] }
 0x401   : > { %5189 = vpow2.f32 %v4919_v48  ;;  %v7707_v48 = vld [vmem:[#allocation71_spill] sm:$0xff] }
 0x40b   : > { %v5186_v26 = vpop.eup %5185 }
 0x40c   : > { %v3324_v45 = vadd.f32 1.0, %v5186_v26  ;;  %v7708_v26 = vld [vmem:[#allocation74_spill] sm:$0xff] }
 0x40d   : > { %v5188_v17 = vpop.eup %5187 }
 0x40e   : > { %5191 = vrcp.f32 %v3324_v45  ;;  %v3330_v20 = vadd.f32 1.0, %v5188_v17  ;;  %v5190_v59 = vpop.eup %5189  ;;  %v7710_v45 = vld [vmem:[#allocation76_spill] sm:$0xff]  ;;  %v7711_v17 = vld [vmem:[#allocation75_spill] sm:$0xff] }
 0x40f   : > { %5193 = vtanh.f32 %v3295_v9  ;;  %v3337_v13 = vadd.f32 1.0, %v5190_v59  ;;  %v7709_v9 = vld [vmem:[#allocation73_spill] sm:$0xff]  ;;  %v7713_v59 = vld [vmem:[#allocation78_spill] sm:$0xff] }
 0x410   : > { %5195 = vrcp.f32 %v3330_v20  ;;  %v7712_v20 = vld [vmem:[#allocation77_spill] sm:$0xff] }
 0x411   : > { %5197 = vrcp.f32 %v3337_v13  ;;  %v7717_v13 = vld [vmem:[#allocation82_spill] sm:$0xff] }
 0x41b   : > { %v5192_v47 = vpop.eup %5191 }
 0x41c   : > { %v5194_v6 = vpop.eup %5193 }
 0x41d   : > { %v5196_v49 = vpop.eup %5195  ;;  %v3341_v37 = vmul.f32 %v5194_v6, %v5192_v47  ;;  %v7714_v47 = vld [vmem:[#allocation79_spill] sm:$0xff]  ;;  %v7715_v6 = vld [vmem:[#allocation80_spill] sm:$0xff] }
 0x41e   : > { %v3340_v16 = vmul.f32 %v5196_v49, %v6730_v62  ;;  %v5198_v25 = vpop.eup %5197  ;;  %v7672_v62 = vld [vmem:[#allocation38_spill] sm:$0xff]  ;;  %v7716_v49 = vld [vmem:[#allocation81_spill] sm:$0xff] }
 0x420   : > { %v7178_v15 = vadd.f32 %v3341_v37, %v3340_v16 }
 0x422   : > { %5199 = vtanh.f32 %v7178_v15 }
 0x42f   : > { %v5200_v44 = vpop.eup %5199 }
 0x430   : > { %v3344_v27 = vmul.f32 %v5200_v44, %v5198_v25 }
 0x432   : > { %4921 = vst [vmem:[%s5381_s15 + $0x8] sm:$0xff] %v3344_v27  ;;  %v3350_v60 = vpack.c.bf16 %v3344_v27, %v3344_v27 }
 0x434   : > { %4151 = vmatprep.mubr.bf16.mxu0 %v3350_v60  ;;  %4192 = vmatprep.mubr.bf16.mxu1 %v3350_v60 }
 0x435   : > { %4152 = vmatmul.mubr.bf16.vlgmr.msra.gmra.mxu0 %v7182_v38  ;;  %4193 = vmatmul.mubr.bf16.vlgmr.msra.gmra.mxu1 %v7182_v38 }
 0x436   : > { %4202 = vmatpush1.bf16.msra.mxu0 %v6713_v2  ;;  %4243 = vmatpush1.bf16.msra.mxu1 %v6715_v55  ;;  %v7675_v2 = vld [vmem:[#allocation39_spill] sm:$0xff]  ;;  %v7676_v55 = vld [vmem:[#allocation42_spill] sm:$0xff] }
 0x437   : > { %4233 = vmatprep.mubr.bf16.mxu0 %v3350_v60  ;;  %4274 = vmatprep.mubr.bf16.mxu1 %v3350_v60 }
 0x438   : > { %4203 = vmatprep.subr.bf16.mxu0 %v6751_v1  ;;  %4244 = vmatprep.subr.bf16.mxu1 %v6753_v39  ;;  %v7678_v1 = vld [vmem:[#allocation44_spill] sm:$0xff]  ;;  %v7679_v39 = vld [vmem:[#allocation43_spill] sm:$0xff] }
 0x43a   : > { %4204 = vmatpush1.bf16.msra.mxu0 %v6768_v33  ;;  %4245 = vmatpush1.bf16.msra.mxu1 %v6770_v19  ;;  %v7680_v33 = vld [vmem:[#allocation46_spill] sm:$0xff]  ;;  %v7681_v19 = vld [vmem:[#allocation45_spill] sm:$0xff] }
 0x43b   : > { %4205 = vmatprep.subr.bf16.mxu0 %v6772_v0  ;;  %4246 = vmatprep.subr.bf16.mxu1 %v7672_v62  ;;  %v7682_v0 = vld [vmem:[#allocation48_spill] sm:$0xff]  ;;  %v5051_v62 = vld [vmem:[%s5383_s17 + $0x38] sm:$0xff] }
 0x43e   : > { %4206 = vmatpush1.bf16.msra.mxu0 %v7673_v21  ;;  %4247 = vmatpush1.bf16.msra.mxu1 %v7674_v23  ;;  %v4288_v23 = vunpack.c.l.bf16 %v5051_v62 }
 0x43f   : > { %4207 = vmatprep.subr.bf16.mxu0 %v7675_v2  ;;  %4248 = vmatprep.subr.bf16.mxu1 %v7676_v55 }
 0x442   : > { %4208 = vmatpush1.bf16.msra.mxu0 %v7677_v28  ;;  %4249 = vmatpush1.bf16.msra.mxu1 %v7678_v1 }
 0x443   : > { %4209 = vmatprep.subr.bf16.mxu0 %v7679_v39  ;;  %4250 = vmatprep.subr.bf16.mxu1 %v7680_v33 }
 0x446   : > { %4210 = vmatpush1.bf16.msra.mxu0 %v7681_v19  ;;  %4251 = vmatpush1.bf16.msra.mxu1 %v7682_v0 }
 0x447   : > { %4211 = vmatprep.subr.bf16.mxu0 %v7683_v34  ;;  %4252 = vmatprep.subr.bf16.mxu1 %v7684_v40 }
 0x44a   : > { %4212 = vmatpush1.bf16.msra.mxu0 %v7685_v42  ;;  %4253 = vmatpush1.bf16.msra.mxu1 %v7686_v50 }
 0x44b   : > { %4213 = vmatprep.subr.bf16.mxu0 %v7687_v56  ;;  %4254 = vmatprep.subr.bf16.mxu1 %v7688_v57 }
 0x44e   : > { %4214 = vmatpush1.bf16.msra.mxu0 %v7689_v58  ;;  %4255 = vmatpush1.bf16.msra.mxu1 %v7690_v4 }
 0x44f   : > { %4215 = vmatprep.subr.bf16.mxu0 %v7691_v10  ;;  %4256 = vmatprep.subr.bf16.mxu1 %v7692_v11  ;;  %v4294_v11 = vld [vmem:[%s5385_s22] sm:$0xff] }
 0x452   : > { %4216 = vmatpush1.bf16.msra.mxu0 %v7693_v12  ;;  %4257 = vmatpush1.bf16.msra.mxu1 %v7694_v22  ;;  %v4296_v12 = vunpack.c.l.bf16 %v4294_v11  ;;  %v4297_v22 = vunpack.c.h.bf16 %v4294_v11 }
 0x453   : > { %4217 = vmatprep.subr.bf16.mxu0 %v7695_v32  ;;  %4258 = vmatprep.subr.bf16.mxu1 %v7696_v35 }
 0x456   : > { %4218 = vmatpush2.bf16.msra.mxu0 %v7697_v36  ;;  %4259 = vmatpush2.bf16.msra.mxu1 %v7698_v61 }
 0x457   : > { %4219 = vmatprep.subr.bf16.mxu0 %v7699_v5  ;;  %4260 = vmatprep.subr.bf16.mxu1 %v7700_v53 }
 0x45a   : > { %4220 = vmatpush2.bf16.msra.mxu0 %v7701_v7  ;;  %4261 = vmatpush2.bf16.msra.mxu1 %v7702_v54 }
 0x45b   : > { %4221 = vmatprep.subr.bf16.mxu0 %v7703_v14  ;;  %4262 = vmatprep.subr.bf16.mxu1 %v7704_v24 }
 0x45e   : > { %4222 = vmatpush2.bf16.msra.mxu0 %v7705_v3  ;;  %4263 = vmatpush2.bf16.msra.mxu1 %v7706_v30  ;;  %v4295_v30 = vld [vmem:[%s5385_s22 + $0x8] sm:$0xff] }
 0x45f   : > { %4223 = vmatprep.subr.bf16.mxu0 %v7707_v48  ;;  %4264 = vmatprep.subr.bf16.mxu1 %v7708_v26  ;;  %v4299_v48 = vunpack.c.h.bf16 %v4295_v30 }
 0x462   : > { %4224 = vmatpush2.bf16.msra.mxu0 %v7709_v9  ;;  %4265 = vmatpush2.bf16.msra.mxu1 %v7710_v45  ;;  %v4298_v9 = vunpack.c.l.bf16 %v4295_v30 }
 0x463   : > { %4225 = vmatprep.subr.bf16.mxu0 %v7711_v17  ;;  %4266 = vmatprep.subr.bf16.mxu1 %v7712_v20 }
 0x466   : > { %4226 = vmatpush2.bf16.msra.mxu0 %v7713_v59  ;;  %4267 = vmatpush2.bf16.msra.mxu1 %v7714_v47 }
 0x467   : > { %4227 = vmatprep.subr.bf16.mxu0 %v7715_v6  ;;  %4268 = vmatprep.subr.bf16.mxu1 %v7716_v49 }
 0x46a   : > { %4228 = vmatpush2.bf16.msra.mxu0 %v7717_v13  ;;  %4269 = vmatpush2.bf16.msra.mxu1 %v7058_v46  ;;  %v5050_v46 = vld [vmem:[%s5383_s17 + $0x30] sm:$0xff] }
 0x46b   : > { %4229 = vmatprep.subr.bf16.mxu0 %v7062_v63  ;;  %4270 = vmatprep.subr.bf16.mxu1 %v7064_v31  ;;  %v4286_v63 = vunpack.c.l.bf16 %v5050_v46  ;;  %v4287_v31 = vunpack.c.h.bf16 %v5050_v46 }
 0x46e   : > { %4230 = vmatpush2.bf16.msra.mxu0 %v7080_v52  ;;  %4271 = vmatpush2.bf16.msra.mxu1 %v7082_v51 }
 0x46f   : > { %4231 = vmatprep.subr.bf16.mxu0 %v7086_v18  ;;  %4272 = vmatprep.subr.bf16.mxu1 %v7088_v43 }
 0x472   : > { %4232 = vmatpush2.bf16.msra.mxu0 %v7092_v29  ;;  %4273 = vmatpush2.bf16.msra.mxu1 %v7094_v8 }
 0x475   : > { %4234 = vmatmul.mubr.bf16.vlgmr.msra.gmra.mxu0 %v7182_v38  ;;  %4275 = vmatmul.mubr.bf16.vlgmr.msra.gmra.mxu1 %v7182_v38  ;;  %v4289_v38 = vunpack.c.h.bf16 %v5051_v62 }
 0x4f5   : > { %v4153_v37 = vpop.f32.mrf.mxu0  ;;  %v4194_v52 = vpop.f32.mrf.mxu1 }
 0x4f6   : > { %v4290_v16 = vadd.f32 %v4286_v63, %v4153_v37  ;;  %v4292_v28 = vadd.f32 %v4288_v23, %v4194_v52 }
 0x4f7   : > { %v4155_v51 = vpop.f32.mrf.mxu0  ;;  %v4196_v25 = vpop.f32.mrf.mxu1 }
 0x4f8   : > { %v5052_v18 = vmul.f32 -1.442695, %v4290_v16  ;;  %v4291_v44 = vadd.f32 %v4287_v31, %v4155_v51  ;;  %v4293_v21 = vadd.f32 %v4289_v38, %v4196_v25 }
 0x4f9   : > { %v4157_v43 = vpop.f32.mrf.mxu0  ;;  %v4198_v27 = vpop.f32.mrf.mxu1 }
 0x4fa   : > { %5201 = vpow2.f32 %v5052_v18  ;;  %v5053_v29 = vmul.f32 -1.442695, %v4291_v44  ;;  %v5054_v2 = vmul.f32 -1.442695, %v4293_v21 }
 0x4fb   : > { %v4158_v8 = vpop.f32.mrf.mxu0  ;;  %v4199_v60 = vpop.f32.mrf.mxu1 }
 0x4fc   : > { %5203 = vpow2.f32 %v5053_v29 }
 0x4fd   : > { %5205 = vpow2.f32 %v5054_v2 }
 0x507   : > { %v5202_v55 = vpop.eup %5201 }
 0x508   : > { %v4307_v1 = vadd.f32 1.0, %v5202_v55 }
 0x509   : > { %v5204_v39 = vpop.eup %5203 }
 0x50a   : > { %5207 = vrcp.f32 %v4307_v1  ;;  %v4313_v33 = vadd.f32 1.0, %v5204_v39  ;;  %v5206_v19 = vpop.eup %5205 }
 0x50b   : > { %5209 = vtanh.f32 %v4292_v28  ;;  %v4320_v42 = vadd.f32 1.0, %v5206_v19 }
 0x50c   : > { %5211 = vrcp.f32 %v4313_v33 }
 0x50d   : > { %5213 = vrcp.f32 %v4320_v42 }
 0x517   : > { %v5208_v0 = vpop.eup %5207 }
 0x518   : > { %v5210_v34 = vpop.eup %5209 }
 0x519   : > { %v5212_v40 = vpop.eup %5211  ;;  %v4324_v50 = vmul.f32 %v5210_v34, %v5208_v0 }
 0x51a   : > { %v4323_v56 = vmul.f32 %v5212_v40, %v7171_v41  ;;  %v5214_v58 = vpop.eup %5213 }
 0x51c   : > { %v4325_v57 = vadd.f32 %v4324_v50, %v4323_v56 }
 0x51e   : > { %5215 = vtanh.f32 %v4325_v57  ;;  %4356 = vst [vmem:[#allocation3] sm:$0xff] %v4325_v57 }
 0x52b   : > { %v5216_v4 = vpop.eup %5215 }
 0x52c   : > { %v4327_v10 = vmul.f32 %v5216_v4, %v5214_v58 }
 0x52e   : > { %5058 = vst [vmem:[%s5376_s11 + $0x18] sm:$0xff] %v4327_v10  ;;  %4355 = vst [vmem:[#allocation2] sm:$0xff] %v4327_v10 }
 0x535   : > { %v4235_v32 = vpop.f32.mrf.mxu0  ;;  %v4276_v35 = vpop.f32.mrf.mxu1 }
 0x536   : > { %v4300_v36 = vadd.f32 %v4296_v12, %v4235_v32  ;;  %v4302_v20 = vadd.f32 %v4298_v9, %v4276_v35 }
 0x537   : > { %v4237_v61 = vpop.f32.mrf.mxu0  ;;  %v4278_v5 = vpop.f32.mrf.mxu1 }
 0x538   : > { %v5055_v53 = vmul.f32 -1.442695, %v4300_v36  ;;  %v4301_v41 = vadd.f32 %v4297_v22, %v4237_v61  ;;  %v4303_v26 = vadd.f32 %v4299_v48, %v4278_v5 }
 0x539   : > { %v4239_v7 = vpop.f32.mrf.mxu0  ;;  %v4280_v54 = vpop.f32.mrf.mxu1 }
 0x53a   : > { %5217 = vpow2.f32 %v5055_v53  ;;  %v5056_v14 = vmul.f32 -1.442695, %v4301_v41  ;;  %v5057_v45 = vmul.f32 -1.442695, %v4303_v26 }
 0x53b   : > { %v4240_v24 = vpop.f32.mrf.mxu0  ;;  %v4281_v3 = vpop.f32.mrf.mxu1 }
 0x53c   : > { %5219 = vpow2.f32 %v5056_v14 }
 0x53d   : > { %5221 = vpow2.f32 %v5057_v45 }
 0x547   : > { %v5218_v17 = vpop.eup %5217 }
 0x548   : > { %v4331_v59 = vadd.f32 1.0, %v5218_v17 }
 0x549   : > { %v5220_v47 = vpop.eup %5219 }
 0x54a   : > { %5223 = vrcp.f32 %v4331_v59  ;;  %v4337_v6 = vadd.f32 1.0, %v5220_v47  ;;  %v5222_v49 = vpop.eup %5221 }
 0x54b   : > { %5225 = vtanh.f32 %v4302_v20  ;;  %v4344_v31 = vadd.f32 1.0, %v5222_v49 }
 0x54c   : > { %5227 = vrcp.f32 %v4337_v6 }
 0x54d   : > { %5229 = vrcp.f32 %v4344_v31 }
 0x557   : > { %v5224_v13 = vpop.eup %5223 }
 0x558   : > { %v5226_v46 = vpop.eup %5225 }
 0x559   : > { %v5228_v63 = vpop.eup %5227  ;;  %v4348_v37 = vmul.f32 %v5226_v46, %v5224_v13 }
 0x55a   : > { %v4347_v52 = vmul.f32 %v5228_v63, %v7178_v15  ;;  %v5230_v51 = vpop.eup %5229 }
 0x55c   : > { %v4349_v16 = vadd.f32 %v4348_v37, %v4347_v52 }
 0x55e   : > { %5231 = vtanh.f32 %v4349_v16  ;;  %4358 = vst [vmem:[#allocation5] sm:$0xff] %v4349_v16 }
 0x56b   : > { %v5232_v25 = vpop.eup %5231 }
 0x56c   : > { %v4351_v18 = vmul.f32 %v5232_v25, %v5230_v51 }
 0x56e   : > { %4354 = vst [vmem:[%s5381_s15] sm:$0xff] %v4351_v18  ;;  %4357 = vst [vmem:[#allocation4] sm:$0xff] %v4351_v18 }
 0x56f PF: > { %p12_p0 = scmp.ge.s32.totalorder %s5328_s21, 4   ;;  %s7718_s15 = smov %s5259_s16 }
 0x570   : > { %s7719_s16 = smov %s5347_s29  ;;  %s7720_s17 = smov %s5267_s18 }
 0x571   : > { %s7721_s18 = smov %s5338_s25  ;;  %s7722_s19 = smov %s5328_s21 }
 0x572   :  { %14 = sbr.rel (!%p12_p0) target bundleno = 3 (0x3), region = 149 }

</bundles_post_ra>
